<compile_context>
chip_gen: v5e
topology: v5e:2x2
jax: 0.10.0
libtpu: 0.0.40
codegen_flags: <defaults>
</compile_context>

<pallas_src>
import functools

import jax
import jax.numpy as jnp
from jax.experimental import pallas as pl
from jax.experimental.pallas import tpu as pltpu


def gtconv_mix_kernel(f1_ref, f2_ref, a_ref, a1_ref, a2_ref, *, c_in, c_out):
    """GTConv for both convs in a single pass over A.

    f1_ref / f2_ref : SMEM [C_out, C_in]   softmaxed mixing weights (conv1 / conv2)
    a_ref           : VMEM [C_in, tm, tn]  tile of the adjacency stack
    a1_ref / a2_ref : VMEM [C_out, tm, tn] premixed output tiles
    """
    a = a_ref[...]
    for i in range(c_out):          # c_out, c_in are small compile-time constants
        m1 = f1_ref[i, 0] * a[0]
        m2 = f2_ref[i, 0] * a[0]
        for c in range(1, c_in):
            m1 = m1 + f1_ref[i, c] * a[c]
            m2 = m2 + f2_ref[i, c] * a[c]
        a1_ref[i] = m1
        a2_ref[i] = m2


def gtlayer_matmul_kernel(a1_ref, a2_ref, o_ref):
    """H_i[m, n] += A1_i[m, k] @ A2_i[k, n].

    The output block index (i, m, n) is constant across the innermost k axis, so the
    f32 output block stays resident in VMEM and we accumulate into it directly
    (no scratch accumulator, no extra copy/cast).
    """
    k = pl.program_id(3)

    @pl.when(k == 0)
    def _():
        o_ref[...] = jnp.zeros_like(o_ref)

    o_ref[0] += jnp.dot(
        a1_ref[0], a2_ref[0],
        preferred_element_type=jnp.float32,
        precision=jax.lax.Precision.HIGH,   # bf16x3: ~f32 accuracy, ~2x fewer MXU passes than HIGHEST
    )


def _pick_tile(n, cap):
    """Largest tile <= cap that divides n; full extent for small n (collapses the grid)."""
    if n <= cap:
        return n                     # single full-extent block (allowed by BlockSpec rules)
    for t in range(cap, 127, -128):
        if n % t == 0:
            return t
    # TODO(synk): pad N up to a multiple of 128 for arbitrary graph sizes.
    return n


def gtlayer_forward(A, w1, w2, *, mix_tile_cap=256, mm_tile_cap=512):
    """Dense GTLayer(first=True) forward.

    A  : [C_in, N, N]   dense adjacency stack
    w1 : [C_out, C_in]  conv1.weight
    w2 : [C_out, C_in]  conv2.weight
    returns (H [C_out, N, N], [softmax(w1), softmax(w2)])
    """
    c_in, n, _ = A.shape
    c_out = w1.shape[0]
    A = A.astype(jnp.float32)

    # Tiny parameter prep (glue): softmax over in_channels.
    f1 = jax.nn.softmax(w1.astype(jnp.float32), axis=1)
    f2 = jax.nn.softmax(w2.astype(jnp.float32), axis=1)

    # ---------------- Stage 1: premix A1 / A2 (GTConv, single read of A) ----------------
    tmm = _pick_tile(n, mix_tile_cap)
    tmn = _pick_tile(n, mix_tile_cap)
    assert n % tmm == 0 and n % tmn == 0

    A1, A2 = pl.pallas_call(
        functools.partial(gtconv_mix_kernel, c_in=c_in, c_out=c_out),
        out_shape=(
            jax.ShapeDtypeStruct((c_out, n, n), jnp.float32),
            jax.ShapeDtypeStruct((c_out, n, n), jnp.float32),
        ),
        grid_spec=pltpu.PrefetchScalarGridSpec(
            num_scalar_prefetch=0,
            grid=(n // tmm, n // tmn),
            in_specs=[
                pl.BlockSpec(memory_space=pltpu.MemorySpace.SMEM),            # f1 (small scalars)
                pl.BlockSpec(memory_space=pltpu.MemorySpace.SMEM),            # f2 (small scalars)
                pl.BlockSpec((c_in, tmm, tmn), lambda m, nn_: (0, m, nn_)),   # A tile
            ],
            out_specs=[
                pl.BlockSpec((c_out, tmm, tmn), lambda m, nn_: (0, m, nn_)),  # A1 tile
                pl.BlockSpec((c_out, tmm, tmn), lambda m, nn_: (0, m, nn_)),  # A2 tile
            ],
        ),
        compiler_params=pltpu.CompilerParams(
            dimension_semantics=("parallel", "parallel"),
            vmem_limit_bytes=32 * 1024 * 1024,
        ),
        cost_estimate=pl.CostEstimate(
            flops=4 * c_out * c_in * n * n,
            transcendentals=0,
            bytes_accessed=(c_in + 2 * c_out) * n * n * 4,
        ),
    )(f1, f2, A)

    # ---------------- Stage 2: batched GEMM  H_i = A1_i @ A2_i (spspmm dense equiv.) ----
    t = _pick_tile(n, mm_tile_cap)
    tm = tn = tk = t
    assert n % t == 0
    grid = (c_out, n // tm, n // tn, n // tk)

    gemm_bytes = (c_out * (n // tm) * (n // tn) * (n // tk) * (tm * tk + tk * tn) * 4
                  + c_out * n * n * 4)

    H = pl.pallas_call(
        gtlayer_matmul_kernel,
        out_shape=jax.ShapeDtypeStruct((c_out, n, n), jnp.float32),
        grid_spec=pltpu.PrefetchScalarGridSpec(
            num_scalar_prefetch=0,
            grid=grid,
            in_specs=[
                pl.BlockSpec((1, tm, tk), lambda i, m, j, k: (i, m, k)),   # A1_i tile (LHS)
                pl.BlockSpec((1, tk, tn), lambda i, m, j, k: (i, k, j)),   # A2_i tile (RHS)
            ],
            out_specs=pl.BlockSpec((1, tm, tn), lambda i, m, j, k: (i, m, j)),
        ),
        compiler_params=pltpu.CompilerParams(
            # Leading c_out axis is "parallel": on v7x the two TensorCores each take half
            # of the output channels; k is the reduction axis and stays innermost/"arbitrary".
            dimension_semantics=("parallel", "parallel", "parallel", "arbitrary"),
            vmem_limit_bytes=32 * 1024 * 1024,
        ),
        cost_estimate=pl.CostEstimate(
            flops=2 * c_out * n * n * n,
            transcendentals=0,
            bytes_accessed=gemm_bytes,
        ),
    )(A1, A2)

    return H, [f1, f2]


if __name__ == "__main__":
    in_channels = 4      # number of edge types / input channels
    out_channels = 2
    num_nodes = 256

    key = jax.random.PRNGKey(0)
    # Dense stand-in for the list of sparse adjacency matrices A = [(edge_index, edge_value), ...]
    A = jax.random.uniform(key, (in_channels, num_nodes, num_nodes), dtype=jnp.float32)

    # GTConv.reset_parameters: nn.init.constant_(weight, 1); bias=None; scale=0.1 (unused in fwd)
    w1 = jnp.ones((out_channels, in_channels), jnp.float32)
    w2 = jnp.ones((out_channels, in_channels), jnp.float32)

    H, W = gtlayer_forward(A, w1, w2)
    H = jax.block_until_ready(H)

    # Pure-JAX reference of the same dense semantics (full f32 accuracy).
    f1 = jax.nn.softmax(w1, axis=1)
    f2 = jax.nn.softmax(w2, axis=1)
    A1_ref = jnp.einsum("oc,cmn->omn", f1, A, precision="highest")
    A2_ref = jnp.einsum("oc,cmn->omn", f2, A, precision="highest")
    H_ref = jnp.einsum("omk,okn->omn", A1_ref, A2_ref, precision="highest")

    assert H.shape == (out_channels, num_nodes, num_nodes)
    assert len(W) == 2 and W[0].shape == (out_channels, in_channels)
    assert jnp.allclose(H, H_ref, rtol=1e-4, atol=1e-4), float(jnp.abs(H - H_ref).max())
    print("KERNEL_OK")
</pallas_src>

<mosaic_0001>
module attributes {stable_mosaic.version = 11 : i64} {
  func.func @gtconv_mix_kernel(%arg0: i32, %arg1: i32, %arg2: memref<2x4xf32, #tpu.memory_space<smem>>, %arg3: memref<2x4xf32, #tpu.memory_space<smem>>, %arg4: memref<4x256x256xf32, #tpu.memory_space<vmem>>, %arg5: memref<2x256x256xf32, #tpu.memory_space<vmem>>, %arg6: memref<2x256x256xf32, #tpu.memory_space<vmem>>) attributes {dimension_semantics = [#tpu.dimension_semantics<parallel>, #tpu.dimension_semantics<parallel>], iteration_bounds = array<i64: 1, 1>, scalar_prefetch = 0 : i64, scratch_operands = 0 : i64, tpu.core_type = #tpu.core_type<tc>, window_params = [{transform_indices = @transform_0, window_bounds = array<i64: 2, 4>}, {transform_indices = @transform_1, window_bounds = array<i64: 2, 4>}, {transform_indices = @transform_2, window_bounds = array<i64: 4, 256, 256>}, {transform_indices = @transform_3, window_bounds = array<i64: 2, 256, 256>}, {transform_indices = @transform_4, window_bounds = array<i64: 2, 256, 256>}]} {
    %c0 = arith.constant 0 : index
    %c0_0 = arith.constant 0 : index
    %c0_1 = arith.constant 0 : index
    %0 = vector.load %arg4[%c0, %c0_0, %c0_1] : memref<4x256x256xf32, #tpu.memory_space<vmem>>, vector<4x256x256xf32>
    %c0_2 = arith.constant 0 : index
    %c0_3 = arith.constant 0 : index
    %1 = memref.load %arg2[%c0_2, %c0_3] : memref<2x4xf32, #tpu.memory_space<smem>>
    %2 = vector.extract_strided_slice %0 {offsets = [0, 0, 0], sizes = [1, 256, 256], strides = [1, 1, 1]} : vector<4x256x256xf32> to vector<1x256x256xf32>
    %3 = vector.shape_cast %2 : vector<1x256x256xf32> to vector<256x256xf32>
    %4 = vector.broadcast %1 : f32 to vector<256x256xf32>
    %5 = arith.mulf %4, %3 : vector<256x256xf32>
    %c0_4 = arith.constant 0 : index
    %c0_5 = arith.constant 0 : index
    %6 = memref.load %arg3[%c0_4, %c0_5] : memref<2x4xf32, #tpu.memory_space<smem>>
    %7 = vector.extract_strided_slice %0 {offsets = [0, 0, 0], sizes = [1, 256, 256], strides = [1, 1, 1]} : vector<4x256x256xf32> to vector<1x256x256xf32>
    %8 = vector.shape_cast %7 : vector<1x256x256xf32> to vector<256x256xf32>
    %9 = vector.broadcast %6 : f32 to vector<256x256xf32>
    %10 = arith.mulf %9, %8 : vector<256x256xf32>
    %c0_6 = arith.constant 0 : index
    %c1 = arith.constant 1 : index
    %11 = memref.load %arg2[%c0_6, %c1] : memref<2x4xf32, #tpu.memory_space<smem>>
    %12 = vector.extract_strided_slice %0 {offsets = [1, 0, 0], sizes = [1, 256, 256], strides = [1, 1, 1]} : vector<4x256x256xf32> to vector<1x256x256xf32>
    %13 = vector.shape_cast %12 : vector<1x256x256xf32> to vector<256x256xf32>
    %14 = vector.broadcast %11 : f32 to vector<256x256xf32>
    %15 = arith.mulf %14, %13 : vector<256x256xf32>
    %16 = arith.addf %5, %15 : vector<256x256xf32>
    %c0_7 = arith.constant 0 : index
    %c1_8 = arith.constant 1 : index
    %17 = memref.load %arg3[%c0_7, %c1_8] : memref<2x4xf32, #tpu.memory_space<smem>>
    %18 = vector.extract_strided_slice %0 {offsets = [1, 0, 0], sizes = [1, 256, 256], strides = [1, 1, 1]} : vector<4x256x256xf32> to vector<1x256x256xf32>
    %19 = vector.shape_cast %18 : vector<1x256x256xf32> to vector<256x256xf32>
    %20 = vector.broadcast %17 : f32 to vector<256x256xf32>
    %21 = arith.mulf %20, %19 : vector<256x256xf32>
    %22 = arith.addf %10, %21 : vector<256x256xf32>
    %c0_9 = arith.constant 0 : index
    %c2 = arith.constant 2 : index
    %23 = memref.load %arg2[%c0_9, %c2] : memref<2x4xf32, #tpu.memory_space<smem>>
    %24 = vector.extract_strided_slice %0 {offsets = [2, 0, 0], sizes = [1, 256, 256], strides = [1, 1, 1]} : vector<4x256x256xf32> to vector<1x256x256xf32>
    %25 = vector.shape_cast %24 : vector<1x256x256xf32> to vector<256x256xf32>
    %26 = vector.broadcast %23 : f32 to vector<256x256xf32>
    %27 = arith.mulf %26, %25 : vector<256x256xf32>
    %28 = arith.addf %16, %27 : vector<256x256xf32>
    %c0_10 = arith.constant 0 : index
    %c2_11 = arith.constant 2 : index
    %29 = memref.load %arg3[%c0_10, %c2_11] : memref<2x4xf32, #tpu.memory_space<smem>>
    %30 = vector.extract_strided_slice %0 {offsets = [2, 0, 0], sizes = [1, 256, 256], strides = [1, 1, 1]} : vector<4x256x256xf32> to vector<1x256x256xf32>
    %31 = vector.shape_cast %30 : vector<1x256x256xf32> to vector<256x256xf32>
    %32 = vector.broadcast %29 : f32 to vector<256x256xf32>
    %33 = arith.mulf %32, %31 : vector<256x256xf32>
    %34 = arith.addf %22, %33 : vector<256x256xf32>
    %c0_12 = arith.constant 0 : index
    %c3 = arith.constant 3 : index
    %35 = memref.load %arg2[%c0_12, %c3] : memref<2x4xf32, #tpu.memory_space<smem>>
    %36 = vector.extract_strided_slice %0 {offsets = [3, 0, 0], sizes = [1, 256, 256], strides = [1, 1, 1]} : vector<4x256x256xf32> to vector<1x256x256xf32>
    %37 = vector.shape_cast %36 : vector<1x256x256xf32> to vector<256x256xf32>
    %38 = vector.broadcast %35 : f32 to vector<256x256xf32>
    %39 = arith.mulf %38, %37 : vector<256x256xf32>
    %40 = arith.addf %28, %39 : vector<256x256xf32>
    %c0_13 = arith.constant 0 : index
    %c3_14 = arith.constant 3 : index
    %41 = memref.load %arg3[%c0_13, %c3_14] : memref<2x4xf32, #tpu.memory_space<smem>>
    %42 = vector.extract_strided_slice %0 {offsets = [3, 0, 0], sizes = [1, 256, 256], strides = [1, 1, 1]} : vector<4x256x256xf32> to vector<1x256x256xf32>
    %43 = vector.shape_cast %42 : vector<1x256x256xf32> to vector<256x256xf32>
    %44 = vector.broadcast %41 : f32 to vector<256x256xf32>
    %45 = arith.mulf %44, %43 : vector<256x256xf32>
    %46 = arith.addf %34, %45 : vector<256x256xf32>
    %c0_15 = arith.constant 0 : index
    %c0_16 = arith.constant 0 : index
    %c0_17 = arith.constant 0 : index
    %47 = vector.load %arg5[%c0_15, %c0_16, %c0_17] : memref<2x256x256xf32, #tpu.memory_space<vmem>>, vector<1x256x256xf32>
    %48 = vector.shape_cast %47 : vector<1x256x256xf32> to vector<256x256xf32>
    %49 = vector.shape_cast %40 : vector<256x256xf32> to vector<1x256x256xf32>
    tpu.vector_store %arg5[%c0_15, %c0_16, %c0_17], %49 {strides = array<i32>} : memref<2x256x256xf32, #tpu.memory_space<vmem>>, vector<1x256x256xf32>,
    %c0_18 = arith.constant 0 : index
    %c0_19 = arith.constant 0 : index
    %c0_20 = arith.constant 0 : index
    %50 = vector.load %arg6[%c0_18, %c0_19, %c0_20] : memref<2x256x256xf32, #tpu.memory_space<vmem>>, vector<1x256x256xf32>
    %51 = vector.shape_cast %50 : vector<1x256x256xf32> to vector<256x256xf32>
    %52 = vector.shape_cast %46 : vector<256x256xf32> to vector<1x256x256xf32>
    tpu.vector_store %arg6[%c0_18, %c0_19, %c0_20], %52 {strides = array<i32>} : memref<2x256x256xf32, #tpu.memory_space<vmem>>, vector<1x256x256xf32>,
    %c1_21 = arith.constant 1 : index
    %c0_22 = arith.constant 0 : index
    %53 = memref.load %arg2[%c1_21, %c0_22] : memref<2x4xf32, #tpu.memory_space<smem>>
    %54 = vector.extract_strided_slice %0 {offsets = [0, 0, 0], sizes = [1, 256, 256], strides = [1, 1, 1]} : vector<4x256x256xf32> to vector<1x256x256xf32>
    %55 = vector.shape_cast %54 : vector<1x256x256xf32> to vector<256x256xf32>
    %56 = vector.broadcast %53 : f32 to vector<256x256xf32>
    %57 = arith.mulf %56, %55 : vector<256x256xf32>
    %c1_23 = arith.constant 1 : index
    %c0_24 = arith.constant 0 : index
    %58 = memref.load %arg3[%c1_23, %c0_24] : memref<2x4xf32, #tpu.memory_space<smem>>
    %59 = vector.extract_strided_slice %0 {offsets = [0, 0, 0], sizes = [1, 256, 256], strides = [1, 1, 1]} : vector<4x256x256xf32> to vector<1x256x256xf32>
    %60 = vector.shape_cast %59 : vector<1x256x256xf32> to vector<256x256xf32>
    %61 = vector.broadcast %58 : f32 to vector<256x256xf32>
    %62 = arith.mulf %61, %60 : vector<256x256xf32>
    %c1_25 = arith.constant 1 : index
    %c1_26 = arith.constant 1 : index
    %63 = memref.load %arg2[%c1_25, %c1_26] : memref<2x4xf32, #tpu.memory_space<smem>>
    %64 = vector.extract_strided_slice %0 {offsets = [1, 0, 0], sizes = [1, 256, 256], strides = [1, 1, 1]} : vector<4x256x256xf32> to vector<1x256x256xf32>
    %65 = vector.shape_cast %64 : vector<1x256x256xf32> to vector<256x256xf32>
    %66 = vector.broadcast %63 : f32 to vector<256x256xf32>
    %67 = arith.mulf %66, %65 : vector<256x256xf32>
    %68 = arith.addf %57, %67 : vector<256x256xf32>
    %c1_27 = arith.constant 1 : index
    %c1_28 = arith.constant 1 : index
    %69 = memref.load %arg3[%c1_27, %c1_28] : memref<2x4xf32, #tpu.memory_space<smem>>
    %70 = vector.extract_strided_slice %0 {offsets = [1, 0, 0], sizes = [1, 256, 256], strides = [1, 1, 1]} : vector<4x256x256xf32> to vector<1x256x256xf32>
    %71 = vector.shape_cast %70 : vector<1x256x256xf32> to vector<256x256xf32>
    %72 = vector.broadcast %69 : f32 to vector<256x256xf32>
    %73 = arith.mulf %72, %71 : vector<256x256xf32>
    %74 = arith.addf %62, %73 : vector<256x256xf32>
    %c1_29 = arith.constant 1 : index
    %c2_30 = arith.constant 2 : index
    %75 = memref.load %arg2[%c1_29, %c2_30] : memref<2x4xf32, #tpu.memory_space<smem>>
    %76 = vector.extract_strided_slice %0 {offsets = [2, 0, 0], sizes = [1, 256, 256], strides = [1, 1, 1]} : vector<4x256x256xf32> to vector<1x256x256xf32>
    %77 = vector.shape_cast %76 : vector<1x256x256xf32> to vector<256x256xf32>
    %78 = vector.broadcast %75 : f32 to vector<256x256xf32>
    %79 = arith.mulf %78, %77 : vector<256x256xf32>
    %80 = arith.addf %68, %79 : vector<256x256xf32>
    %c1_31 = arith.constant 1 : index
    %c2_32 = arith.constant 2 : index
    %81 = memref.load %arg3[%c1_31, %c2_32] : memref<2x4xf32, #tpu.memory_space<smem>>
    %82 = vector.extract_strided_slice %0 {offsets = [2, 0, 0], sizes = [1, 256, 256], strides = [1, 1, 1]} : vector<4x256x256xf32> to vector<1x256x256xf32>
    %83 = vector.shape_cast %82 : vector<1x256x256xf32> to vector<256x256xf32>
    %84 = vector.broadcast %81 : f32 to vector<256x256xf32>
    %85 = arith.mulf %84, %83 : vector<256x256xf32>
    %86 = arith.addf %74, %85 : vector<256x256xf32>
    %c1_33 = arith.constant 1 : index
    %c3_34 = arith.constant 3 : index
    %87 = memref.load %arg2[%c1_33, %c3_34] : memref<2x4xf32, #tpu.memory_space<smem>>
    %88 = vector.extract_strided_slice %0 {offsets = [3, 0, 0], sizes = [1, 256, 256], strides = [1, 1, 1]} : vector<4x256x256xf32> to vector<1x256x256xf32>
    %89 = vector.shape_cast %88 : vector<1x256x256xf32> to vector<256x256xf32>
    %90 = vector.broadcast %87 : f32 to vector<256x256xf32>
    %91 = arith.mulf %90, %89 : vector<256x256xf32>
    %92 = arith.addf %80, %91 : vector<256x256xf32>
    %c1_35 = arith.constant 1 : index
    %c3_36 = arith.constant 3 : index
    %93 = memref.load %arg3[%c1_35, %c3_36] : memref<2x4xf32, #tpu.memory_space<smem>>
    %94 = vector.extract_strided_slice %0 {offsets = [3, 0, 0], sizes = [1, 256, 256], strides = [1, 1, 1]} : vector<4x256x256xf32> to vector<1x256x256xf32>
    %95 = vector.shape_cast %94 : vector<1x256x256xf32> to vector<256x256xf32>
    %96 = vector.broadcast %93 : f32 to vector<256x256xf32>
    %97 = arith.mulf %96, %95 : vector<256x256xf32>
    %98 = arith.addf %86, %97 : vector<256x256xf32>
    %c1_37 = arith.constant 1 : index
    %c0_38 = arith.constant 0 : index
    %c0_39 = arith.constant 0 : index
    %99 = vector.load %arg5[%c1_37, %c0_38, %c0_39] : memref<2x256x256xf32, #tpu.memory_space<vmem>>, vector<1x256x256xf32>
    %100 = vector.shape_cast %99 : vector<1x256x256xf32> to vector<256x256xf32>
    %101 = vector.shape_cast %92 : vector<256x256xf32> to vector<1x256x256xf32>
    tpu.vector_store %arg5[%c1_37, %c0_38, %c0_39], %101 {strides = array<i32>} : memref<2x256x256xf32, #tpu.memory_space<vmem>>, vector<1x256x256xf32>,
    %c1_40 = arith.constant 1 : index
    %c0_41 = arith.constant 0 : index
    %c0_42 = arith.constant 0 : index
    %102 = vector.load %arg6[%c1_40, %c0_41, %c0_42] : memref<2x256x256xf32, #tpu.memory_space<vmem>>, vector<1x256x256xf32>
    %103 = vector.shape_cast %102 : vector<1x256x256xf32> to vector<256x256xf32>
    %104 = vector.shape_cast %98 : vector<256x256xf32> to vector<1x256x256xf32>
    tpu.vector_store %arg6[%c1_40, %c0_41, %c0_42], %104 {strides = array<i32>} : memref<2x256x256xf32, #tpu.memory_space<vmem>>, vector<1x256x256xf32>,
    return
  }
  func.func @transform_0(%arg0: i32, %arg1: i32) -> (i32, i32) {
    %c0_i32 = arith.constant 0 : i32
    %c0_i32_0 = arith.constant 0 : i32
    %c0_i32_1 = arith.constant 0 : i32
    return %c0_i32, %c0_i32_0 : i32, i32
  }
  func.func @transform_1(%arg0: i32, %arg1: i32) -> (i32, i32) {
    %c0_i32 = arith.constant 0 : i32
    %c0_i32_0 = arith.constant 0 : i32
    %c0_i32_1 = arith.constant 0 : i32
    return %c0_i32, %c0_i32_0 : i32, i32
  }
  func.func @transform_2(%arg0: i32, %arg1: i32) -> (i32, i32, i32) {
    %c0_i32 = arith.constant 0 : i32
    %c0_i32_0 = arith.constant 0 : i32
    return %c0_i32, %arg0, %arg1 : i32, i32, i32
  }
  func.func @transform_3(%arg0: i32, %arg1: i32) -> (i32, i32, i32) {
    %c0_i32 = arith.constant 0 : i32
    %c0_i32_0 = arith.constant 0 : i32
    return %c0_i32, %arg0, %arg1 : i32, i32, i32
  }
  func.func @transform_4(%arg0: i32, %arg1: i32) -> (i32, i32, i32) {
    %c0_i32 = arith.constant 0 : i32
    %c0_i32_0 = arith.constant 0 : i32
    return %c0_i32, %arg0, %arg1 : i32, i32, i32
  }
}

</mosaic_0001>

<bundles_post_ra>
// kernel: tpu_custom_call.1
= control target key start
LH: loop header
LB: loop body
LE: loop exit
PB: predicated region body
PF: predicated region fallthrough
CT: control target
= control target key end

     0   :  { %10 = vsyncpa [#allocation5], 0  ;;  %s4482_s0 = inlined_call_operand.hbm [shape: f32[2,4], index: 0, kind: input, shape index: {}]   ;;  %s4483_s1 = inlined_call_operand.hbm [shape: f32[2,4], index: 1, kind: input, shape index: {}]   ;;  %s4484_s2 = inlined_call_operand.hbm [shape: f32[4,256,256], index: 2, kind: input, shape index: {}]   ;;  %s4485_s3 = inlined_call_operand.hbm [shape: f32[2,256,256], index: 3, kind: output, shape index: {0}]   ;;  %s4486_s4 = inlined_call_operand.hbm [shape: f32[2,256,256], index: 4, kind: output, shape index: {1}]  }
   0x1   :  { %11 = vsyncpa [#allocation7], 0 }
   0x2   :  { %12 = vsyncpa [#allocation3], 0 }
   0x3   :  { %13 = vsyncpa [#allocation4], 0 }
   0x4   :  { %14 = vsyncpa [#allocation11], 0  ;;  %s20_s17 = sshll.u32 %s4482_s0, 4  ;;  %s29_s20 = sshll.u32 %s4483_s1, 4  ;;  %s21_s17 = int_to_ptr.hbm [resolvable:$true] %s20_s17  ;;  %s30_s20 = int_to_ptr.hbm [resolvable:$true] %s29_s20 }
   0x5   :  { %s3331_s21 = smov [#allocation2]   ;;  %s3332_s22 = smov [#allocation6]  }
   0x6   :  { %23 = dma.hbm_to_smem %s21_s17, 32, %s3331_s21, [#allocation5]  }
   0x7   :  { %32 = dma.hbm_to_smem %s30_s20, 32, %s3332_s22, [#allocation7]  }
   0x8   :  { %s37_s25 = sshll.u32 %s4484_s2, 4  ;;  %s3333_s26 = smov [#allocation8]   ;;  %s38_s25 = int_to_ptr.hbm [resolvable:$true] %s37_s25 }
   0x9   :  { %s39_s27 = sshll.u32 %s3333_s26, 4  ;;  %s3334_s28 = smov 256   ;;  %s40_s27 = int_to_ptr.vmem [resolvable:$true] %s39_s27 }
   0xa   :  { %s3335_s0 = smov 16  }
   0xb   :  { %45 = dma.hbm_to_vmem [thread:$0]  %s38_s25, 32768, %s40_s27, [#allocation3], %s3334_s28, %s3334_s28, %s3335_s0  }
   0xc   :  { %3321 = dma.done.wait [#allocation5], 32  }
   0xd   :  { %3322 = vsyncadd [#allocation5], 4294967264 }
   0xe   :  { %3323 = dma.done.wait [#allocation7], 32  }
   0xf   :  { %3324 = vsyncadd [#allocation7], 4294967264 }
  0x10   :  { %3325 = dma.done.wait [#allocation3], 32768  }
  0x11   :  { %3326 = vsyncadd [#allocation3], 4294934528 }
  0x12   :  { %58 = sfence }
  0x13   :  { %s315_s1 = sld [smem:[#allocation2]]  ;;  %v59_v0 = vld [vmem:[#allocation8] sm:$0xff]  ;;  %v60_v1 = vld [vmem:[#allocation8 + $0x8] sm:$0xff]  ;;  %v61_v2 = vld [vmem:[#allocation8 + $0x10] sm:$0xff]  ;;  %s3336_s17 = smov [#allocation9]  }
  0x14   :  { %s2436_s29 = sld [smem:[#allocation2 + $0x1]]  ;;  %v123_v3 = vld [vmem:[#allocation8 + $0x200] sm:$0xff]  ;;  %v124_v4 = vld [vmem:[#allocation8 + $0x208] sm:$0xff]  ;;  %v125_v5 = vld [vmem:[#allocation8 + $0x210] sm:$0xff]  ;;  %s4207_s18 = sshll.u32 %s3336_s17, 4  ;;  %s2402_s18 = int_to_ptr.vmem [resolvable:$true] %s4207_s18 }
  0x15   :  { %s2438_s2 = sld [smem:[#allocation2 + $0x2]]  ;;  %v187_v6 = vld [vmem:[#allocation8 + $0x400] sm:$0xff]  ;;  %v188_v8 = vld [vmem:[#allocation8 + $0x408] sm:$0xff]  ;;  %v189_v9 = vld [vmem:[#allocation8 + $0x410] sm:$0xff]  ;;  %s2403_s21 = sshll.u32 %s4485_s3, 4  ;;  %s2404_s21 = int_to_ptr.hbm [resolvable:$true] %s2403_s21 }
  0x16   :  { %s2440_s30 = sld [smem:[#allocation2 + $0x3]]  ;;  %v251_v10 = vld [vmem:[#allocation8 + $0x600] sm:$0xff]  ;;  %v252_v13 = vld [vmem:[#allocation8 + $0x608] sm:$0xff]  ;;  %v253_v19 = vld [vmem:[#allocation8 + $0x610] sm:$0xff]  ;;  %s3337_s3 = smov [#allocation10]  }
  0x17   :  { %v62_v21 = vld [vmem:[#allocation8 + $0x18] sm:$0xff]  ;;  %v63_v33 = vld [vmem:[#allocation8 + $0x20] sm:$0xff]  ;;  %v64_v45 = vld [vmem:[#allocation8 + $0x28] sm:$0xff]  ;;  %s3621_s5 = sld [smem:[#allocation6]]  ;;  %s2414_s22 = sshll.u32 %s3337_s3, 4  ;;  %s2415_s22 = int_to_ptr.vmem [resolvable:$true] %s2414_s22 }
  0x18   :  { %v126_v22 = vld [vmem:[#allocation8 + $0x218] sm:$0xff]  ;;  %v127_v34 = vld [vmem:[#allocation8 + $0x220] sm:$0xff]  ;;  %v128_v46 = vld [vmem:[#allocation8 + $0x228] sm:$0xff]  ;;  %s3624_s6 = sld [smem:[#allocation6 + $0x1]]  ;;  %s2416_s25 = sshll.u32 %s4486_s4, 4  ;;  %s2417_s25 = int_to_ptr.hbm [resolvable:$true] %s2416_s25 }
  0x19   :  { %v3375_v7 = vstv %s315_s1  ;;  %v190_v27 = vld [vmem:[#allocation8 + $0x418] sm:$0xff]  ;;  %v191_v39 = vld [vmem:[#allocation8 + $0x420] sm:$0xff]  ;;  %v192_v51 = vld [vmem:[#allocation8 + $0x428] sm:$0xff]  ;;  %s3629_s7 = sld [smem:[#allocation6 + $0x2]] }
  0x1a   :  { %v317_v11 = vmul.f32 %v3375_v7, %v59_v0  ;;  %v3378_v12 = vstv %s2436_s29  ;;  %v318_v14 = vmul.f32 %v3375_v7, %v60_v1  ;;  %v319_v15 = vmul.f32 %v3375_v7, %v61_v2  ;;  %v254_v28 = vld [vmem:[#allocation8 + $0x618] sm:$0xff]  ;;  %v255_v40 = vld [vmem:[#allocation8 + $0x620] sm:$0xff]  ;;  %v256_v52 = vld [vmem:[#allocation8 + $0x628] sm:$0xff]  ;;  %s3633_s8 = sld [smem:[#allocation6 + $0x3]] }
  0x1b   :  { %v449_v16 = vmul.f32 %v3378_v12, %v123_v3  ;;  %v3383_v17 = vstv %s2438_s2  ;;  %v450_v18 = vmul.f32 %v3378_v12, %v124_v4  ;;  %v451_v20 = vmul.f32 %v3378_v12, %v125_v5  ;;  %v65_v53 = vld [vmem:[#allocation8 + $0x30] sm:$0xff]  ;;  %v66_v1 = vld [vmem:[#allocation8 + $0x38] sm:$0xff]  ;;  %s3897_s9 = sld [smem:[#allocation2 + $0x80]] }
  0x1c   :  { %v709_v23 = vmul.f32 %v3383_v17, %v187_v6  ;;  %v3388_v24 = vstv %s2440_s30  ;;  %v710_v25 = vmul.f32 %v3383_v17, %v188_v8  ;;  %v711_v26 = vmul.f32 %v3383_v17, %v189_v9  ;;  %v129_v58 = vld [vmem:[#allocation8 + $0x230] sm:$0xff]  ;;  %v130_v2 = vld [vmem:[#allocation8 + $0x238] sm:$0xff]  ;;  %s3900_s10 = sld [smem:[#allocation2 + $0x81]] }
  0x1d   :  { %v513_v29 = vadd.f32 %v449_v16, %v317_v11  ;;  %v969_v30 = vmul.f32 %v3388_v24, %v251_v10  ;;  %v514_v31 = vadd.f32 %v450_v18, %v318_v14  ;;  %v970_v32 = vmul.f32 %v3388_v24, %v252_v13  ;;  %v193_v59 = vld [vmem:[#allocation8 + $0x430] sm:$0xff]  ;;  %v194_v8 = vld [vmem:[#allocation8 + $0x438] sm:$0xff]  ;;  %v131_v16 = vld [vmem:[#allocation8 + $0x240] sm:$0xff]  ;;  %s3905_s11 = sld [smem:[#allocation2 + $0x82]] }
  0x1e   :  { %v515_v35 = vadd.f32 %v451_v20, %v319_v15  ;;  %v971_v36 = vmul.f32 %v3388_v24, %v253_v19  ;;  %v320_v37 = vmul.f32 %v3375_v7, %v62_v21  ;;  %v452_v38 = vmul.f32 %v3378_v12, %v126_v22  ;;  %v257_v0 = vld [vmem:[#allocation8 + $0x630] sm:$0xff]  ;;  %v258_v9 = vld [vmem:[#allocation8 + $0x638] sm:$0xff]  ;;  %v67_v15 = vld [vmem:[#allocation8 + $0x40] sm:$0xff]  ;;  %s3909_s12 = sld [smem:[#allocation2 + $0x83]] }
  0x1f   :  { %v773_v41 = vadd.f32 %v709_v23, %v513_v29  ;;  %v774_v42 = vadd.f32 %v710_v25, %v514_v31  ;;  %v712_v43 = vmul.f32 %v3383_v17, %v190_v27  ;;  %v972_v44 = vmul.f32 %v3388_v24, %v254_v28  ;;  %v195_v22 = vld [vmem:[#allocation8 + $0x440] sm:$0xff]  ;;  %v68_v25 = vld [vmem:[#allocation8 + $0x48] sm:$0xff]  ;;  %s4173_s13 = sld [smem:[#allocation6 + $0x80]] }
  0x20   :  { %v775_v47 = vadd.f32 %v711_v26, %v515_v35  ;;  %v516_v48 = vadd.f32 %v452_v38, %v320_v37  ;;  %v321_v49 = vmul.f32 %v3375_v7, %v63_v33  ;;  %v453_v50 = vmul.f32 %v3378_v12, %v127_v34  ;;  %v259_v23 = vld [vmem:[#allocation8 + $0x640] sm:$0xff]  ;;  %v196_v35 = vld [vmem:[#allocation8 + $0x448] sm:$0xff]  ;;  %v69_v37 = vld [vmem:[#allocation8 + $0x50] sm:$0xff]  ;;  %s4176_s14 = sld [smem:[#allocation6 + $0x81]] }
  0x21   :  { %v1033_v54 = vadd.f32 %v969_v30, %v773_v41  ;;  %v1034_v55 = vadd.f32 %v970_v32, %v774_v42  ;;  %v713_v56 = vmul.f32 %v3383_v17, %v191_v39  ;;  %v973_v57 = vmul.f32 %v3388_v24, %v255_v40  ;;  %v132_v30 = vld [vmem:[#allocation8 + $0x248] sm:$0xff]  ;;  %v133_v42 = vld [vmem:[#allocation8 + $0x250] sm:$0xff]  ;;  %s4181_s15 = sld [smem:[#allocation6 + $0x82]] }
  0x22   :  { %v1035_v60 = vadd.f32 %v971_v36, %v775_v47  ;;  %v776_v61 = vadd.f32 %v712_v43, %v516_v48  ;;  %v517_v62 = vadd.f32 %v453_v50, %v321_v49  ;;  %v322_v63 = vmul.f32 %v3375_v7, %v64_v45  ;;  %v260_v36 = vld [vmem:[#allocation8 + $0x648] sm:$0xff]  ;;  %v197_v43 = vld [vmem:[#allocation8 + $0x450] sm:$0xff]  ;;  %v70_v49 = vld [vmem:[#allocation8 + $0x58] sm:$0xff]  ;;  %s4185_s16 = sld [smem:[#allocation6 + $0x83]] }
  0x23   :  { %1227 = vst [vmem:[#allocation9] sm:$0xff] %v1033_v54  ;;  %v454_v3 = vmul.f32 %v3378_v12, %v128_v46  ;;  %v714_v4 = vmul.f32 %v3383_v17, %v192_v51  ;;  %v974_v5 = vmul.f32 %v3388_v24, %v256_v52  ;;  %v323_v6 = vmul.f32 %v3375_v7, %v65_v53  ;;  %v261_v48 = vld [vmem:[#allocation8 + $0x650] sm:$0xff]  ;;  %v134_v50 = vld [vmem:[#allocation8 + $0x258] sm:$0xff] }
  0x24   :  { %1228 = vst [vmem:[#allocation9 + $0x8] sm:$0xff] %v1034_v55  ;;  %v1036_v10 = vadd.f32 %v972_v44, %v776_v61  ;;  %v777_v11 = vadd.f32 %v713_v56, %v517_v62  ;;  %v455_v13 = vmul.f32 %v3378_v12, %v129_v58  ;;  %v715_v14 = vmul.f32 %v3383_v17, %v193_v59  ;;  %v198_v55 = vld [vmem:[#allocation8 + $0x458] sm:$0xff]  ;;  %v71_v61 = vld [vmem:[#allocation8 + $0x60] sm:$0xff] }
  0x25   :  { %1229 = vst [vmem:[#allocation9 + $0x10] sm:$0xff] %v1035_v60  ;;  %v518_v18 = vadd.f32 %v454_v3, %v322_v63  ;;  %v975_v19 = vmul.f32 %v3388_v24, %v257_v0  ;;  %v324_v20 = vmul.f32 %v3375_v7, %v66_v1  ;;  %v456_v21 = vmul.f32 %v3378_v12, %v130_v2  ;;  %v262_v60 = vld [vmem:[#allocation8 + $0x658] sm:$0xff]  ;;  %v135_v62 = vld [vmem:[#allocation8 + $0x260] sm:$0xff] }
  0x26   :  { %1230 = vst [vmem:[#allocation9 + $0x18] sm:$0xff] %v1036_v10  ;;  %v1037_v26 = vadd.f32 %v973_v57, %v777_v11  ;;  %v519_v27 = vadd.f32 %v455_v13, %v323_v6  ;;  %v716_v28 = vmul.f32 %v3383_v17, %v194_v8  ;;  %v976_v29 = vmul.f32 %v3388_v24, %v258_v9  ;;  %v199_v3 = vld [vmem:[#allocation8 + $0x460] sm:$0xff]  ;;  %v72_v10 = vld [vmem:[#allocation8 + $0x68] sm:$0xff] }
  0x27   :  { %v778_v31 = vadd.f32 %v714_v4, %v518_v18  ;;  %v520_v32 = vadd.f32 %v456_v21, %v324_v20  ;;  %v325_v33 = vmul.f32 %v3375_v7, %v67_v15  ;;  %v457_v34 = vmul.f32 %v3378_v12, %v131_v16  ;;  %v263_v4 = vld [vmem:[#allocation8 + $0x660] sm:$0xff]  ;;  %v136_v11 = vld [vmem:[#allocation8 + $0x268] sm:$0xff]  ;;  %v73_v20 = vld [vmem:[#allocation8 + $0x70] sm:$0xff] }
  0x28   :  { %1231 = vst [vmem:[#allocation9 + $0x20] sm:$0xff] %v1037_v26  ;;  %v779_v38 = vadd.f32 %v715_v14, %v519_v27  ;;  %v717_v39 = vmul.f32 %v3383_v17, %v195_v22  ;;  %v977_v40 = vmul.f32 %v3388_v24, %v259_v23  ;;  %v326_v41 = vmul.f32 %v3375_v7, %v68_v25  ;;  %v200_v18 = vld [vmem:[#allocation8 + $0x468] sm:$0xff]  ;;  %v137_v26 = vld [vmem:[#allocation8 + $0x270] sm:$0xff] }
  0x29   :  { %v1038_v44 = vadd.f32 %v974_v5, %v778_v31  ;;  %v780_v45 = vadd.f32 %v716_v28, %v520_v32  ;;  %v521_v46 = vadd.f32 %v457_v34, %v325_v33  ;;  %v458_v47 = vmul.f32 %v3378_v12, %v132_v30  ;;  %v201_v27 = vld [vmem:[#allocation8 + $0x470] sm:$0xff]  ;;  %v74_v33 = vld [vmem:[#allocation8 + $0x78] sm:$0xff] }
  0x2a   :  { %v1039_v51 = vadd.f32 %v975_v19, %v779_v38  ;;  %v718_v52 = vmul.f32 %v3383_v17, %v196_v35  ;;  %v978_v53 = vmul.f32 %v3388_v24, %v260_v36  ;;  %v327_v54 = vmul.f32 %v3375_v7, %v69_v37  ;;  %v264_v19 = vld [vmem:[#allocation8 + $0x668] sm:$0xff]  ;;  %v265_v32 = vld [vmem:[#allocation8 + $0x670] sm:$0xff]  ;;  %v138_v34 = vld [vmem:[#allocation8 + $0x278] sm:$0xff] }
  0x2b   :  { %1232 = vst [vmem:[#allocation9 + $0x28] sm:$0xff] %v1038_v44  ;;  %v1040_v56 = vadd.f32 %v976_v29, %v780_v45  ;;  %v781_v57 = vadd.f32 %v717_v39, %v521_v46  ;;  %v522_v58 = vadd.f32 %v458_v47, %v326_v41  ;;  %v459_v59 = vmul.f32 %v3378_v12, %v133_v42  ;;  %v202_v39 = vld [vmem:[#allocation8 + $0x478] sm:$0xff]  ;;  %v75_v45 = vld [vmem:[#allocation8 + $0x80] sm:$0xff] }
  0x2c   :  { %1233 = vst [vmem:[#allocation9 + $0x30] sm:$0xff] %v1039_v51  ;;  %v719_v63 = vmul.f32 %v3383_v17, %v197_v43  ;;  %v979_v0 = vmul.f32 %v3388_v24, %v261_v48  ;;  %v328_v1 = vmul.f32 %v3375_v7, %v70_v49  ;;  %v460_v2 = vmul.f32 %v3378_v12, %v134_v50  ;;  %v266_v44 = vld [vmem:[#allocation8 + $0x678] sm:$0xff]  ;;  %v139_v46 = vld [vmem:[#allocation8 + $0x280] sm:$0xff] }
  0x2d   :  { %1234 = vst [vmem:[#allocation9 + $0x38] sm:$0xff] %v1040_v56  ;;  %v1041_v5 = vadd.f32 %v977_v40, %v781_v57  ;;  %v782_v6 = vadd.f32 %v718_v52, %v522_v58  ;;  %v523_v8 = vadd.f32 %v459_v59, %v327_v54  ;;  %v720_v9 = vmul.f32 %v3383_v17, %v198_v55  ;;  %v203_v51 = vld [vmem:[#allocation8 + $0x480] sm:$0xff]  ;;  %v76_v57 = vld [vmem:[#allocation8 + $0x88] sm:$0xff] }
  0x2e   :  { %v524_v13 = vadd.f32 %v460_v2, %v328_v1  ;;  %v980_v14 = vmul.f32 %v3388_v24, %v262_v60  ;;  %v329_v15 = vmul.f32 %v3375_v7, %v71_v61  ;;  %v461_v16 = vmul.f32 %v3378_v12, %v135_v62  ;;  %v267_v52 = vld [vmem:[#allocation8 + $0x680] sm:$0xff]  ;;  %v140_v58 = vld [vmem:[#allocation8 + $0x288] sm:$0xff]  ;;  %v77_v1 = vld [vmem:[#allocation8 + $0x90] sm:$0xff] }
  0x2f   :  { %1235 = vst [vmem:[#allocation9 + $0x40] sm:$0xff] %v1041_v5  ;;  %v1042_v21 = vadd.f32 %v978_v53, %v782_v6  ;;  %v783_v22 = vadd.f32 %v719_v63, %v523_v8  ;;  %v721_v23 = vmul.f32 %v3383_v17, %v199_v3  ;;  %v981_v25 = vmul.f32 %v3388_v24, %v263_v4  ;;  %v204_v63 = vld [vmem:[#allocation8 + $0x488] sm:$0xff]  ;;  %v141_v6 = vld [vmem:[#allocation8 + $0x290] sm:$0xff] }
  0x30   :  { %v784_v28 = vadd.f32 %v720_v9, %v524_v13  ;;  %v525_v29 = vadd.f32 %v461_v16, %v329_v15  ;;  %v330_v30 = vmul.f32 %v3375_v7, %v72_v10  ;;  %v462_v31 = vmul.f32 %v3378_v12, %v136_v11  ;;  %v205_v8 = vld [vmem:[#allocation8 + $0x490] sm:$0xff]  ;;  %v78_v15 = vld [vmem:[#allocation8 + $0x98] sm:$0xff] }
  0x31   :  { %1236 = vst [vmem:[#allocation9 + $0x48] sm:$0xff] %v1042_v21  ;;  %v1043_v35 = vadd.f32 %v979_v0, %v783_v22  ;;  %v722_v36 = vmul.f32 %v3383_v17, %v200_v18  ;;  %v982_v37 = vmul.f32 %v3388_v24, %v264_v19  ;;  %v331_v38 = vmul.f32 %v3375_v7, %v73_v20  ;;  %v268_v0 = vld [vmem:[#allocation8 + $0x688] sm:$0xff]  ;;  %v142_v16 = vld [vmem:[#allocation8 + $0x298] sm:$0xff] }
  0x32   :  { %v1044_v40 = vadd.f32 %v980_v14, %v784_v28  ;;  %v785_v41 = vadd.f32 %v721_v23, %v525_v29  ;;  %v526_v42 = vadd.f32 %v462_v31, %v330_v30  ;;  %v463_v43 = vmul.f32 %v3378_v12, %v137_v26  ;;  %v269_v14 = vld [vmem:[#allocation8 + $0x690] sm:$0xff]  ;;  %v206_v22 = vld [vmem:[#allocation8 + $0x498] sm:$0xff]  ;;  %v79_v29 = vld [vmem:[#allocation8 + $0xa0] sm:$0xff] }
  0x33   :  { %1237 = vst [vmem:[#allocation9 + $0x50] sm:$0xff] %v1043_v35  ;;  %v723_v47 = vmul.f32 %v3383_v17, %v201_v27  ;;  %v983_v48 = vmul.f32 %v3388_v24, %v265_v32  ;;  %v332_v49 = vmul.f32 %v3375_v7, %v74_v33  ;;  %v464_v50 = vmul.f32 %v3378_v12, %v138_v34  ;;  %v270_v28 = vld [vmem:[#allocation8 + $0x698] sm:$0xff]  ;;  %v143_v30 = vld [vmem:[#allocation8 + $0x2a0] sm:$0xff] }
  0x34   :  { %1238 = vst [vmem:[#allocation9 + $0x58] sm:$0xff] %v1044_v40  ;;  %v1045_v53 = vadd.f32 %v981_v25, %v785_v41  ;;  %v786_v54 = vadd.f32 %v722_v36, %v526_v42  ;;  %v527_v55 = vadd.f32 %v463_v43, %v331_v38  ;;  %v724_v56 = vmul.f32 %v3383_v17, %v202_v39  ;;  %v207_v35 = vld [vmem:[#allocation8 + $0x4a0] sm:$0xff]  ;;  %v80_v41 = vld [vmem:[#allocation8 + $0xa8] sm:$0xff] }
  0x35   :  { %v528_v59 = vadd.f32 %v464_v50, %v332_v49  ;;  %v984_v60 = vmul.f32 %v3388_v24, %v266_v44  ;;  %v333_v61 = vmul.f32 %v3375_v7, %v75_v45  ;;  %v465_v62 = vmul.f32 %v3378_v12, %v139_v46  ;;  %v271_v36 = vld [vmem:[#allocation8 + $0x6a0] sm:$0xff]  ;;  %v144_v42 = vld [vmem:[#allocation8 + $0x2a8] sm:$0xff]  ;;  %v81_v49 = vld [vmem:[#allocation8 + $0xb0] sm:$0xff] }
  0x36   :  { %1239 = vst [vmem:[#allocation9 + $0x60] sm:$0xff] %v1045_v53  ;;  %v1046_v2 = vadd.f32 %v982_v37, %v786_v54  ;;  %v787_v3 = vadd.f32 %v723_v47, %v527_v55  ;;  %v725_v4 = vmul.f32 %v3383_v17, %v203_v51  ;;  %v985_v5 = vmul.f32 %v3388_v24, %v267_v52  ;;  %v208_v47 = vld [vmem:[#allocation8 + $0x4a8] sm:$0xff]  ;;  %v145_v54 = vld [vmem:[#allocation8 + $0x2b0] sm:$0xff] }
  0x37   :  { %v788_v9 = vadd.f32 %v724_v56, %v528_v59  ;;  %v529_v10 = vadd.f32 %v465_v62, %v333_v61  ;;  %v334_v11 = vmul.f32 %v3375_v7, %v76_v57  ;;  %v466_v13 = vmul.f32 %v3378_v12, %v140_v58  ;;  %v209_v55 = vld [vmem:[#allocation8 + $0x4b0] sm:$0xff]  ;;  %v82_v61 = vld [vmem:[#allocation8 + $0xb8] sm:$0xff] }
  0x38   :  { %1240 = vst [vmem:[#allocation9 + $0x68] sm:$0xff] %v1046_v2  ;;  %v1047_v18 = vadd.f32 %v983_v48, %v787_v3  ;;  %v726_v19 = vmul.f32 %v3383_v17, %v204_v63  ;;  %v986_v20 = vmul.f32 %v3388_v24, %v268_v0  ;;  %v335_v21 = vmul.f32 %v3375_v7, %v77_v1  ;;  %v272_v48 = vld [vmem:[#allocation8 + $0x6a8] sm:$0xff]  ;;  %v146_v62 = vld [vmem:[#allocation8 + $0x2b8] sm:$0xff] }
  0x39   :  { %v1048_v23 = vadd.f32 %v984_v60, %v788_v9  ;;  %v789_v25 = vadd.f32 %v725_v4, %v529_v10  ;;  %v530_v26 = vadd.f32 %v466_v13, %v334_v11  ;;  %v467_v27 = vmul.f32 %v3378_v12, %v141_v6  ;;  %v273_v60 = vld [vmem:[#allocation8 + $0x6b0] sm:$0xff]  ;;  %v210_v3 = vld [vmem:[#allocation8 + $0x4b8] sm:$0xff]  ;;  %v83_v10 = vld [vmem:[#allocation8 + $0xc0] sm:$0xff] }
  0x3a   :  { %1241 = vst [vmem:[#allocation9 + $0x70] sm:$0xff] %v1047_v18  ;;  %v727_v31 = vmul.f32 %v3383_v17, %v205_v8  ;;  %v987_v32 = vmul.f32 %v3388_v24, %v269_v14  ;;  %v336_v33 = vmul.f32 %v3375_v7, %v78_v15  ;;  %v468_v34 = vmul.f32 %v3378_v12, %v142_v16  ;;  %v274_v9 = vld [vmem:[#allocation8 + $0x6b8] sm:$0xff]  ;;  %v147_v11 = vld [vmem:[#allocation8 + $0x2c0] sm:$0xff] }
  0x3b   :  { %1242 = vst [vmem:[#allocation9 + $0x78] sm:$0xff] %v1048_v23  ;;  %v1049_v37 = vadd.f32 %v985_v5, %v789_v25  ;;  %v790_v38 = vadd.f32 %v726_v19, %v530_v26  ;;  %v531_v39 = vadd.f32 %v467_v27, %v335_v21  ;;  %v728_v40 = vmul.f32 %v3383_v17, %v206_v22  ;;  %v211_v18 = vld [vmem:[#allocation8 + $0x4c0] sm:$0xff]  ;;  %v84_v25 = vld [vmem:[#allocation8 + $0xc8] sm:$0xff] }
  0x3c   :  { %v532_v43 = vadd.f32 %v468_v34, %v336_v33  ;;  %v988_v44 = vmul.f32 %v3388_v24, %v270_v28  ;;  %v337_v45 = vmul.f32 %v3375_v7, %v79_v29  ;;  %v469_v46 = vmul.f32 %v3378_v12, %v143_v30  ;;  %v275_v19 = vld [vmem:[#allocation8 + $0x6c0] sm:$0xff]  ;;  %v148_v26 = vld [vmem:[#allocation8 + $0x2c8] sm:$0xff]  ;;  %v85_v33 = vld [vmem:[#allocation8 + $0xd0] sm:$0xff] }
  0x3d   :  { %1243 = vst [vmem:[#allocation9 + $0x80] sm:$0xff] %v1049_v37  ;;  %v1050_v50 = vadd.f32 %v986_v20, %v790_v38  ;;  %v791_v51 = vadd.f32 %v727_v31, %v531_v39  ;;  %v729_v52 = vmul.f32 %v3383_v17, %v207_v35  ;;  %v989_v53 = vmul.f32 %v3388_v24, %v271_v36  ;;  %v212_v31 = vld [vmem:[#allocation8 + $0x4c8] sm:$0xff]  ;;  %v149_v38 = vld [vmem:[#allocation8 + $0x2d0] sm:$0xff] }
  0x3e   :  { %v792_v56 = vadd.f32 %v728_v40, %v532_v43  ;;  %v533_v57 = vadd.f32 %v469_v46, %v337_v45  ;;  %v338_v58 = vmul.f32 %v3375_v7, %v80_v41  ;;  %v470_v59 = vmul.f32 %v3378_v12, %v144_v42  ;;  %v213_v39 = vld [vmem:[#allocation8 + $0x4d0] sm:$0xff]  ;;  %v86_v45 = vld [vmem:[#allocation8 + $0xd8] sm:$0xff] }
  0x3f   :  { %1244 = vst [vmem:[#allocation9 + $0x88] sm:$0xff] %v1050_v50  ;;  %v1051_v63 = vadd.f32 %v987_v32, %v791_v51  ;;  %v730_v0 = vmul.f32 %v3383_v17, %v208_v47  ;;  %v990_v1 = vmul.f32 %v3388_v24, %v272_v48  ;;  %v339_v2 = vmul.f32 %v3375_v7, %v81_v49  ;;  %v276_v32 = vld [vmem:[#allocation8 + $0x6c8] sm:$0xff]  ;;  %v150_v46 = vld [vmem:[#allocation8 + $0x2d8] sm:$0xff] }
  0x40   :  { %v1052_v4 = vadd.f32 %v988_v44, %v792_v56  ;;  %v793_v5 = vadd.f32 %v729_v52, %v533_v57  ;;  %v534_v6 = vadd.f32 %v470_v59, %v338_v58  ;;  %v471_v8 = vmul.f32 %v3378_v12, %v145_v54  ;;  %v277_v44 = vld [vmem:[#allocation8 + $0x6d0] sm:$0xff]  ;;  %v214_v51 = vld [vmem:[#allocation8 + $0x4d8] sm:$0xff]  ;;  %v87_v57 = vld [vmem:[#allocation8 + $0xe0] sm:$0xff] }
  0x41   :  { %1245 = vst [vmem:[#allocation9 + $0x90] sm:$0xff] %v1051_v63  ;;  %v731_v13 = vmul.f32 %v3383_v17, %v209_v55  ;;  %v991_v14 = vmul.f32 %v3388_v24, %v273_v60  ;;  %v340_v15 = vmul.f32 %v3375_v7, %v82_v61  ;;  %v472_v16 = vmul.f32 %v3378_v12, %v146_v62  ;;  %v278_v56 = vld [vmem:[#allocation8 + $0x6d8] sm:$0xff]  ;;  %v151_v58 = vld [vmem:[#allocation8 + $0x2e0] sm:$0xff] }
  0x42   :  { %1246 = vst [vmem:[#allocation9 + $0x98] sm:$0xff] %v1052_v4  ;;  %v1053_v20 = vadd.f32 %v989_v53, %v793_v5  ;;  %v794_v21 = vadd.f32 %v730_v0, %v534_v6  ;;  %v535_v22 = vadd.f32 %v471_v8, %v339_v2  ;;  %v732_v23 = vmul.f32 %v3383_v17, %v210_v3  ;;  %v215_v63 = vld [vmem:[#allocation8 + $0x4e0] sm:$0xff]  ;;  %v88_v5 = vld [vmem:[#allocation8 + $0xe8] sm:$0xff] }
  0x43   :  { %v536_v27 = vadd.f32 %v472_v16, %v340_v15  ;;  %v992_v28 = vmul.f32 %v3388_v24, %v274_v9  ;;  %v341_v29 = vmul.f32 %v3375_v7, %v83_v10  ;;  %v473_v30 = vmul.f32 %v3378_v12, %v147_v11  ;;  %v279_v0 = vld [vmem:[#allocation8 + $0x6e0] sm:$0xff]  ;;  %v152_v6 = vld [vmem:[#allocation8 + $0x2e8] sm:$0xff]  ;;  %v89_v15 = vld [vmem:[#allocation8 + $0xf0] sm:$0xff] }
  0x44   :  { %1247 = vst [vmem:[#allocation9 + $0xa0] sm:$0xff] %v1053_v20  ;;  %v1054_v34 = vadd.f32 %v990_v1, %v794_v21  ;;  %v795_v35 = vadd.f32 %v731_v13, %v535_v22  ;;  %v733_v36 = vmul.f32 %v3383_v17, %v211_v18  ;;  %v993_v37 = vmul.f32 %v3388_v24, %v275_v19  ;;  %v216_v13 = vld [vmem:[#allocation8 + $0x4e8] sm:$0xff]  ;;  %v153_v21 = vld [vmem:[#allocation8 + $0x2f0] sm:$0xff] }
  0x45   :  { %v796_v40 = vadd.f32 %v732_v23, %v536_v27  ;;  %v537_v41 = vadd.f32 %v473_v30, %v341_v29  ;;  %v342_v42 = vmul.f32 %v3375_v7, %v84_v25  ;;  %v474_v43 = vmul.f32 %v3378_v12, %v148_v26  ;;  %v217_v22 = vld [vmem:[#allocation8 + $0x4f0] sm:$0xff]  ;;  %v90_v29 = vld [vmem:[#allocation8 + $0xf8] sm:$0xff] }
  0x46   :  { %1248 = vst [vmem:[#allocation9 + $0xa8] sm:$0xff] %v1054_v34  ;;  %v1055_v47 = vadd.f32 %v991_v14, %v795_v35  ;;  %v734_v48 = vmul.f32 %v3383_v17, %v212_v31  ;;  %v994_v49 = vmul.f32 %v3388_v24, %v276_v32  ;;  %v343_v50 = vmul.f32 %v3375_v7, %v85_v33  ;;  %v280_v14 = vld [vmem:[#allocation8 + $0x6e8] sm:$0xff]  ;;  %v154_v30 = vld [vmem:[#allocation8 + $0x2f8] sm:$0xff] }
  0x47   :  { %v1056_v52 = vadd.f32 %v992_v28, %v796_v40  ;;  %v797_v53 = vadd.f32 %v733_v36, %v537_v41  ;;  %v538_v54 = vadd.f32 %v474_v43, %v342_v42  ;;  %v475_v55 = vmul.f32 %v3378_v12, %v149_v38  ;;  %v281_v28 = vld [vmem:[#allocation8 + $0x6f0] sm:$0xff]  ;;  %v218_v35 = vld [vmem:[#allocation8 + $0x4f8] sm:$0xff]  ;;  %v91_v41 = vld [vmem:[#allocation8 + $0x100] sm:$0xff] }
  0x48   :  { %1249 = vst [vmem:[#allocation9 + $0xb0] sm:$0xff] %v1055_v47  ;;  %v735_v59 = vmul.f32 %v3383_v17, %v213_v39  ;;  %v995_v60 = vmul.f32 %v3388_v24, %v277_v44  ;;  %v344_v61 = vmul.f32 %v3375_v7, %v86_v45  ;;  %v476_v62 = vmul.f32 %v3378_v12, %v150_v46  ;;  %v282_v40 = vld [vmem:[#allocation8 + $0x6f8] sm:$0xff]  ;;  %v155_v42 = vld [vmem:[#allocation8 + $0x300] sm:$0xff] }
  0x49   :  { %1250 = vst [vmem:[#allocation9 + $0xb8] sm:$0xff] %v1056_v52  ;;  %v1057_v1 = vadd.f32 %v993_v37, %v797_v53  ;;  %v798_v2 = vadd.f32 %v734_v48, %v538_v54  ;;  %v539_v3 = vadd.f32 %v475_v55, %v343_v50  ;;  %v736_v4 = vmul.f32 %v3383_v17, %v214_v51  ;;  %v219_v47 = vld [vmem:[#allocation8 + $0x500] sm:$0xff]  ;;  %v92_v53 = vld [vmem:[#allocation8 + $0x108] sm:$0xff] }
  0x4a   :  { %v540_v8 = vadd.f32 %v476_v62, %v344_v61  ;;  %v996_v9 = vmul.f32 %v3388_v24, %v278_v56  ;;  %v345_v10 = vmul.f32 %v3375_v7, %v87_v57  ;;  %v477_v11 = vmul.f32 %v3378_v12, %v151_v58  ;;  %v283_v48 = vld [vmem:[#allocation8 + $0x700] sm:$0xff]  ;;  %v156_v54 = vld [vmem:[#allocation8 + $0x308] sm:$0xff]  ;;  %v93_v61 = vld [vmem:[#allocation8 + $0x110] sm:$0xff] }
  0x4b   :  { %1251 = vst [vmem:[#allocation9 + $0xc0] sm:$0xff] %v1057_v1  ;;  %v1058_v16 = vadd.f32 %v994_v49, %v798_v2  ;;  %v799_v18 = vadd.f32 %v735_v59, %v539_v3  ;;  %v737_v19 = vmul.f32 %v3383_v17, %v215_v63  ;;  %v997_v20 = vmul.f32 %v3388_v24, %v279_v0  ;;  %v220_v59 = vld [vmem:[#allocation8 + $0x508] sm:$0xff]  ;;  %v157_v2 = vld [vmem:[#allocation8 + $0x310] sm:$0xff] }
  0x4c   :  { %v800_v23 = vadd.f32 %v736_v4, %v540_v8  ;;  %v541_v25 = vadd.f32 %v477_v11, %v345_v10  ;;  %v346_v26 = vmul.f32 %v3375_v7, %v88_v5  ;;  %v478_v27 = vmul.f32 %v3378_v12, %v152_v6  ;;  %v221_v3 = vld [vmem:[#allocation8 + $0x510] sm:$0xff]  ;;  %v94_v10 = vld [vmem:[#allocation8 + $0x118] sm:$0xff] }
  0x4d   :  { %1252 = vst [vmem:[#allocation9 + $0xc8] sm:$0xff] %v1058_v16  ;;  %v1059_v31 = vadd.f32 %v995_v60, %v799_v18  ;;  %v738_v32 = vmul.f32 %v3383_v17, %v216_v13  ;;  %v998_v33 = vmul.f32 %v3388_v24, %v280_v14  ;;  %v347_v34 = vmul.f32 %v3375_v7, %v89_v15  ;;  %v284_v60 = vld [vmem:[#allocation8 + $0x708] sm:$0xff]  ;;  %v158_v11 = vld [vmem:[#allocation8 + $0x318] sm:$0xff] }
  0x4e   :  { %v1060_v36 = vadd.f32 %v996_v9, %v800_v23  ;;  %v801_v37 = vadd.f32 %v737_v19, %v541_v25  ;;  %v542_v38 = vadd.f32 %v478_v27, %v346_v26  ;;  %v479_v39 = vmul.f32 %v3378_v12, %v153_v21  ;;  %v285_v9 = vld [vmem:[#allocation8 + $0x710] sm:$0xff]  ;;  %v222_v18 = vld [vmem:[#allocation8 + $0x518] sm:$0xff]  ;;  %v95_v25 = vld [vmem:[#allocation8 + $0x120] sm:$0xff] }
  0x4f   :  { %1253 = vst [vmem:[#allocation9 + $0xd0] sm:$0xff] %v1059_v31  ;;  %v739_v43 = vmul.f32 %v3383_v17, %v217_v22  ;;  %v999_v44 = vmul.f32 %v3388_v24, %v281_v28  ;;  %v348_v45 = vmul.f32 %v3375_v7, %v90_v29  ;;  %v480_v46 = vmul.f32 %v3378_v12, %v154_v30  ;;  %v286_v23 = vld [vmem:[#allocation8 + $0x718] sm:$0xff]  ;;  %v159_v26 = vld [vmem:[#allocation8 + $0x320] sm:$0xff] }
  0x50   :  { %1254 = vst [vmem:[#allocation9 + $0xd8] sm:$0xff] %v1060_v36  ;;  %v1061_v49 = vadd.f32 %v997_v20, %v801_v37  ;;  %v802_v50 = vadd.f32 %v738_v32, %v542_v38  ;;  %v543_v51 = vadd.f32 %v479_v39, %v347_v34  ;;  %v740_v52 = vmul.f32 %v3383_v17, %v218_v35  ;;  %v223_v31 = vld [vmem:[#allocation8 + $0x520] sm:$0xff]  ;;  %v96_v37 = vld [vmem:[#allocation8 + $0x128] sm:$0xff] }
  0x51   :  { %v544_v55 = vadd.f32 %v480_v46, %v348_v45  ;;  %v1000_v56 = vmul.f32 %v3388_v24, %v282_v40  ;;  %v349_v57 = vmul.f32 %v3375_v7, %v91_v41  ;;  %v481_v58 = vmul.f32 %v3378_v12, %v155_v42  ;;  %v287_v32 = vld [vmem:[#allocation8 + $0x720] sm:$0xff]  ;;  %v160_v38 = vld [vmem:[#allocation8 + $0x328] sm:$0xff]  ;;  %v97_v45 = vld [vmem:[#allocation8 + $0x130] sm:$0xff] }
  0x52   :  { %1255 = vst [vmem:[#allocation9 + $0xe0] sm:$0xff] %v1061_v49  ;;  %v1062_v62 = vadd.f32 %v998_v33, %v802_v50  ;;  %v803_v63 = vadd.f32 %v739_v43, %v543_v51  ;;  %v741_v0 = vmul.f32 %v3383_v17, %v219_v47  ;;  %v1001_v1 = vmul.f32 %v3388_v24, %v283_v48  ;;  %v224_v43 = vld [vmem:[#allocation8 + $0x528] sm:$0xff]  ;;  %v161_v50 = vld [vmem:[#allocation8 + $0x330] sm:$0xff] }
  0x53   :  { %v804_v4 = vadd.f32 %v740_v52, %v544_v55  ;;  %v545_v5 = vadd.f32 %v481_v58, %v349_v57  ;;  %v350_v6 = vmul.f32 %v3375_v7, %v92_v53  ;;  %v482_v8 = vmul.f32 %v3378_v12, %v156_v54  ;;  %v225_v51 = vld [vmem:[#allocation8 + $0x530] sm:$0xff]  ;;  %v98_v57 = vld [vmem:[#allocation8 + $0x138] sm:$0xff] }
  0x54   :  { %1256 = vst [vmem:[#allocation9 + $0xe8] sm:$0xff] %v1062_v62  ;;  %v1063_v13 = vadd.f32 %v999_v44, %v803_v63  ;;  %v742_v14 = vmul.f32 %v3383_v17, %v220_v59  ;;  %v1002_v15 = vmul.f32 %v3388_v24, %v284_v60  ;;  %v351_v16 = vmul.f32 %v3375_v7, %v93_v61  ;;  %v288_v44 = vld [vmem:[#allocation8 + $0x728] sm:$0xff]  ;;  %v162_v58 = vld [vmem:[#allocation8 + $0x338] sm:$0xff] }
  0x55   :  { %v1064_v19 = vadd.f32 %v1000_v56, %v804_v4  ;;  %v805_v20 = vadd.f32 %v741_v0, %v545_v5  ;;  %v546_v21 = vadd.f32 %v482_v8, %v350_v6  ;;  %v483_v22 = vmul.f32 %v3378_v12, %v157_v2  ;;  %v289_v56 = vld [vmem:[#allocation8 + $0x730] sm:$0xff]  ;;  %v226_v63 = vld [vmem:[#allocation8 + $0x538] sm:$0xff]  ;;  %v99_v5 = vld [vmem:[#allocation8 + $0x140] sm:$0xff] }
  0x56   :  { %1257 = vst [vmem:[#allocation9 + $0xf0] sm:$0xff] %v1063_v13  ;;  %v743_v27 = vmul.f32 %v3383_v17, %v221_v3  ;;  %v1003_v28 = vmul.f32 %v3388_v24, %v285_v9  ;;  %v352_v29 = vmul.f32 %v3375_v7, %v94_v10  ;;  %v484_v30 = vmul.f32 %v3378_v12, %v158_v11  ;;  %v290_v4 = vld [vmem:[#allocation8 + $0x738] sm:$0xff]  ;;  %v163_v6 = vld [vmem:[#allocation8 + $0x340] sm:$0xff] }
  0x57   :  { %1258 = vst [vmem:[#allocation9 + $0xf8] sm:$0xff] %v1064_v19  ;;  %v1065_v33 = vadd.f32 %v1001_v1, %v805_v20  ;;  %v806_v34 = vadd.f32 %v742_v14, %v546_v21  ;;  %v547_v35 = vadd.f32 %v483_v22, %v351_v16  ;;  %v744_v36 = vmul.f32 %v3383_v17, %v222_v18  ;;  %v227_v13 = vld [vmem:[#allocation8 + $0x540] sm:$0xff]  ;;  %v100_v20 = vld [vmem:[#allocation8 + $0x148] sm:$0xff] }
  0x58   :  { %v548_v39 = vadd.f32 %v484_v30, %v352_v29  ;;  %v1004_v40 = vmul.f32 %v3388_v24, %v286_v23  ;;  %v353_v41 = vmul.f32 %v3375_v7, %v95_v25  ;;  %v485_v42 = vmul.f32 %v3378_v12, %v159_v26  ;;  %v291_v14 = vld [vmem:[#allocation8 + $0x740] sm:$0xff]  ;;  %v164_v21 = vld [vmem:[#allocation8 + $0x348] sm:$0xff]  ;;  %v101_v29 = vld [vmem:[#allocation8 + $0x150] sm:$0xff] }
  0x59   :  { %1259 = vst [vmem:[#allocation9 + $0x100] sm:$0xff] %v1065_v33  ;;  %v1066_v46 = vadd.f32 %v1002_v15, %v806_v34  ;;  %v807_v47 = vadd.f32 %v743_v27, %v547_v35  ;;  %v745_v48 = vmul.f32 %v3383_v17, %v223_v31  ;;  %v1005_v49 = vmul.f32 %v3388_v24, %v287_v32  ;;  %v228_v27 = vld [vmem:[#allocation8 + $0x548] sm:$0xff]  ;;  %v165_v34 = vld [vmem:[#allocation8 + $0x350] sm:$0xff] }
  0x5a   :  { %v808_v52 = vadd.f32 %v744_v36, %v548_v39  ;;  %v549_v53 = vadd.f32 %v485_v42, %v353_v41  ;;  %v354_v54 = vmul.f32 %v3375_v7, %v96_v37  ;;  %v486_v55 = vmul.f32 %v3378_v12, %v160_v38  ;;  %v229_v35 = vld [vmem:[#allocation8 + $0x550] sm:$0xff]  ;;  %v102_v41 = vld [vmem:[#allocation8 + $0x158] sm:$0xff] }
  0x5b   :  { %1260 = vst [vmem:[#allocation9 + $0x108] sm:$0xff] %v1066_v46  ;;  %v1067_v59 = vadd.f32 %v1003_v28, %v807_v47  ;;  %v746_v60 = vmul.f32 %v3383_v17, %v224_v43  ;;  %v1006_v61 = vmul.f32 %v3388_v24, %v288_v44  ;;  %v355_v62 = vmul.f32 %v3375_v7, %v97_v45  ;;  %v292_v28 = vld [vmem:[#allocation8 + $0x748] sm:$0xff]  ;;  %v166_v42 = vld [vmem:[#allocation8 + $0x358] sm:$0xff] }
  0x5c   :  { %v1068_v0 = vadd.f32 %v1004_v40, %v808_v52  ;;  %v809_v1 = vadd.f32 %v745_v48, %v549_v53  ;;  %v550_v2 = vadd.f32 %v486_v55, %v354_v54  ;;  %v487_v3 = vmul.f32 %v3378_v12, %v161_v50  ;;  %v293_v40 = vld [vmem:[#allocation8 + $0x750] sm:$0xff]  ;;  %v230_v47 = vld [vmem:[#allocation8 + $0x558] sm:$0xff]  ;;  %v103_v53 = vld [vmem:[#allocation8 + $0x160] sm:$0xff] }
  0x5d   :  { %1261 = vst [vmem:[#allocation9 + $0x110] sm:$0xff] %v1067_v59  ;;  %v747_v8 = vmul.f32 %v3383_v17, %v225_v51  ;;  %v1007_v9 = vmul.f32 %v3388_v24, %v289_v56  ;;  %v356_v10 = vmul.f32 %v3375_v7, %v98_v57  ;;  %v488_v11 = vmul.f32 %v3378_v12, %v162_v58  ;;  %v294_v52 = vld [vmem:[#allocation8 + $0x758] sm:$0xff]  ;;  %v167_v54 = vld [vmem:[#allocation8 + $0x360] sm:$0xff] }
  0x5e   :  { %1262 = vst [vmem:[#allocation9 + $0x118] sm:$0xff] %v1068_v0  ;;  %v1069_v15 = vadd.f32 %v1005_v49, %v809_v1  ;;  %v810_v16 = vadd.f32 %v746_v60, %v550_v2  ;;  %v551_v18 = vadd.f32 %v487_v3, %v355_v62  ;;  %v748_v19 = vmul.f32 %v3383_v17, %v226_v63  ;;  %v231_v59 = vld [vmem:[#allocation8 + $0x560] sm:$0xff]  ;;  %v104_v1 = vld [vmem:[#allocation8 + $0x168] sm:$0xff] }
  0x5f   :  { %v552_v22 = vadd.f32 %v488_v11, %v356_v10  ;;  %v1008_v23 = vmul.f32 %v3388_v24, %v290_v4  ;;  %v357_v25 = vmul.f32 %v3375_v7, %v99_v5  ;;  %v489_v26 = vmul.f32 %v3378_v12, %v163_v6  ;;  %v295_v60 = vld [vmem:[#allocation8 + $0x760] sm:$0xff]  ;;  %v168_v2 = vld [vmem:[#allocation8 + $0x368] sm:$0xff]  ;;  %v105_v10 = vld [vmem:[#allocation8 + $0x170] sm:$0xff] }
  0x60   :  { %1263 = vst [vmem:[#allocation9 + $0x120] sm:$0xff] %v1069_v15  ;;  %v1070_v30 = vadd.f32 %v1006_v61, %v810_v16  ;;  %v811_v31 = vadd.f32 %v747_v8, %v551_v18  ;;  %v749_v32 = vmul.f32 %v3383_v17, %v227_v13  ;;  %v1009_v33 = vmul.f32 %v3388_v24, %v291_v14  ;;  %v232_v8 = vld [vmem:[#allocation8 + $0x568] sm:$0xff]  ;;  %v169_v16 = vld [vmem:[#allocation8 + $0x370] sm:$0xff] }
  0x61   :  { %v812_v36 = vadd.f32 %v748_v19, %v552_v22  ;;  %v553_v37 = vadd.f32 %v489_v26, %v357_v25  ;;  %v358_v38 = vmul.f32 %v3375_v7, %v100_v20  ;;  %v490_v39 = vmul.f32 %v3378_v12, %v164_v21  ;;  %v233_v18 = vld [vmem:[#allocation8 + $0x570] sm:$0xff]  ;;  %v106_v25 = vld [vmem:[#allocation8 + $0x178] sm:$0xff] }
  0x62   :  { %1264 = vst [vmem:[#allocation9 + $0x128] sm:$0xff] %v1070_v30  ;;  %v1071_v43 = vadd.f32 %v1007_v9, %v811_v31  ;;  %v750_v44 = vmul.f32 %v3383_v17, %v228_v27  ;;  %v1010_v45 = vmul.f32 %v3388_v24, %v292_v28  ;;  %v359_v46 = vmul.f32 %v3375_v7, %v101_v29  ;;  %v296_v9 = vld [vmem:[#allocation8 + $0x768] sm:$0xff]  ;;  %v170_v26 = vld [vmem:[#allocation8 + $0x378] sm:$0xff] }
  0x63   :  { %v1072_v48 = vadd.f32 %v1008_v23, %v812_v36  ;;  %v813_v49 = vadd.f32 %v749_v32, %v553_v37  ;;  %v554_v50 = vadd.f32 %v490_v39, %v358_v38  ;;  %v491_v51 = vmul.f32 %v3378_v12, %v165_v34  ;;  %v297_v23 = vld [vmem:[#allocation8 + $0x770] sm:$0xff]  ;;  %v234_v31 = vld [vmem:[#allocation8 + $0x578] sm:$0xff]  ;;  %v107_v37 = vld [vmem:[#allocation8 + $0x180] sm:$0xff] }
  0x64   :  { %1265 = vst [vmem:[#allocation9 + $0x130] sm:$0xff] %v1071_v43  ;;  %v751_v55 = vmul.f32 %v3383_v17, %v229_v35  ;;  %v1011_v56 = vmul.f32 %v3388_v24, %v293_v40  ;;  %v360_v57 = vmul.f32 %v3375_v7, %v102_v41  ;;  %v492_v58 = vmul.f32 %v3378_v12, %v166_v42  ;;  %v298_v36 = vld [vmem:[#allocation8 + $0x778] sm:$0xff]  ;;  %v171_v38 = vld [vmem:[#allocation8 + $0x380] sm:$0xff] }
  0x65   :  { %1266 = vst [vmem:[#allocation9 + $0x138] sm:$0xff] %v1072_v48  ;;  %v1073_v61 = vadd.f32 %v1009_v33, %v813_v49  ;;  %v814_v62 = vadd.f32 %v750_v44, %v554_v50  ;;  %v555_v63 = vadd.f32 %v491_v51, %v359_v46  ;;  %v752_v0 = vmul.f32 %v3383_v17, %v230_v47  ;;  %v235_v43 = vld [vmem:[#allocation8 + $0x580] sm:$0xff]  ;;  %v108_v49 = vld [vmem:[#allocation8 + $0x188] sm:$0xff] }
  0x66   :  { %v556_v3 = vadd.f32 %v492_v58, %v360_v57  ;;  %v1012_v4 = vmul.f32 %v3388_v24, %v294_v52  ;;  %v361_v5 = vmul.f32 %v3375_v7, %v103_v53  ;;  %v493_v6 = vmul.f32 %v3378_v12, %v167_v54  ;;  %v299_v44 = vld [vmem:[#allocation8 + $0x780] sm:$0xff]  ;;  %v172_v50 = vld [vmem:[#allocation8 + $0x388] sm:$0xff]  ;;  %v109_v57 = vld [vmem:[#allocation8 + $0x190] sm:$0xff] }
  0x67   :  { %1267 = vst [vmem:[#allocation9 + $0x140] sm:$0xff] %v1073_v61  ;;  %v1074_v11 = vadd.f32 %v1010_v45, %v814_v62  ;;  %v815_v13 = vadd.f32 %v751_v55, %v555_v63  ;;  %v753_v14 = vmul.f32 %v3383_v17, %v231_v59  ;;  %v1013_v15 = vmul.f32 %v3388_v24, %v295_v60  ;;  %v236_v55 = vld [vmem:[#allocation8 + $0x588] sm:$0xff]  ;;  %v173_v62 = vld [vmem:[#allocation8 + $0x390] sm:$0xff] }
  0x68   :  { %v816_v19 = vadd.f32 %v752_v0, %v556_v3  ;;  %v557_v20 = vadd.f32 %v493_v6, %v361_v5  ;;  %v362_v21 = vmul.f32 %v3375_v7, %v104_v1  ;;  %v494_v22 = vmul.f32 %v3378_v12, %v168_v2  ;;  %v237_v63 = vld [vmem:[#allocation8 + $0x590] sm:$0xff]  ;;  %v110_v5 = vld [vmem:[#allocation8 + $0x198] sm:$0xff] }
  0x69   :  { %1268 = vst [vmem:[#allocation9 + $0x148] sm:$0xff] %v1074_v11  ;;  %v1075_v27 = vadd.f32 %v1011_v56, %v815_v13  ;;  %v754_v28 = vmul.f32 %v3383_v17, %v232_v8  ;;  %v1014_v29 = vmul.f32 %v3388_v24, %v296_v9  ;;  %v363_v30 = vmul.f32 %v3375_v7, %v105_v10  ;;  %v300_v56 = vld [vmem:[#allocation8 + $0x788] sm:$0xff]  ;;  %v174_v6 = vld [vmem:[#allocation8 + $0x398] sm:$0xff] }
  0x6a   :  { %v1076_v32 = vadd.f32 %v1012_v4, %v816_v19  ;;  %v817_v33 = vadd.f32 %v753_v14, %v557_v20  ;;  %v558_v34 = vadd.f32 %v494_v22, %v362_v21  ;;  %v495_v35 = vmul.f32 %v3378_v12, %v169_v16  ;;  %v301_v4 = vld [vmem:[#allocation8 + $0x790] sm:$0xff]  ;;  %v238_v13 = vld [vmem:[#allocation8 + $0x598] sm:$0xff]  ;;  %v111_v20 = vld [vmem:[#allocation8 + $0x1a0] sm:$0xff] }
  0x6b   :  { %1269 = vst [vmem:[#allocation9 + $0x150] sm:$0xff] %v1075_v27  ;;  %v755_v39 = vmul.f32 %v3383_v17, %v233_v18  ;;  %v1015_v40 = vmul.f32 %v3388_v24, %v297_v23  ;;  %v364_v41 = vmul.f32 %v3375_v7, %v106_v25  ;;  %v496_v42 = vmul.f32 %v3378_v12, %v170_v26  ;;  %v302_v19 = vld [vmem:[#allocation8 + $0x798] sm:$0xff]  ;;  %v175_v21 = vld [vmem:[#allocation8 + $0x3a0] sm:$0xff] }
  0x6c   :  { %1270 = vst [vmem:[#allocation9 + $0x158] sm:$0xff] %v1076_v32  ;;  %v1077_v45 = vadd.f32 %v1013_v15, %v817_v33  ;;  %v818_v46 = vadd.f32 %v754_v28, %v558_v34  ;;  %v559_v47 = vadd.f32 %v495_v35, %v363_v30  ;;  %v756_v48 = vmul.f32 %v3383_v17, %v234_v31  ;;  %v239_v27 = vld [vmem:[#allocation8 + $0x5a0] sm:$0xff]  ;;  %v112_v33 = vld [vmem:[#allocation8 + $0x1a8] sm:$0xff] }
  0x6d   :  { %v560_v51 = vadd.f32 %v496_v42, %v364_v41  ;;  %v1016_v52 = vmul.f32 %v3388_v24, %v298_v36  ;;  %v365_v53 = vmul.f32 %v3375_v7, %v107_v37  ;;  %v497_v54 = vmul.f32 %v3378_v12, %v171_v38  ;;  %v303_v28 = vld [vmem:[#allocation8 + $0x7a0] sm:$0xff]  ;;  %v176_v34 = vld [vmem:[#allocation8 + $0x3a8] sm:$0xff]  ;;  %v113_v41 = vld [vmem:[#allocation8 + $0x1b0] sm:$0xff] }
  0x6e   :  { %1271 = vst [vmem:[#allocation9 + $0x160] sm:$0xff] %v1077_v45  ;;  %v1078_v58 = vadd.f32 %v1014_v29, %v818_v46  ;;  %v819_v59 = vadd.f32 %v755_v39, %v559_v47  ;;  %v757_v60 = vmul.f32 %v3383_v17, %v235_v43  ;;  %v1017_v61 = vmul.f32 %v3388_v24, %v299_v44  ;;  %v240_v39 = vld [vmem:[#allocation8 + $0x5a8] sm:$0xff]  ;;  %v177_v46 = vld [vmem:[#allocation8 + $0x3b0] sm:$0xff] }
  0x6f   :  { %v820_v0 = vadd.f32 %v756_v48, %v560_v51  ;;  %v561_v1 = vadd.f32 %v497_v54, %v365_v53  ;;  %v366_v2 = vmul.f32 %v3375_v7, %v108_v49  ;;  %v498_v3 = vmul.f32 %v3378_v12, %v172_v50  ;;  %v241_v47 = vld [vmem:[#allocation8 + $0x5b0] sm:$0xff]  ;;  %v114_v53 = vld [vmem:[#allocation8 + $0x1b8] sm:$0xff] }
  0x70   :  { %1272 = vst [vmem:[#allocation9 + $0x168] sm:$0xff] %v1078_v58  ;;  %v1079_v8 = vadd.f32 %v1015_v40, %v819_v59  ;;  %v758_v9 = vmul.f32 %v3383_v17, %v236_v55  ;;  %v1018_v10 = vmul.f32 %v3388_v24, %v300_v56  ;;  %v367_v11 = vmul.f32 %v3375_v7, %v109_v57  ;;  %v304_v40 = vld [vmem:[#allocation8 + $0x7a8] sm:$0xff]  ;;  %v178_v54 = vld [vmem:[#allocation8 + $0x3b8] sm:$0xff] }
  0x71   :  { %v1080_v14 = vadd.f32 %v1016_v52, %v820_v0  ;;  %v821_v15 = vadd.f32 %v757_v60, %v561_v1  ;;  %v562_v16 = vadd.f32 %v498_v3, %v366_v2  ;;  %v499_v18 = vmul.f32 %v3378_v12, %v173_v62  ;;  %v305_v52 = vld [vmem:[#allocation8 + $0x7b0] sm:$0xff]  ;;  %v242_v59 = vld [vmem:[#allocation8 + $0x5b8] sm:$0xff]  ;;  %v115_v1 = vld [vmem:[#allocation8 + $0x1c0] sm:$0xff] }
  0x72   :  { %1273 = vst [vmem:[#allocation9 + $0x170] sm:$0xff] %v1079_v8  ;;  %v759_v22 = vmul.f32 %v3383_v17, %v237_v63  ;;  %v1019_v23 = vmul.f32 %v3388_v24, %v301_v4  ;;  %v368_v25 = vmul.f32 %v3375_v7, %v110_v5  ;;  %v500_v26 = vmul.f32 %v3378_v12, %v174_v6  ;;  %v306_v0 = vld [vmem:[#allocation8 + $0x7b8] sm:$0xff]  ;;  %v179_v2 = vld [vmem:[#allocation8 + $0x3c0] sm:$0xff] }
  0x73   :  { %1274 = vst [vmem:[#allocation9 + $0x178] sm:$0xff] %v1080_v14  ;;  %v1081_v29 = vadd.f32 %v1017_v61, %v821_v15  ;;  %v822_v30 = vadd.f32 %v758_v9, %v562_v16  ;;  %v563_v31 = vadd.f32 %v499_v18, %v367_v11  ;;  %v760_v32 = vmul.f32 %v3383_v17, %v238_v13  ;;  %v243_v8 = vld [vmem:[#allocation8 + $0x5c0] sm:$0xff]  ;;  %v116_v15 = vld [vmem:[#allocation8 + $0x1c8] sm:$0xff] }
  0x74   :  { %v564_v35 = vadd.f32 %v500_v26, %v368_v25  ;;  %v1020_v36 = vmul.f32 %v3388_v24, %v302_v19  ;;  %v369_v37 = vmul.f32 %v3375_v7, %v111_v20  ;;  %v501_v38 = vmul.f32 %v3378_v12, %v175_v21  ;;  %v307_v9 = vld [vmem:[#allocation8 + $0x7c0] sm:$0xff]  ;;  %v180_v16 = vld [vmem:[#allocation8 + $0x3c8] sm:$0xff]  ;;  %v117_v25 = vld [vmem:[#allocation8 + $0x1d0] sm:$0xff] }
  0x75   :  { %1275 = vst [vmem:[#allocation9 + $0x180] sm:$0xff] %v1081_v29  ;;  %v1082_v42 = vadd.f32 %v1018_v10, %v822_v30  ;;  %v823_v43 = vadd.f32 %v759_v22, %v563_v31  ;;  %v761_v44 = vmul.f32 %v3383_v17, %v239_v27  ;;  %v1021_v45 = vmul.f32 %v3388_v24, %v303_v28  ;;  %v244_v22 = vld [vmem:[#allocation8 + $0x5c8] sm:$0xff]  ;;  %v181_v30 = vld [vmem:[#allocation8 + $0x3d0] sm:$0xff] }
  0x76   :  { %v824_v48 = vadd.f32 %v760_v32, %v564_v35  ;;  %v565_v49 = vadd.f32 %v501_v38, %v369_v37  ;;  %v370_v50 = vmul.f32 %v3375_v7, %v112_v33  ;;  %v502_v51 = vmul.f32 %v3378_v12, %v176_v34  ;;  %v245_v31 = vld [vmem:[#allocation8 + $0x5d0] sm:$0xff]  ;;  %v118_v37 = vld [vmem:[#allocation8 + $0x1d8] sm:$0xff] }
  0x77   :  { %1276 = vst [vmem:[#allocation9 + $0x188] sm:$0xff] %v1082_v42  ;;  %v1083_v55 = vadd.f32 %v1019_v23, %v823_v43  ;;  %v762_v56 = vmul.f32 %v3383_v17, %v240_v39  ;;  %v1022_v57 = vmul.f32 %v3388_v24, %v304_v40  ;;  %v371_v58 = vmul.f32 %v3375_v7, %v113_v41  ;;  %v308_v23 = vld [vmem:[#allocation8 + $0x7c8] sm:$0xff]  ;;  %v182_v38 = vld [vmem:[#allocation8 + $0x3d8] sm:$0xff] }
  0x78   :  { %v1084_v60 = vadd.f32 %v1020_v36, %v824_v48  ;;  %v825_v61 = vadd.f32 %v761_v44, %v565_v49  ;;  %v566_v62 = vadd.f32 %v502_v51, %v370_v50  ;;  %v503_v63 = vmul.f32 %v3378_v12, %v177_v46  ;;  %v309_v36 = vld [vmem:[#allocation8 + $0x7d0] sm:$0xff]  ;;  %v246_v43 = vld [vmem:[#allocation8 + $0x5d8] sm:$0xff]  ;;  %v119_v49 = vld [vmem:[#allocation8 + $0x1e0] sm:$0xff] }
  0x79   :  { %1277 = vst [vmem:[#allocation9 + $0x190] sm:$0xff] %v1083_v55  ;;  %v763_v3 = vmul.f32 %v3383_v17, %v241_v47  ;;  %v1023_v4 = vmul.f32 %v3388_v24, %v305_v52  ;;  %v372_v5 = vmul.f32 %v3375_v7, %v114_v53  ;;  %v504_v6 = vmul.f32 %v3378_v12, %v178_v54  ;;  %v310_v48 = vld [vmem:[#allocation8 + $0x7d8] sm:$0xff]  ;;  %v183_v50 = vld [vmem:[#allocation8 + $0x3e0] sm:$0xff] }
  0x7a   :  { %1278 = vst [vmem:[#allocation9 + $0x198] sm:$0xff] %v1084_v60  ;;  %v1085_v10 = vadd.f32 %v1021_v45, %v825_v61  ;;  %v826_v11 = vadd.f32 %v762_v56, %v566_v62  ;;  %v567_v13 = vadd.f32 %v503_v63, %v371_v58  ;;  %v764_v14 = vmul.f32 %v3383_v17, %v242_v59  ;;  %v247_v55 = vld [vmem:[#allocation8 + $0x5e0] sm:$0xff]  ;;  %v120_v61 = vld [vmem:[#allocation8 + $0x1e8] sm:$0xff] }
  0x7b   :  { %v568_v18 = vadd.f32 %v504_v6, %v372_v5  ;;  %v1024_v19 = vmul.f32 %v3388_v24, %v306_v0  ;;  %v373_v20 = vmul.f32 %v3375_v7, %v115_v1  ;;  %v505_v21 = vmul.f32 %v3378_v12, %v179_v2  ;;  %v311_v56 = vld [vmem:[#allocation8 + $0x7e0] sm:$0xff]  ;;  %v184_v62 = vld [vmem:[#allocation8 + $0x3e8] sm:$0xff]  ;;  %v121_v5 = vld [vmem:[#allocation8 + $0x1f0] sm:$0xff] }
  0x7c   :  { %1279 = vst [vmem:[#allocation9 + $0x1a0] sm:$0xff] %v1085_v10  ;;  %v1086_v26 = vadd.f32 %v1022_v57, %v826_v11  ;;  %v827_v27 = vadd.f32 %v763_v3, %v567_v13  ;;  %v765_v28 = vmul.f32 %v3383_v17, %v243_v8  ;;  %v1025_v29 = vmul.f32 %v3388_v24, %v307_v9  ;;  %v248_v3 = vld [vmem:[#allocation8 + $0x5e8] sm:$0xff]  ;;  %v185_v11 = vld [vmem:[#allocation8 + $0x3f0] sm:$0xff] }
  0x7d   :  { %v828_v32 = vadd.f32 %v764_v14, %v568_v18  ;;  %v569_v33 = vadd.f32 %v505_v21, %v373_v20  ;;  %v374_v34 = vmul.f32 %v3375_v7, %v116_v15  ;;  %v506_v35 = vmul.f32 %v3378_v12, %v180_v16  ;;  %v249_v13 = vld [vmem:[#allocation8 + $0x5f0] sm:$0xff]  ;;  %v122_v20 = vld [vmem:[#allocation8 + $0x1f8] sm:$0xff] }
  0x7e   :  { %1280 = vst [vmem:[#allocation9 + $0x1a8] sm:$0xff] %v1086_v26  ;;  %v1087_v39 = vadd.f32 %v1023_v4, %v827_v27  ;;  %v766_v40 = vmul.f32 %v3383_v17, %v244_v22  ;;  %v1026_v41 = vmul.f32 %v3388_v24, %v308_v23  ;;  %v375_v42 = vmul.f32 %v3375_v7, %v117_v25  ;;  %v312_v4 = vld [vmem:[#allocation8 + $0x7e8] sm:$0xff]  ;;  %v186_v21 = vld [vmem:[#allocation8 + $0x3f8] sm:$0xff] }
  0x7f   :  { %v1088_v44 = vadd.f32 %v1024_v19, %v828_v32  ;;  %v829_v45 = vadd.f32 %v765_v28, %v569_v33  ;;  %v570_v46 = vadd.f32 %v506_v35, %v374_v34  ;;  %v507_v47 = vmul.f32 %v3378_v12, %v181_v30  ;;  %v313_v19 = vld [vmem:[#allocation8 + $0x7f0] sm:$0xff]  ;;  %v250_v27 = vld [vmem:[#allocation8 + $0x5f8] sm:$0xff] }
  0x80   :  { %1281 = vst [vmem:[#allocation9 + $0x1b0] sm:$0xff] %v1087_v39  ;;  %v767_v51 = vmul.f32 %v3383_v17, %v245_v31  ;;  %v1027_v52 = vmul.f32 %v3388_v24, %v309_v36  ;;  %v376_v53 = vmul.f32 %v3375_v7, %v118_v37  ;;  %v508_v54 = vmul.f32 %v3378_v12, %v182_v38  ;;  %v314_v32 = vld [vmem:[#allocation8 + $0x7f8] sm:$0xff] }
  0x81   :  { %1282 = vst [vmem:[#allocation9 + $0x1b8] sm:$0xff] %v1088_v44  ;;  %v1089_v57 = vadd.f32 %v1025_v29, %v829_v45  ;;  %v830_v58 = vadd.f32 %v766_v40, %v570_v46  ;;  %v571_v59 = vadd.f32 %v507_v47, %v375_v42  ;;  %v768_v60 = vmul.f32 %v3383_v17, %v246_v43  ;;  %v2457_v46 = vld [vmem:[#allocation8] sm:$0xff] }
  0x82   :  { %v572_v63 = vadd.f32 %v508_v54, %v376_v53  ;;  %v1028_v0 = vmul.f32 %v3388_v24, %v310_v48  ;;  %v377_v1 = vmul.f32 %v3375_v7, %v119_v49  ;;  %v509_v2 = vmul.f32 %v3378_v12, %v183_v50  ;;  %v2458_v47 = vld [vmem:[#allocation8 + $0x200] sm:$0xff] }
  0x83   :  { %1283 = vst [vmem:[#allocation9 + $0x1c0] sm:$0xff] %v1089_v57  ;;  %v1090_v6 = vadd.f32 %v1026_v41, %v830_v58  ;;  %v831_v8 = vadd.f32 %v767_v51, %v571_v59  ;;  %v769_v9 = vmul.f32 %v3383_v17, %v247_v55  ;;  %v1029_v10 = vmul.f32 %v3388_v24, %v311_v56  ;;  %v2459_v51 = vld [vmem:[#allocation8 + $0x8] sm:$0xff]  ;;  %v2460_v54 = vld [vmem:[#allocation8 + $0x400] sm:$0xff] }
  0x84   :  { %v832_v14 = vadd.f32 %v768_v60, %v572_v63  ;;  %v573_v15 = vadd.f32 %v509_v2, %v377_v1  ;;  %v378_v16 = vmul.f32 %v3375_v7, %v120_v61  ;;  %v510_v18 = vmul.f32 %v3378_v12, %v184_v62  ;;  %v2461_v56 = vld [vmem:[#allocation8 + $0x600] sm:$0xff]  ;;  %v2462_v59 = vld [vmem:[#allocation8 + $0x208] sm:$0xff]  ;;  %v2465_v2 = vld [vmem:[#allocation8 + $0x10] sm:$0xff] }
  0x85   :  { %1284 = vst [vmem:[#allocation9 + $0x1c8] sm:$0xff] %v1090_v6  ;;  %v1091_v22 = vadd.f32 %v1027_v52, %v831_v8  ;;  %v770_v23 = vmul.f32 %v3383_v17, %v248_v3  ;;  %v1030_v25 = vmul.f32 %v3388_v24, %v312_v4  ;;  %v379_v26 = vmul.f32 %v3375_v7, %v121_v5  ;;  %v2463_v61 = vld [vmem:[#allocation8 + $0x408] sm:$0xff]  ;;  %v2466_v4 = vld [vmem:[#allocation8 + $0x210] sm:$0xff] }
  0x86   :  { %v1092_v28 = vadd.f32 %v1028_v0, %v832_v14  ;;  %v833_v29 = vadd.f32 %v769_v9, %v573_v15  ;;  %v574_v30 = vadd.f32 %v510_v18, %v378_v16  ;;  %v511_v31 = vmul.f32 %v3378_v12, %v185_v11  ;;  %v2464_v63 = vld [vmem:[#allocation8 + $0x608] sm:$0xff]  ;;  %v2467_v6 = vld [vmem:[#allocation8 + $0x410] sm:$0xff]  ;;  %v2470_v15 = vld [vmem:[#allocation8 + $0x218] sm:$0xff] }
  0x87   :  { %1285 = vst [vmem:[#allocation9 + $0x1d0] sm:$0xff] %v1091_v22  ;;  %v771_v33 = vmul.f32 %v3383_v17, %v249_v13  ;;  %v1031_v34 = vmul.f32 %v3388_v24, %v313_v19  ;;  %v380_v35 = vmul.f32 %v3375_v7, %v122_v20  ;;  %v512_v36 = vmul.f32 %v3378_v12, %v186_v21  ;;  %v2469_v13 = vld [vmem:[#allocation8 + $0x18] sm:$0xff] }
  0x88   :  { %1286 = vst [vmem:[#allocation9 + $0x1d8] sm:$0xff] %v1092_v28  ;;  %v1093_v37 = vadd.f32 %v1029_v10, %v833_v29  ;;  %v834_v38 = vadd.f32 %v770_v23, %v574_v30  ;;  %v575_v39 = vadd.f32 %v511_v31, %v379_v26  ;;  %v772_v40 = vmul.f32 %v3383_v17, %v250_v27  ;;  %v2468_v10 = vld [vmem:[#allocation8 + $0x610] sm:$0xff]  ;;  %v2471_v20 = vld [vmem:[#allocation8 + $0x418] sm:$0xff]  ;;  %v2473_v27 = vld [vmem:[#allocation8 + $0x20] sm:$0xff] }
  0x89   :  { %v576_v41 = vadd.f32 %v512_v36, %v380_v35  ;;  %v1032_v42 = vmul.f32 %v3388_v24, %v314_v32  ;;  %v3648_v43 = vstv %s3621_s5  ;;  %v3651_v44 = vstv %s3624_s6  ;;  %v2472_v22 = vld [vmem:[#allocation8 + $0x618] sm:$0xff]  ;;  %v2474_v29 = vld [vmem:[#allocation8 + $0x220] sm:$0xff]  ;;  %v2477_v36 = vld [vmem:[#allocation8 + $0x28] sm:$0xff] }
  0x8a   :  { %1287 = vst [vmem:[#allocation9 + $0x1e0] sm:$0xff] %v1093_v37  ;;  %v1094_v45 = vadd.f32 %v1030_v25, %v834_v38  ;;  %v835_v7 = vadd.f32 %v771_v33, %v575_v39  ;;  %v383_v12 = vmul.f32 %v2457_v46, %v3648_v43  ;;  %v579_v48 = vmul.f32 %v2458_v47, %v3651_v44  ;;  %v2475_v32 = vld [vmem:[#allocation8 + $0x420] sm:$0xff] }
  0x8b   :  { %v836_v49 = vadd.f32 %v772_v40, %v576_v41  ;;  %v3656_v50 = vstv %s3629_s7  ;;  %v3659_v17 = vstv %s3633_s8  ;;  %v384_v24 = vmul.f32 %v2459_v51, %v3648_v43  ;;  %v2478_v41 = vld [vmem:[#allocation8 + $0x228] sm:$0xff] }
  0x8c   :  { %1288 = vst [vmem:[#allocation9 + $0x1e8] sm:$0xff] %v1094_v45  ;;  %v1095_v52 = vadd.f32 %v1031_v34, %v835_v7  ;;  %v643_v53 = vadd.f32 %v579_v48, %v383_v12  ;;  %v839_v55 = vmul.f32 %v2460_v54, %v3656_v50  ;;  %v1099_v57 = vmul.f32 %v2461_v56, %v3659_v17  ;;  %v2476_v34 = vld [vmem:[#allocation8 + $0x620] sm:$0xff]  ;;  %v2479_v7 = vld [vmem:[#allocation8 + $0x428] sm:$0xff]  ;;  %v2481_v48 = vld [vmem:[#allocation8 + $0x30] sm:$0xff] }
  0x8d   :  { %v1096_v58 = vadd.f32 %v1032_v42, %v836_v49  ;;  %v580_v60 = vmul.f32 %v2462_v59, %v3651_v44  ;;  %v840_v62 = vmul.f32 %v2463_v61, %v3656_v50  ;;  %v1100_v0 = vmul.f32 %v2464_v63, %v3659_v17  ;;  %v2480_v12 = vld [vmem:[#allocation8 + $0x628] sm:$0xff]  ;;  %v2485_v59 = vld [vmem:[#allocation8 + $0x38] sm:$0xff] }
  0x8e   :  { %1289 = vst [vmem:[#allocation9 + $0x1f0] sm:$0xff] %v1095_v52  ;;  %v903_v1 = vadd.f32 %v839_v55, %v643_v53  ;;  %v385_v3 = vmul.f32 %v2465_v2, %v3648_v43  ;;  %v581_v5 = vmul.f32 %v2466_v4, %v3651_v44  ;;  %v841_v8 = vmul.f32 %v2467_v6, %v3656_v50  ;;  %v2482_v53 = vld [vmem:[#allocation8 + $0x230] sm:$0xff]  ;;  %v2486_v61 = vld [vmem:[#allocation8 + $0x238] sm:$0xff] }
  0x8f   :  { %1290 = vst [vmem:[#allocation9 + $0x1f8] sm:$0xff] %v1096_v58  ;;  %v644_v9 = vadd.f32 %v580_v60, %v384_v24  ;;  %v1101_v11 = vmul.f32 %v2468_v10, %v3659_v17  ;;  %v386_v14 = vmul.f32 %v2469_v13, %v3648_v43  ;;  %v582_v16 = vmul.f32 %v2470_v15, %v3651_v44  ;;  %v2483_v55 = vld [vmem:[#allocation8 + $0x430] sm:$0xff]  ;;  %v2487_v2 = vld [vmem:[#allocation8 + $0x438] sm:$0xff]  ;;  %v2490_v10 = vld [vmem:[#allocation8 + $0x240] sm:$0xff] }
  0x90   :  { %v1163_v18 = vadd.f32 %v1099_v57, %v903_v1  ;;  %v645_v19 = vadd.f32 %v581_v5, %v385_v3  ;;  %v842_v21 = vmul.f32 %v2471_v20, %v3656_v50  ;;  %v1102_v23 = vmul.f32 %v2472_v22, %v3659_v17  ;;  %v2484_v57 = vld [vmem:[#allocation8 + $0x630] sm:$0xff]  ;;  %v2488_v5 = vld [vmem:[#allocation8 + $0x638] sm:$0xff]  ;;  %v2491_v15 = vld [vmem:[#allocation8 + $0x440] sm:$0xff] }
  0x91   :  { %v904_v25 = vadd.f32 %v840_v62, %v644_v9  ;;  %v646_v26 = vadd.f32 %v582_v16, %v386_v14  ;;  %v387_v28 = vmul.f32 %v2473_v27, %v3648_v43  ;;  %v583_v30 = vmul.f32 %v2474_v29, %v3651_v44  ;;  %v2493_v22 = vld [vmem:[#allocation8 + $0x48] sm:$0xff] }
  0x92   :  { %1291 = vst [vmem:[#allocation10] sm:$0xff] %v1163_v18  ;;  %v905_v31 = vadd.f32 %v841_v8, %v645_v19  ;;  %v843_v33 = vmul.f32 %v2475_v32, %v3656_v50  ;;  %v1103_v35 = vmul.f32 %v2476_v34, %v3659_v17  ;;  %v388_v37 = vmul.f32 %v2477_v36, %v3648_v43  ;;  %v2489_v8 = vld [vmem:[#allocation8 + $0x40] sm:$0xff]  ;;  %v2497_v32 = vld [vmem:[#allocation8 + $0x50] sm:$0xff] }
  0x93   :  { %v1164_v38 = vadd.f32 %v1100_v0, %v904_v25  ;;  %v906_v39 = vadd.f32 %v842_v21, %v646_v26  ;;  %v647_v40 = vadd.f32 %v583_v30, %v387_v28  ;;  %v584_v42 = vmul.f32 %v2478_v41, %v3651_v44  ;;  %v2492_v18 = vld [vmem:[#allocation8 + $0x640] sm:$0xff]  ;;  %v2494_v25 = vld [vmem:[#allocation8 + $0x248] sm:$0xff]  ;;  %v2500_v41 = vld [vmem:[#allocation8 + $0x650] sm:$0xff] }
  0x94   :  { %v1165_v45 = vadd.f32 %v1101_v11, %v905_v31  ;;  %v844_v46 = vmul.f32 %v2479_v7, %v3656_v50  ;;  %v1104_v47 = vmul.f32 %v2480_v12, %v3659_v17  ;;  %v389_v49 = vmul.f32 %v2481_v48, %v3648_v43  ;;  %v2495_v28 = vld [vmem:[#allocation8 + $0x448] sm:$0xff] }
  0x95   :  { %1292 = vst [vmem:[#allocation10 + $0x8] sm:$0xff] %v1164_v38  ;;  %v1166_v51 = vadd.f32 %v1102_v23, %v906_v39  ;;  %v907_v24 = vadd.f32 %v843_v33, %v647_v40  ;;  %v648_v52 = vadd.f32 %v584_v42, %v388_v37  ;;  %v585_v54 = vmul.f32 %v2482_v53, %v3651_v44  ;;  %v2496_v30 = vld [vmem:[#allocation8 + $0x648] sm:$0xff]  ;;  %v2498_v37 = vld [vmem:[#allocation8 + $0x250] sm:$0xff]  ;;  %v2504_v53 = vld [vmem:[#allocation8 + $0x658] sm:$0xff] }
  0x96   :  { %1293 = vst [vmem:[#allocation10 + $0x10] sm:$0xff] %v1165_v45  ;;  %v845_v56 = vmul.f32 %v2483_v55, %v3656_v50  ;;  %v1105_v58 = vmul.f32 %v2484_v57, %v3659_v17  ;;  %v390_v60 = vmul.f32 %v2485_v59, %v3648_v43  ;;  %v586_v62 = vmul.f32 %v2486_v61, %v3651_v44  ;;  %v2499_v39 = vld [vmem:[#allocation8 + $0x450] sm:$0xff]  ;;  %v2501_v45 = vld [vmem:[#allocation8 + $0x58] sm:$0xff]  ;;  %v2505_v55 = vld [vmem:[#allocation8 + $0x60] sm:$0xff] }
  0x97   :  { %1294 = vst [vmem:[#allocation10 + $0x18] sm:$0xff] %v1166_v51  ;;  %v1167_v63 = vadd.f32 %v1103_v35, %v907_v24  ;;  %v908_v0 = vadd.f32 %v844_v46, %v648_v52  ;;  %v649_v1 = vadd.f32 %v585_v54, %v389_v49  ;;  %v846_v3 = vmul.f32 %v2487_v2, %v3656_v50  ;;  %v2502_v46 = vld [vmem:[#allocation8 + $0x258] sm:$0xff]  ;;  %v2506_v57 = vld [vmem:[#allocation8 + $0x260] sm:$0xff] }
  0x98   :  { %v650_v4 = vadd.f32 %v586_v62, %v390_v60  ;;  %v1106_v6 = vmul.f32 %v2488_v5, %v3659_v17  ;;  %v391_v9 = vmul.f32 %v2489_v8, %v3648_v43  ;;  %v587_v11 = vmul.f32 %v2490_v10, %v3651_v44  ;;  %v2503_v51 = vld [vmem:[#allocation8 + $0x458] sm:$0xff]  ;;  %v2507_v61 = vld [vmem:[#allocation8 + $0x460] sm:$0xff]  ;;  %v2510_v5 = vld [vmem:[#allocation8 + $0x268] sm:$0xff] }
  0x99   :  { %1295 = vst [vmem:[#allocation10 + $0x20] sm:$0xff] %v1167_v63  ;;  %v1168_v13 = vadd.f32 %v1104_v47, %v908_v0  ;;  %v909_v14 = vadd.f32 %v845_v56, %v649_v1  ;;  %v847_v16 = vmul.f32 %v2491_v15, %v3656_v50  ;;  %v1107_v19 = vmul.f32 %v2492_v18, %v3659_v17  ;;  %v2508_v63 = vld [vmem:[#allocation8 + $0x660] sm:$0xff] }
  0x9a   :  { %v910_v20 = vadd.f32 %v846_v3, %v650_v4  ;;  %v651_v21 = vadd.f32 %v587_v11, %v391_v9  ;;  %v392_v23 = vmul.f32 %v2493_v22, %v3648_v43  ;;  %v588_v26 = vmul.f32 %v2494_v25, %v3651_v44  ;;  %v2509_v3 = vld [vmem:[#allocation8 + $0x68] sm:$0xff]  ;;  %v2515_v22 = vld [vmem:[#allocation8 + $0x470] sm:$0xff] }
  0x9b   :  { %1296 = vst [vmem:[#allocation10 + $0x28] sm:$0xff] %v1168_v13  ;;  %v1169_v27 = vadd.f32 %v1105_v58, %v909_v14  ;;  %v848_v29 = vmul.f32 %v2495_v28, %v3656_v50  ;;  %v1108_v31 = vmul.f32 %v2496_v30, %v3659_v17  ;;  %v393_v33 = vmul.f32 %v2497_v32, %v3648_v43  ;;  %v2511_v9 = vld [vmem:[#allocation8 + $0x468] sm:$0xff]  ;;  %v2513_v14 = vld [vmem:[#allocation8 + $0x70] sm:$0xff] }
  0x9c   :  { %v1170_v34 = vadd.f32 %v1106_v6, %v910_v20  ;;  %v911_v35 = vadd.f32 %v847_v16, %v651_v21  ;;  %v652_v36 = vadd.f32 %v588_v26, %v392_v23  ;;  %v589_v38 = vmul.f32 %v2498_v37, %v3651_v44  ;;  %v2512_v11 = vld [vmem:[#allocation8 + $0x668] sm:$0xff]  ;;  %v2514_v20 = vld [vmem:[#allocation8 + $0x270] sm:$0xff]  ;;  %v2520_v37 = vld [vmem:[#allocation8 + $0x678] sm:$0xff] }
  0x9d   :  { %1297 = vst [vmem:[#allocation10 + $0x30] sm:$0xff] %v1169_v27  ;;  %v849_v40 = vmul.f32 %v2499_v39, %v3656_v50  ;;  %v1109_v42 = vmul.f32 %v2500_v41, %v3659_v17  ;;  %v394_v7 = vmul.f32 %v2501_v45, %v3648_v43  ;;  %v590_v12 = vmul.f32 %v2502_v46, %v3651_v44  ;;  %v2516_v25 = vld [vmem:[#allocation8 + $0x670] sm:$0xff]  ;;  %v2517_v27 = vld [vmem:[#allocation8 + $0x78] sm:$0xff]  ;;  %v2521_v39 = vld [vmem:[#allocation8 + $0x80] sm:$0xff] }
  0x9e   :  { %1298 = vst [vmem:[#allocation10 + $0x38] sm:$0xff] %v1170_v34  ;;  %v1171_v47 = vadd.f32 %v1107_v19, %v911_v35  ;;  %v912_v48 = vadd.f32 %v848_v29, %v652_v36  ;;  %v653_v49 = vadd.f32 %v589_v38, %v393_v33  ;;  %v850_v24 = vmul.f32 %v2503_v51, %v3656_v50  ;;  %v2518_v29 = vld [vmem:[#allocation8 + $0x278] sm:$0xff]  ;;  %v2522_v41 = vld [vmem:[#allocation8 + $0x280] sm:$0xff] }
  0x9f   :  { %v654_v52 = vadd.f32 %v590_v12, %v394_v7  ;;  %v1110_v54 = vmul.f32 %v2504_v53, %v3659_v17  ;;  %v395_v56 = vmul.f32 %v2505_v55, %v3648_v43  ;;  %v591_v58 = vmul.f32 %v2506_v57, %v3651_v44  ;;  %v2519_v34 = vld [vmem:[#allocation8 + $0x478] sm:$0xff]  ;;  %v2523_v46 = vld [vmem:[#allocation8 + $0x480] sm:$0xff]  ;;  %v2526_v53 = vld [vmem:[#allocation8 + $0x288] sm:$0xff] }
  0xa0   :  { %1299 = vst [vmem:[#allocation10 + $0x40] sm:$0xff] %v1171_v47  ;;  %v1172_v59 = vadd.f32 %v1108_v31, %v912_v48  ;;  %v913_v60 = vadd.f32 %v849_v40, %v653_v49  ;;  %v851_v62 = vmul.f32 %v2507_v61, %v3656_v50  ;;  %v1111_v0 = vmul.f32 %v2508_v63, %v3659_v17  ;;  %v2524_v47 = vld [vmem:[#allocation8 + $0x680] sm:$0xff] }
  0xa1   :  { %v914_v1 = vadd.f32 %v850_v24, %v654_v52  ;;  %v655_v2 = vadd.f32 %v591_v58, %v395_v56  ;;  %v396_v4 = vmul.f32 %v2509_v3, %v3648_v43  ;;  %v592_v6 = vmul.f32 %v2510_v5, %v3651_v44  ;;  %v2525_v24 = vld [vmem:[#allocation8 + $0x88] sm:$0xff]  ;;  %v2531_v3 = vld [vmem:[#allocation8 + $0x490] sm:$0xff] }
  0xa2   :  { %1300 = vst [vmem:[#allocation10 + $0x48] sm:$0xff] %v1172_v59  ;;  %v1173_v8 = vadd.f32 %v1109_v42, %v913_v60  ;;  %v852_v10 = vmul.f32 %v2511_v9, %v3656_v50  ;;  %v1112_v13 = vmul.f32 %v2512_v11, %v3659_v17  ;;  %v397_v15 = vmul.f32 %v2513_v14, %v3648_v43  ;;  %v2527_v56 = vld [vmem:[#allocation8 + $0x488] sm:$0xff]  ;;  %v2529_v60 = vld [vmem:[#allocation8 + $0x90] sm:$0xff] }
  0xa3   :  { %v1174_v16 = vadd.f32 %v1110_v54, %v914_v1  ;;  %v915_v18 = vadd.f32 %v851_v62, %v655_v2  ;;  %v656_v19 = vadd.f32 %v592_v6, %v396_v4  ;;  %v593_v21 = vmul.f32 %v2514_v20, %v3651_v44  ;;  %v2528_v58 = vld [vmem:[#allocation8 + $0x688] sm:$0xff]  ;;  %v2530_v1 = vld [vmem:[#allocation8 + $0x290] sm:$0xff]  ;;  %v2536_v20 = vld [vmem:[#allocation8 + $0x698] sm:$0xff] }
  0xa4   :  { %1301 = vst [vmem:[#allocation10 + $0x50] sm:$0xff] %v1173_v8  ;;  %v853_v23 = vmul.f32 %v2515_v22, %v3656_v50  ;;  %v1113_v26 = vmul.f32 %v2516_v25, %v3659_v17  ;;  %v398_v28 = vmul.f32 %v2517_v27, %v3648_v43  ;;  %v594_v30 = vmul.f32 %v2518_v29, %v3651_v44  ;;  %v2532_v5 = vld [vmem:[#allocation8 + $0x690] sm:$0xff]  ;;  %v2533_v8 = vld [vmem:[#allocation8 + $0x98] sm:$0xff]  ;;  %v2537_v22 = vld [vmem:[#allocation8 + $0xa0] sm:$0xff] }
  0xa5   :  { %1302 = vst [vmem:[#allocation10 + $0x58] sm:$0xff] %v1174_v16  ;;  %v1175_v31 = vadd.f32 %v1111_v0, %v915_v18  ;;  %v916_v32 = vadd.f32 %v852_v10, %v656_v19  ;;  %v657_v33 = vadd.f32 %v593_v21, %v397_v15  ;;  %v854_v35 = vmul.f32 %v2519_v34, %v3656_v50  ;;  %v2534_v10 = vld [vmem:[#allocation8 + $0x298] sm:$0xff]  ;;  %v2538_v25 = vld [vmem:[#allocation8 + $0x2a0] sm:$0xff] }
  0xa6   :  { %v658_v36 = vadd.f32 %v594_v30, %v398_v28  ;;  %v1114_v38 = vmul.f32 %v2520_v37, %v3659_v17  ;;  %v399_v40 = vmul.f32 %v2521_v39, %v3648_v43  ;;  %v595_v42 = vmul.f32 %v2522_v41, %v3651_v44  ;;  %v2535_v16 = vld [vmem:[#allocation8 + $0x498] sm:$0xff]  ;;  %v2539_v29 = vld [vmem:[#allocation8 + $0x4a0] sm:$0xff]  ;;  %v2542_v37 = vld [vmem:[#allocation8 + $0x2a8] sm:$0xff] }
  0xa7   :  { %1303 = vst [vmem:[#allocation10 + $0x60] sm:$0xff] %v1175_v31  ;;  %v1176_v45 = vadd.f32 %v1112_v13, %v916_v32  ;;  %v917_v7 = vadd.f32 %v853_v23, %v657_v33  ;;  %v855_v12 = vmul.f32 %v2523_v46, %v3656_v50  ;;  %v1115_v48 = vmul.f32 %v2524_v47, %v3659_v17  ;;  %v2540_v31 = vld [vmem:[#allocation8 + $0x6a0] sm:$0xff] }
  0xa8   :  { %v918_v49 = vadd.f32 %v854_v35, %v658_v36  ;;  %v659_v51 = vadd.f32 %v595_v42, %v399_v40  ;;  %v400_v52 = vmul.f32 %v2525_v24, %v3648_v43  ;;  %v596_v54 = vmul.f32 %v2526_v53, %v3651_v44  ;;  %v2541_v35 = vld [vmem:[#allocation8 + $0xa8] sm:$0xff]  ;;  %v2547_v24 = vld [vmem:[#allocation8 + $0x4b0] sm:$0xff] }
  0xa9   :  { %1304 = vst [vmem:[#allocation10 + $0x68] sm:$0xff] %v1176_v45  ;;  %v1177_v55 = vadd.f32 %v1113_v26, %v917_v7  ;;  %v856_v57 = vmul.f32 %v2527_v56, %v3656_v50  ;;  %v1116_v59 = vmul.f32 %v2528_v58, %v3659_v17  ;;  %v401_v61 = vmul.f32 %v2529_v60, %v3648_v43  ;;  %v2543_v40 = vld [vmem:[#allocation8 + $0x4a8] sm:$0xff]  ;;  %v2545_v7 = vld [vmem:[#allocation8 + $0xb0] sm:$0xff] }
  0xaa   :  { %v1178_v62 = vadd.f32 %v1114_v38, %v918_v49  ;;  %v919_v63 = vadd.f32 %v855_v12, %v659_v51  ;;  %v660_v0 = vadd.f32 %v596_v54, %v400_v52  ;;  %v597_v2 = vmul.f32 %v2530_v1, %v3651_v44  ;;  %v2544_v42 = vld [vmem:[#allocation8 + $0x6a8] sm:$0xff]  ;;  %v2546_v49 = vld [vmem:[#allocation8 + $0x2b0] sm:$0xff]  ;;  %v2552_v1 = vld [vmem:[#allocation8 + $0x6b8] sm:$0xff] }
  0xab   :  { %1305 = vst [vmem:[#allocation10 + $0x70] sm:$0xff] %v1177_v55  ;;  %v857_v4 = vmul.f32 %v2531_v3, %v3656_v50  ;;  %v1117_v6 = vmul.f32 %v2532_v5, %v3659_v17  ;;  %v402_v9 = vmul.f32 %v2533_v8, %v3648_v43  ;;  %v598_v11 = vmul.f32 %v2534_v10, %v3651_v44  ;;  %v2548_v53 = vld [vmem:[#allocation8 + $0x6b0] sm:$0xff]  ;;  %v2549_v55 = vld [vmem:[#allocation8 + $0xb8] sm:$0xff]  ;;  %v2553_v3 = vld [vmem:[#allocation8 + $0xc0] sm:$0xff] }
  0xac   :  { %1306 = vst [vmem:[#allocation10 + $0x78] sm:$0xff] %v1178_v62  ;;  %v1179_v13 = vadd.f32 %v1115_v48, %v919_v63  ;;  %v920_v14 = vadd.f32 %v856_v57, %v660_v0  ;;  %v661_v15 = vadd.f32 %v597_v2, %v401_v61  ;;  %v858_v18 = vmul.f32 %v2535_v16, %v3656_v50  ;;  %v2550_v57 = vld [vmem:[#allocation8 + $0x2b8] sm:$0xff]  ;;  %v2554_v5 = vld [vmem:[#allocation8 + $0x2c0] sm:$0xff] }
  0xad   :  { %v662_v19 = vadd.f32 %v598_v11, %v402_v9  ;;  %v1118_v21 = vmul.f32 %v2536_v20, %v3659_v17  ;;  %v403_v23 = vmul.f32 %v2537_v22, %v3648_v43  ;;  %v599_v26 = vmul.f32 %v2538_v25, %v3651_v44  ;;  %v2551_v62 = vld [vmem:[#allocation8 + $0x4b8] sm:$0xff]  ;;  %v2555_v10 = vld [vmem:[#allocation8 + $0x4c0] sm:$0xff]  ;;  %v2558_v20 = vld [vmem:[#allocation8 + $0x2c8] sm:$0xff] }
  0xae   :  { %1307 = vst [vmem:[#allocation10 + $0x80] sm:$0xff] %v1179_v13  ;;  %v1180_v27 = vadd.f32 %v1116_v59, %v920_v14  ;;  %v921_v28 = vadd.f32 %v857_v4, %v661_v15  ;;  %v859_v30 = vmul.f32 %v2539_v29, %v3656_v50  ;;  %v1119_v32 = vmul.f32 %v2540_v31, %v3659_v17  ;;  %v2556_v13 = vld [vmem:[#allocation8 + $0x6c0] sm:$0xff] }
  0xaf   :  { %v922_v33 = vadd.f32 %v858_v18, %v662_v19  ;;  %v663_v34 = vadd.f32 %v599_v26, %v403_v23  ;;  %v404_v36 = vmul.f32 %v2541_v35, %v3648_v43  ;;  %v600_v38 = vmul.f32 %v2542_v37, %v3651_v44  ;;  %v2557_v18 = vld [vmem:[#allocation8 + $0xc8] sm:$0xff]  ;;  %v2563_v35 = vld [vmem:[#allocation8 + $0x4d0] sm:$0xff] }
  0xb0   :  { %1308 = vst [vmem:[#allocation10 + $0x88] sm:$0xff] %v1180_v27  ;;  %v1181_v39 = vadd.f32 %v1117_v6, %v921_v28  ;;  %v860_v41 = vmul.f32 %v2543_v40, %v3656_v50  ;;  %v1120_v45 = vmul.f32 %v2544_v42, %v3659_v17  ;;  %v405_v46 = vmul.f32 %v2545_v7, %v3648_v43  ;;  %v2559_v23 = vld [vmem:[#allocation8 + $0x4c8] sm:$0xff]  ;;  %v2561_v28 = vld [vmem:[#allocation8 + $0xd0] sm:$0xff] }
  0xb1   :  { %v1182_v12 = vadd.f32 %v1118_v21, %v922_v33  ;;  %v923_v47 = vadd.f32 %v859_v30, %v663_v34  ;;  %v664_v48 = vadd.f32 %v600_v38, %v404_v36  ;;  %v601_v51 = vmul.f32 %v2546_v49, %v3651_v44  ;;  %v2560_v26 = vld [vmem:[#allocation8 + $0x6c8] sm:$0xff]  ;;  %v2562_v33 = vld [vmem:[#allocation8 + $0x2d0] sm:$0xff]  ;;  %v2568_v49 = vld [vmem:[#allocation8 + $0x6d8] sm:$0xff] }
  0xb2   :  { %1309 = vst [vmem:[#allocation10 + $0x90] sm:$0xff] %v1181_v39  ;;  %v861_v52 = vmul.f32 %v2547_v24, %v3656_v50  ;;  %v1121_v54 = vmul.f32 %v2548_v53, %v3659_v17  ;;  %v406_v56 = vmul.f32 %v2549_v55, %v3648_v43  ;;  %v602_v58 = vmul.f32 %v2550_v57, %v3651_v44  ;;  %v2564_v37 = vld [vmem:[#allocation8 + $0x6d0] sm:$0xff]  ;;  %v2565_v39 = vld [vmem:[#allocation8 + $0xd8] sm:$0xff]  ;;  %v2569_v24 = vld [vmem:[#allocation8 + $0xe0] sm:$0xff] }
  0xb3   :  { %1310 = vst [vmem:[#allocation10 + $0x98] sm:$0xff] %v1182_v12  ;;  %v1183_v59 = vadd.f32 %v1119_v32, %v923_v47  ;;  %v924_v60 = vadd.f32 %v860_v41, %v664_v48  ;;  %v665_v61 = vadd.f32 %v601_v51, %v405_v46  ;;  %v862_v63 = vmul.f32 %v2551_v62, %v3656_v50  ;;  %v2566_v41 = vld [vmem:[#allocation8 + $0x2d8] sm:$0xff]  ;;  %v2570_v53 = vld [vmem:[#allocation8 + $0x2e0] sm:$0xff] }
  0xb4   :  { %v666_v0 = vadd.f32 %v602_v58, %v406_v56  ;;  %v1122_v2 = vmul.f32 %v2552_v1, %v3659_v17  ;;  %v407_v4 = vmul.f32 %v2553_v3, %v3648_v43  ;;  %v603_v6 = vmul.f32 %v2554_v5, %v3651_v44  ;;  %v2567_v12 = vld [vmem:[#allocation8 + $0x4d8] sm:$0xff]  ;;  %v2571_v57 = vld [vmem:[#allocation8 + $0x4e0] sm:$0xff]  ;;  %v2574_v1 = vld [vmem:[#allocation8 + $0x2e8] sm:$0xff] }
  0xb5   :  { %1311 = vst [vmem:[#allocation10 + $0xa0] sm:$0xff] %v1183_v59  ;;  %v1184_v8 = vadd.f32 %v1120_v45, %v924_v60  ;;  %v925_v9 = vadd.f32 %v861_v52, %v665_v61  ;;  %v863_v11 = vmul.f32 %v2555_v10, %v3656_v50  ;;  %v1123_v14 = vmul.f32 %v2556_v13, %v3659_v17  ;;  %v2572_v59 = vld [vmem:[#allocation8 + $0x6e0] sm:$0xff] }
  0xb6   :  { %v926_v15 = vadd.f32 %v862_v63, %v666_v0  ;;  %v667_v16 = vadd.f32 %v603_v6, %v407_v4  ;;  %v408_v19 = vmul.f32 %v2557_v18, %v3648_v43  ;;  %v604_v21 = vmul.f32 %v2558_v20, %v3651_v44  ;;  %v2573_v63 = vld [vmem:[#allocation8 + $0xe8] sm:$0xff]  ;;  %v2579_v18 = vld [vmem:[#allocation8 + $0x4f0] sm:$0xff] }
  0xb7   :  { %1312 = vst [vmem:[#allocation10 + $0xa8] sm:$0xff] %v1184_v8  ;;  %v1185_v22 = vadd.f32 %v1121_v54, %v925_v9  ;;  %v864_v25 = vmul.f32 %v2559_v23, %v3656_v50  ;;  %v1124_v27 = vmul.f32 %v2560_v26, %v3659_v17  ;;  %v409_v29 = vmul.f32 %v2561_v28, %v3648_v43  ;;  %v2575_v4 = vld [vmem:[#allocation8 + $0x4e8] sm:$0xff]  ;;  %v2577_v9 = vld [vmem:[#allocation8 + $0xf0] sm:$0xff] }
  0xb8   :  { %v1186_v30 = vadd.f32 %v1122_v2, %v926_v15  ;;  %v927_v31 = vadd.f32 %v863_v11, %v667_v16  ;;  %v668_v32 = vadd.f32 %v604_v21, %v408_v19  ;;  %v605_v34 = vmul.f32 %v2562_v33, %v3651_v44  ;;  %v2576_v6 = vld [vmem:[#allocation8 + $0x6e8] sm:$0xff]  ;;  %v2578_v15 = vld [vmem:[#allocation8 + $0x2f0] sm:$0xff]  ;;  %v2584_v33 = vld [vmem:[#allocation8 + $0x6f8] sm:$0xff] }
  0xb9   :  { %1313 = vst [vmem:[#allocation10 + $0xb0] sm:$0xff] %v1185_v22  ;;  %v865_v36 = vmul.f32 %v2563_v35, %v3656_v50  ;;  %v1125_v38 = vmul.f32 %v2564_v37, %v3659_v17  ;;  %v410_v40 = vmul.f32 %v2565_v39, %v3648_v43  ;;  %v606_v42 = vmul.f32 %v2566_v41, %v3651_v44  ;;  %v2580_v20 = vld [vmem:[#allocation8 + $0x6f0] sm:$0xff]  ;;  %v2581_v22 = vld [vmem:[#allocation8 + $0xf8] sm:$0xff]  ;;  %v2585_v35 = vld [vmem:[#allocation8 + $0x100] sm:$0xff] }
  0xba   :  { %1314 = vst [vmem:[#allocation10 + $0xb8] sm:$0xff] %v1186_v30  ;;  %v1187_v45 = vadd.f32 %v1123_v14, %v927_v31  ;;  %v928_v7 = vadd.f32 %v864_v25, %v668_v32  ;;  %v669_v46 = vadd.f32 %v605_v34, %v409_v29  ;;  %v866_v47 = vmul.f32 %v2567_v12, %v3656_v50  ;;  %v2582_v25 = vld [vmem:[#allocation8 + $0x2f8] sm:$0xff]  ;;  %v2586_v37 = vld [vmem:[#allocation8 + $0x300] sm:$0xff] }
  0xbb   :  { %v670_v48 = vadd.f32 %v606_v42, %v410_v40  ;;  %v1126_v51 = vmul.f32 %v2568_v49, %v3659_v17  ;;  %v411_v52 = vmul.f32 %v2569_v24, %v3648_v43  ;;  %v607_v54 = vmul.f32 %v2570_v53, %v3651_v44  ;;  %v2583_v30 = vld [vmem:[#allocation8 + $0x4f8] sm:$0xff]  ;;  %v2587_v41 = vld [vmem:[#allocation8 + $0x500] sm:$0xff]  ;;  %v2590_v49 = vld [vmem:[#allocation8 + $0x308] sm:$0xff] }
  0xbc   :  { %1315 = vst [vmem:[#allocation10 + $0xc0] sm:$0xff] %v1187_v45  ;;  %v1188_v55 = vadd.f32 %v1124_v27, %v928_v7  ;;  %v929_v56 = vadd.f32 %v865_v36, %v669_v46  ;;  %v867_v58 = vmul.f32 %v2571_v57, %v3656_v50  ;;  %v1127_v60 = vmul.f32 %v2572_v59, %v3659_v17  ;;  %v2588_v45 = vld [vmem:[#allocation8 + $0x700] sm:$0xff] }
  0xbd   :  { %v930_v61 = vadd.f32 %v866_v47, %v670_v48  ;;  %v671_v62 = vadd.f32 %v607_v54, %v411_v52  ;;  %v412_v0 = vmul.f32 %v2573_v63, %v3648_v43  ;;  %v608_v2 = vmul.f32 %v2574_v1, %v3651_v44  ;;  %v2589_v47 = vld [vmem:[#allocation8 + $0x108] sm:$0xff]  ;;  %v2595_v63 = vld [vmem:[#allocation8 + $0x510] sm:$0xff] }
  0xbe   :  { %1316 = vst [vmem:[#allocation10 + $0xc8] sm:$0xff] %v1188_v55  ;;  %v1189_v3 = vadd.f32 %v1125_v38, %v929_v56  ;;  %v868_v5 = vmul.f32 %v2575_v4, %v3656_v50  ;;  %v1128_v8 = vmul.f32 %v2576_v6, %v3659_v17  ;;  %v413_v10 = vmul.f32 %v2577_v9, %v3648_v43  ;;  %v2591_v52 = vld [vmem:[#allocation8 + $0x508] sm:$0xff]  ;;  %v2593_v56 = vld [vmem:[#allocation8 + $0x110] sm:$0xff] }
  0xbf   :  { %v1190_v11 = vadd.f32 %v1126_v51, %v930_v61  ;;  %v931_v13 = vadd.f32 %v867_v58, %v671_v62  ;;  %v672_v14 = vadd.f32 %v608_v2, %v412_v0  ;;  %v609_v16 = vmul.f32 %v2578_v15, %v3651_v44  ;;  %v2592_v54 = vld [vmem:[#allocation8 + $0x708] sm:$0xff]  ;;  %v2594_v61 = vld [vmem:[#allocation8 + $0x310] sm:$0xff]  ;;  %v2600_v15 = vld [vmem:[#allocation8 + $0x718] sm:$0xff] }
  0xc0   :  { %1317 = vst [vmem:[#allocation10 + $0xd0] sm:$0xff] %v1189_v3  ;;  %v869_v19 = vmul.f32 %v2579_v18, %v3656_v50  ;;  %v1129_v21 = vmul.f32 %v2580_v20, %v3659_v17  ;;  %v414_v23 = vmul.f32 %v2581_v22, %v3648_v43  ;;  %v610_v26 = vmul.f32 %v2582_v25, %v3651_v44  ;;  %v2596_v1 = vld [vmem:[#allocation8 + $0x710] sm:$0xff]  ;;  %v2597_v3 = vld [vmem:[#allocation8 + $0x118] sm:$0xff]  ;;  %v2601_v18 = vld [vmem:[#allocation8 + $0x120] sm:$0xff] }
  0xc1   :  { %1318 = vst [vmem:[#allocation10 + $0xd8] sm:$0xff] %v1190_v11  ;;  %v1191_v27 = vadd.f32 %v1127_v60, %v931_v13  ;;  %v932_v28 = vadd.f32 %v868_v5, %v672_v14  ;;  %v673_v29 = vadd.f32 %v609_v16, %v413_v10  ;;  %v870_v31 = vmul.f32 %v2583_v30, %v3656_v50  ;;  %v2598_v5 = vld [vmem:[#allocation8 + $0x318] sm:$0xff]  ;;  %v2602_v20 = vld [vmem:[#allocation8 + $0x320] sm:$0xff] }
  0xc2   :  { %v674_v32 = vadd.f32 %v610_v26, %v414_v23  ;;  %v1130_v34 = vmul.f32 %v2584_v33, %v3659_v17  ;;  %v415_v36 = vmul.f32 %v2585_v35, %v3648_v43  ;;  %v611_v38 = vmul.f32 %v2586_v37, %v3651_v44  ;;  %v2599_v11 = vld [vmem:[#allocation8 + $0x518] sm:$0xff]  ;;  %v2603_v25 = vld [vmem:[#allocation8 + $0x520] sm:$0xff]  ;;  %v2606_v33 = vld [vmem:[#allocation8 + $0x328] sm:$0xff] }
  0xc3   :  { %1319 = vst [vmem:[#allocation10 + $0xe0] sm:$0xff] %v1191_v27  ;;  %v1192_v39 = vadd.f32 %v1128_v8, %v932_v28  ;;  %v933_v40 = vadd.f32 %v869_v19, %v673_v29  ;;  %v871_v42 = vmul.f32 %v2587_v41, %v3656_v50  ;;  %v1131_v7 = vmul.f32 %v2588_v45, %v3659_v17  ;;  %v2604_v27 = vld [vmem:[#allocation8 + $0x720] sm:$0xff] }
  0xc4   :  { %v934_v46 = vadd.f32 %v870_v31, %v674_v32  ;;  %v675_v12 = vadd.f32 %v611_v38, %v415_v36  ;;  %v416_v48 = vmul.f32 %v2589_v47, %v3648_v43  ;;  %v612_v51 = vmul.f32 %v2590_v49, %v3651_v44  ;;  %v2605_v31 = vld [vmem:[#allocation8 + $0x128] sm:$0xff]  ;;  %v2611_v47 = vld [vmem:[#allocation8 + $0x530] sm:$0xff] }
  0xc5   :  { %1320 = vst [vmem:[#allocation10 + $0xe8] sm:$0xff] %v1192_v39  ;;  %v1193_v24 = vadd.f32 %v1129_v21, %v933_v40  ;;  %v872_v53 = vmul.f32 %v2591_v52, %v3656_v50  ;;  %v1132_v55 = vmul.f32 %v2592_v54, %v3659_v17  ;;  %v417_v57 = vmul.f32 %v2593_v56, %v3648_v43  ;;  %v2607_v36 = vld [vmem:[#allocation8 + $0x528] sm:$0xff]  ;;  %v2609_v40 = vld [vmem:[#allocation8 + $0x130] sm:$0xff] }
  0xc6   :  { %v1194_v58 = vadd.f32 %v1130_v34, %v934_v46  ;;  %v935_v59 = vadd.f32 %v871_v42, %v675_v12  ;;  %v676_v60 = vadd.f32 %v612_v51, %v416_v48  ;;  %v613_v62 = vmul.f32 %v2594_v61, %v3651_v44  ;;  %v2608_v38 = vld [vmem:[#allocation8 + $0x728] sm:$0xff]  ;;  %v2610_v46 = vld [vmem:[#allocation8 + $0x330] sm:$0xff]  ;;  %v2616_v61 = vld [vmem:[#allocation8 + $0x738] sm:$0xff] }
  0xc7   :  { %1321 = vst [vmem:[#allocation10 + $0xf0] sm:$0xff] %v1193_v24  ;;  %v873_v0 = vmul.f32 %v2595_v63, %v3656_v50  ;;  %v1133_v2 = vmul.f32 %v2596_v1, %v3659_v17  ;;  %v418_v4 = vmul.f32 %v2597_v3, %v3648_v43  ;;  %v614_v6 = vmul.f32 %v2598_v5, %v3651_v44  ;;  %v2612_v49 = vld [vmem:[#allocation8 + $0x730] sm:$0xff]  ;;  %v2613_v24 = vld [vmem:[#allocation8 + $0x138] sm:$0xff]  ;;  %v2617_v63 = vld [vmem:[#allocation8 + $0x140] sm:$0xff] }
  0xc8   :  { %1322 = vst [vmem:[#allocation10 + $0xf8] sm:$0xff] %v1194_v58  ;;  %v1195_v8 = vadd.f32 %v1131_v7, %v935_v59  ;;  %v936_v9 = vadd.f32 %v872_v53, %v676_v60  ;;  %v677_v10 = vadd.f32 %v613_v62, %v417_v57  ;;  %v874_v13 = vmul.f32 %v2599_v11, %v3656_v50  ;;  %v2614_v53 = vld [vmem:[#allocation8 + $0x338] sm:$0xff]  ;;  %v2618_v1 = vld [vmem:[#allocation8 + $0x340] sm:$0xff] }
  0xc9   :  { %v678_v14 = vadd.f32 %v614_v6, %v418_v4  ;;  %v1134_v16 = vmul.f32 %v2600_v15, %v3659_v17  ;;  %v419_v19 = vmul.f32 %v2601_v18, %v3648_v43  ;;  %v615_v21 = vmul.f32 %v2602_v20, %v3651_v44  ;;  %v2615_v58 = vld [vmem:[#allocation8 + $0x538] sm:$0xff]  ;;  %v2619_v5 = vld [vmem:[#allocation8 + $0x540] sm:$0xff]  ;;  %v2622_v15 = vld [vmem:[#allocation8 + $0x348] sm:$0xff] }
  0xca   :  { %1323 = vst [vmem:[#allocation10 + $0x100] sm:$0xff] %v1195_v8  ;;  %v1196_v22 = vadd.f32 %v1132_v55, %v936_v9  ;;  %v937_v23 = vadd.f32 %v873_v0, %v677_v10  ;;  %v875_v26 = vmul.f32 %v2603_v25, %v3656_v50  ;;  %v1135_v28 = vmul.f32 %v2604_v27, %v3659_v17  ;;  %v2620_v8 = vld [vmem:[#allocation8 + $0x740] sm:$0xff] }
  0xcb   :  { %v938_v29 = vadd.f32 %v874_v13, %v678_v14  ;;  %v679_v30 = vadd.f32 %v615_v21, %v419_v19  ;;  %v420_v32 = vmul.f32 %v2605_v31, %v3648_v43  ;;  %v616_v34 = vmul.f32 %v2606_v33, %v3651_v44  ;;  %v2621_v13 = vld [vmem:[#allocation8 + $0x148] sm:$0xff]  ;;  %v2627_v31 = vld [vmem:[#allocation8 + $0x550] sm:$0xff] }
  0xcc   :  { %1324 = vst [vmem:[#allocation10 + $0x108] sm:$0xff] %v1196_v22  ;;  %v1197_v35 = vadd.f32 %v1133_v2, %v937_v23  ;;  %v876_v37 = vmul.f32 %v2607_v36, %v3656_v50  ;;  %v1136_v39 = vmul.f32 %v2608_v38, %v3659_v17  ;;  %v421_v41 = vmul.f32 %v2609_v40, %v3648_v43  ;;  %v2623_v19 = vld [vmem:[#allocation8 + $0x548] sm:$0xff]  ;;  %v2625_v23 = vld [vmem:[#allocation8 + $0x150] sm:$0xff] }
  0xcd   :  { %v1198_v42 = vadd.f32 %v1134_v16, %v938_v29  ;;  %v939_v45 = vadd.f32 %v875_v26, %v679_v30  ;;  %v680_v7 = vadd.f32 %v616_v34, %v420_v32  ;;  %v617_v12 = vmul.f32 %v2610_v46, %v3651_v44  ;;  %v2624_v21 = vld [vmem:[#allocation8 + $0x748] sm:$0xff]  ;;  %v2626_v29 = vld [vmem:[#allocation8 + $0x350] sm:$0xff]  ;;  %v2632_v46 = vld [vmem:[#allocation8 + $0x758] sm:$0xff] }
  0xce   :  { %1325 = vst [vmem:[#allocation10 + $0x110] sm:$0xff] %v1197_v35  ;;  %v877_v48 = vmul.f32 %v2611_v47, %v3656_v50  ;;  %v1137_v51 = vmul.f32 %v2612_v49, %v3659_v17  ;;  %v422_v52 = vmul.f32 %v2613_v24, %v3648_v43  ;;  %v618_v54 = vmul.f32 %v2614_v53, %v3651_v44  ;;  %v2628_v33 = vld [vmem:[#allocation8 + $0x750] sm:$0xff]  ;;  %v2629_v35 = vld [vmem:[#allocation8 + $0x158] sm:$0xff]  ;;  %v2633_v47 = vld [vmem:[#allocation8 + $0x160] sm:$0xff] }
  0xcf   :  { %1326 = vst [vmem:[#allocation10 + $0x118] sm:$0xff] %v1198_v42  ;;  %v1199_v55 = vadd.f32 %v1135_v28, %v939_v45  ;;  %v940_v56 = vadd.f32 %v876_v37, %v680_v7  ;;  %v681_v57 = vadd.f32 %v617_v12, %v421_v41  ;;  %v878_v59 = vmul.f32 %v2615_v58, %v3656_v50  ;;  %v2630_v37 = vld [vmem:[#allocation8 + $0x358] sm:$0xff]  ;;  %v2634_v49 = vld [vmem:[#allocation8 + $0x360] sm:$0xff] }
  0xd0   :  { %v682_v60 = vadd.f32 %v618_v54, %v422_v52  ;;  %v1138_v62 = vmul.f32 %v2616_v61, %v3659_v17  ;;  %v423_v0 = vmul.f32 %v2617_v63, %v3648_v43  ;;  %v619_v2 = vmul.f32 %v2618_v1, %v3651_v44  ;;  %v2631_v42 = vld [vmem:[#allocation8 + $0x558] sm:$0xff]  ;;  %v2635_v53 = vld [vmem:[#allocation8 + $0x560] sm:$0xff]  ;;  %v2638_v61 = vld [vmem:[#allocation8 + $0x368] sm:$0xff] }
  0xd1   :  { %1327 = vst [vmem:[#allocation10 + $0x120] sm:$0xff] %v1199_v55  ;;  %v1200_v3 = vadd.f32 %v1136_v39, %v940_v56  ;;  %v941_v4 = vadd.f32 %v877_v48, %v681_v57  ;;  %v879_v6 = vmul.f32 %v2619_v5, %v3656_v50  ;;  %v1139_v9 = vmul.f32 %v2620_v8, %v3659_v17  ;;  %v2636_v55 = vld [vmem:[#allocation8 + $0x760] sm:$0xff] }
  0xd2   :  { %v942_v10 = vadd.f32 %v878_v59, %v682_v60  ;;  %v683_v11 = vadd.f32 %v619_v2, %v423_v0  ;;  %v424_v14 = vmul.f32 %v2621_v13, %v3648_v43  ;;  %v620_v16 = vmul.f32 %v2622_v15, %v3651_v44  ;;  %v2637_v59 = vld [vmem:[#allocation8 + $0x168] sm:$0xff]  ;;  %v2643_v13 = vld [vmem:[#allocation8 + $0x570] sm:$0xff] }
  0xd3   :  { %1328 = vst [vmem:[#allocation10 + $0x128] sm:$0xff] %v1200_v3  ;;  %v1201_v18 = vadd.f32 %v1137_v51, %v941_v4  ;;  %v880_v20 = vmul.f32 %v2623_v19, %v3656_v50  ;;  %v1140_v22 = vmul.f32 %v2624_v21, %v3659_v17  ;;  %v425_v25 = vmul.f32 %v2625_v23, %v3648_v43  ;;  %v2639_v0 = vld [vmem:[#allocation8 + $0x568] sm:$0xff]  ;;  %v2641_v4 = vld [vmem:[#allocation8 + $0x170] sm:$0xff] }
  0xd4   :  { %v1202_v26 = vadd.f32 %v1138_v62, %v942_v10  ;;  %v943_v27 = vadd.f32 %v879_v6, %v683_v11  ;;  %v684_v28 = vadd.f32 %v620_v16, %v424_v14  ;;  %v621_v30 = vmul.f32 %v2626_v29, %v3651_v44  ;;  %v2640_v2 = vld [vmem:[#allocation8 + $0x768] sm:$0xff]  ;;  %v2642_v10 = vld [vmem:[#allocation8 + $0x370] sm:$0xff]  ;;  %v2648_v29 = vld [vmem:[#allocation8 + $0x778] sm:$0xff] }
  0xd5   :  { %1329 = vst [vmem:[#allocation10 + $0x130] sm:$0xff] %v1201_v18  ;;  %v881_v32 = vmul.f32 %v2627_v31, %v3656_v50  ;;  %v1141_v34 = vmul.f32 %v2628_v33, %v3659_v17  ;;  %v426_v36 = vmul.f32 %v2629_v35, %v3648_v43  ;;  %v622_v38 = vmul.f32 %v2630_v37, %v3651_v44  ;;  %v2644_v15 = vld [vmem:[#allocation8 + $0x770] sm:$0xff]  ;;  %v2645_v18 = vld [vmem:[#allocation8 + $0x178] sm:$0xff]  ;;  %v2649_v31 = vld [vmem:[#allocation8 + $0x180] sm:$0xff] }
  0xd6   :  { %1330 = vst [vmem:[#allocation10 + $0x138] sm:$0xff] %v1202_v26  ;;  %v1203_v39 = vadd.f32 %v1139_v9, %v943_v27  ;;  %v944_v40 = vadd.f32 %v880_v20, %v684_v28  ;;  %v685_v41 = vadd.f32 %v621_v30, %v425_v25  ;;  %v882_v45 = vmul.f32 %v2631_v42, %v3656_v50  ;;  %v2646_v20 = vld [vmem:[#allocation8 + $0x378] sm:$0xff]  ;;  %v2650_v33 = vld [vmem:[#allocation8 + $0x380] sm:$0xff] }
  0xd7   :  { %v686_v7 = vadd.f32 %v622_v38, %v426_v36  ;;  %v1142_v12 = vmul.f32 %v2632_v46, %v3659_v17  ;;  %v427_v48 = vmul.f32 %v2633_v47, %v3648_v43  ;;  %v623_v51 = vmul.f32 %v2634_v49, %v3651_v44  ;;  %v2647_v26 = vld [vmem:[#allocation8 + $0x578] sm:$0xff]  ;;  %v2651_v37 = vld [vmem:[#allocation8 + $0x580] sm:$0xff]  ;;  %v2654_v46 = vld [vmem:[#allocation8 + $0x388] sm:$0xff] }
  0xd8   :  { %1331 = vst [vmem:[#allocation10 + $0x140] sm:$0xff] %v1203_v39  ;;  %v1204_v24 = vadd.f32 %v1140_v22, %v944_v40  ;;  %v945_v52 = vadd.f32 %v881_v32, %v685_v41  ;;  %v883_v54 = vmul.f32 %v2635_v53, %v3656_v50  ;;  %v1143_v56 = vmul.f32 %v2636_v55, %v3659_v17  ;;  %v2652_v39 = vld [vmem:[#allocation8 + $0x780] sm:$0xff] }
  0xd9   :  { %v946_v57 = vadd.f32 %v882_v45, %v686_v7  ;;  %v687_v58 = vadd.f32 %v623_v51, %v427_v48  ;;  %v428_v60 = vmul.f32 %v2637_v59, %v3648_v43  ;;  %v624_v62 = vmul.f32 %v2638_v61, %v3651_v44  ;;  %v2653_v45 = vld [vmem:[#allocation8 + $0x188] sm:$0xff]  ;;  %v2659_v59 = vld [vmem:[#allocation8 + $0x590] sm:$0xff] }
  0xda   :  { %1332 = vst [vmem:[#allocation10 + $0x148] sm:$0xff] %v1204_v24  ;;  %v1205_v63 = vadd.f32 %v1141_v34, %v945_v52  ;;  %v884_v1 = vmul.f32 %v2639_v0, %v3656_v50  ;;  %v1144_v3 = vmul.f32 %v2640_v2, %v3659_v17  ;;  %v429_v5 = vmul.f32 %v2641_v4, %v3648_v43  ;;  %v2655_v48 = vld [vmem:[#allocation8 + $0x588] sm:$0xff]  ;;  %v2657_v52 = vld [vmem:[#allocation8 + $0x190] sm:$0xff] }
  0xdb   :  { %v1206_v6 = vadd.f32 %v1142_v12, %v946_v57  ;;  %v947_v8 = vadd.f32 %v883_v54, %v687_v58  ;;  %v688_v9 = vadd.f32 %v624_v62, %v428_v60  ;;  %v625_v11 = vmul.f32 %v2642_v10, %v3651_v44  ;;  %v2656_v51 = vld [vmem:[#allocation8 + $0x788] sm:$0xff]  ;;  %v2658_v57 = vld [vmem:[#allocation8 + $0x390] sm:$0xff]  ;;  %v2664_v10 = vld [vmem:[#allocation8 + $0x798] sm:$0xff] }
  0xdc   :  { %1333 = vst [vmem:[#allocation10 + $0x150] sm:$0xff] %v1205_v63  ;;  %v885_v14 = vmul.f32 %v2643_v13, %v3656_v50  ;;  %v1145_v16 = vmul.f32 %v2644_v15, %v3659_v17  ;;  %v430_v19 = vmul.f32 %v2645_v18, %v3648_v43  ;;  %v626_v21 = vmul.f32 %v2646_v20, %v3651_v44  ;;  %v2660_v61 = vld [vmem:[#allocation8 + $0x790] sm:$0xff]  ;;  %v2661_v63 = vld [vmem:[#allocation8 + $0x198] sm:$0xff]  ;;  %v2665_v13 = vld [vmem:[#allocation8 + $0x1a0] sm:$0xff] }
  0xdd   :  { %1334 = vst [vmem:[#allocation10 + $0x158] sm:$0xff] %v1206_v6  ;;  %v1207_v22 = vadd.f32 %v1143_v56, %v947_v8  ;;  %v948_v23 = vadd.f32 %v884_v1, %v688_v9  ;;  %v689_v25 = vadd.f32 %v625_v11, %v429_v5  ;;  %v886_v27 = vmul.f32 %v2647_v26, %v3656_v50  ;;  %v2662_v1 = vld [vmem:[#allocation8 + $0x398] sm:$0xff]  ;;  %v2666_v15 = vld [vmem:[#allocation8 + $0x3a0] sm:$0xff] }
  0xde   :  { %v690_v28 = vadd.f32 %v626_v21, %v430_v19  ;;  %v1146_v30 = vmul.f32 %v2648_v29, %v3659_v17  ;;  %v431_v32 = vmul.f32 %v2649_v31, %v3648_v43  ;;  %v627_v34 = vmul.f32 %v2650_v33, %v3651_v44  ;;  %v2663_v6 = vld [vmem:[#allocation8 + $0x598] sm:$0xff]  ;;  %v2667_v20 = vld [vmem:[#allocation8 + $0x5a0] sm:$0xff]  ;;  %v2670_v29 = vld [vmem:[#allocation8 + $0x3a8] sm:$0xff] }
  0xdf   :  { %1335 = vst [vmem:[#allocation10 + $0x160] sm:$0xff] %v1207_v22  ;;  %v1208_v35 = vadd.f32 %v1144_v3, %v948_v23  ;;  %v949_v36 = vadd.f32 %v885_v14, %v689_v25  ;;  %v887_v38 = vmul.f32 %v2651_v37, %v3656_v50  ;;  %v1147_v40 = vmul.f32 %v2652_v39, %v3659_v17  ;;  %v2668_v22 = vld [vmem:[#allocation8 + $0x7a0] sm:$0xff] }
  0xe0   :  { %v950_v41 = vadd.f32 %v886_v27, %v690_v28  ;;  %v691_v42 = vadd.f32 %v627_v34, %v431_v32  ;;  %v432_v7 = vmul.f32 %v2653_v45, %v3648_v43  ;;  %v628_v12 = vmul.f32 %v2654_v46, %v3651_v44  ;;  %v2669_v27 = vld [vmem:[#allocation8 + $0x1a8] sm:$0xff]  ;;  %v2675_v45 = vld [vmem:[#allocation8 + $0x5b0] sm:$0xff] }
  0xe1   :  { %1336 = vst [vmem:[#allocation10 + $0x168] sm:$0xff] %v1208_v35  ;;  %v1209_v47 = vadd.f32 %v1145_v16, %v949_v36  ;;  %v888_v49 = vmul.f32 %v2655_v48, %v3656_v50  ;;  %v1148_v24 = vmul.f32 %v2656_v51, %v3659_v17  ;;  %v433_v53 = vmul.f32 %v2657_v52, %v3648_v43  ;;  %v2671_v32 = vld [vmem:[#allocation8 + $0x5a8] sm:$0xff]  ;;  %v2673_v36 = vld [vmem:[#allocation8 + $0x1b0] sm:$0xff] }
  0xe2   :  { %v1210_v54 = vadd.f32 %v1146_v30, %v950_v41  ;;  %v951_v55 = vadd.f32 %v887_v38, %v691_v42  ;;  %v692_v56 = vadd.f32 %v628_v12, %v432_v7  ;;  %v629_v58 = vmul.f32 %v2658_v57, %v3651_v44  ;;  %v2672_v34 = vld [vmem:[#allocation8 + $0x7a8] sm:$0xff]  ;;  %v2674_v41 = vld [vmem:[#allocation8 + $0x3b0] sm:$0xff]  ;;  %v2680_v57 = vld [vmem:[#allocation8 + $0x7b8] sm:$0xff] }
  0xe3   :  { %1337 = vst [vmem:[#allocation10 + $0x170] sm:$0xff] %v1209_v47  ;;  %v889_v60 = vmul.f32 %v2659_v59, %v3656_v50  ;;  %v1149_v62 = vmul.f32 %v2660_v61, %v3659_v17  ;;  %v434_v0 = vmul.f32 %v2661_v63, %v3648_v43  ;;  %v630_v2 = vmul.f32 %v2662_v1, %v3651_v44  ;;  %v2676_v46 = vld [vmem:[#allocation8 + $0x7b0] sm:$0xff]  ;;  %v2677_v47 = vld [vmem:[#allocation8 + $0x1b8] sm:$0xff]  ;;  %v2681_v59 = vld [vmem:[#allocation8 + $0x1c0] sm:$0xff] }
  0xe4   :  { %1338 = vst [vmem:[#allocation10 + $0x178] sm:$0xff] %v1210_v54  ;;  %v1211_v3 = vadd.f32 %v1147_v40, %v951_v55  ;;  %v952_v4 = vadd.f32 %v888_v49, %v692_v56  ;;  %v693_v5 = vadd.f32 %v629_v58, %v433_v53  ;;  %v890_v8 = vmul.f32 %v2663_v6, %v3656_v50  ;;  %v2678_v49 = vld [vmem:[#allocation8 + $0x3b8] sm:$0xff]  ;;  %v2682_v61 = vld [vmem:[#allocation8 + $0x3c0] sm:$0xff] }
  0xe5   :  { %v694_v9 = vadd.f32 %v630_v2, %v434_v0  ;;  %v1150_v11 = vmul.f32 %v2664_v10, %v3659_v17  ;;  %v435_v14 = vmul.f32 %v2665_v13, %v3648_v43  ;;  %v631_v16 = vmul.f32 %v2666_v15, %v3651_v44  ;;  %v2679_v54 = vld [vmem:[#allocation8 + $0x5b8] sm:$0xff]  ;;  %v2683_v1 = vld [vmem:[#allocation8 + $0x5c0] sm:$0xff]  ;;  %v2686_v10 = vld [vmem:[#allocation8 + $0x3c8] sm:$0xff] }
  0xe6   :  { %1339 = vst [vmem:[#allocation10 + $0x180] sm:$0xff] %v1211_v3  ;;  %v1212_v18 = vadd.f32 %v1148_v24, %v952_v4  ;;  %v953_v19 = vadd.f32 %v889_v60, %v693_v5  ;;  %v891_v21 = vmul.f32 %v2667_v20, %v3656_v50  ;;  %v1151_v23 = vmul.f32 %v2668_v22, %v3659_v17  ;;  %v2684_v3 = vld [vmem:[#allocation8 + $0x7c0] sm:$0xff] }
  0xe7   :  { %v954_v25 = vadd.f32 %v890_v8, %v694_v9  ;;  %v695_v26 = vadd.f32 %v631_v16, %v435_v14  ;;  %v436_v28 = vmul.f32 %v2669_v27, %v3648_v43  ;;  %v632_v30 = vmul.f32 %v2670_v29, %v3651_v44  ;;  %v2685_v8 = vld [vmem:[#allocation8 + $0x1c8] sm:$0xff]  ;;  %v2691_v27 = vld [vmem:[#allocation8 + $0x5d0] sm:$0xff] }
  0xe8   :  { %1340 = vst [vmem:[#allocation10 + $0x188] sm:$0xff] %v1212_v18  ;;  %v1213_v31 = vadd.f32 %v1149_v62, %v953_v19  ;;  %v892_v33 = vmul.f32 %v2671_v32, %v3656_v50  ;;  %v1152_v35 = vmul.f32 %v2672_v34, %v3659_v17  ;;  %v437_v37 = vmul.f32 %v2673_v36, %v3648_v43  ;;  %v2687_v14 = vld [vmem:[#allocation8 + $0x5c8] sm:$0xff]  ;;  %v2689_v19 = vld [vmem:[#allocation8 + $0x1d0] sm:$0xff] }
  0xe9   :  { %v1214_v38 = vadd.f32 %v1150_v11, %v954_v25  ;;  %v955_v39 = vadd.f32 %v891_v21, %v695_v26  ;;  %v696_v40 = vadd.f32 %v632_v30, %v436_v28  ;;  %v633_v42 = vmul.f32 %v2674_v41, %v3651_v44  ;;  %v2688_v16 = vld [vmem:[#allocation8 + $0x7c8] sm:$0xff]  ;;  %v2690_v25 = vld [vmem:[#allocation8 + $0x3d0] sm:$0xff]  ;;  %v2696_v41 = vld [vmem:[#allocation8 + $0x7d8] sm:$0xff] }
  0xea   :  { %1341 = vst [vmem:[#allocation10 + $0x190] sm:$0xff] %v1213_v31  ;;  %v893_v7 = vmul.f32 %v2675_v45, %v3656_v50  ;;  %v1153_v12 = vmul.f32 %v2676_v46, %v3659_v17  ;;  %v438_v48 = vmul.f32 %v2677_v47, %v3648_v43  ;;  %v634_v51 = vmul.f32 %v2678_v49, %v3651_v44  ;;  %v2692_v29 = vld [vmem:[#allocation8 + $0x7d0] sm:$0xff]  ;;  %v2693_v31 = vld [vmem:[#allocation8 + $0x1d8] sm:$0xff]  ;;  %v2697_v45 = vld [vmem:[#allocation8 + $0x1e0] sm:$0xff] }
  0xeb   :  { %1342 = vst [vmem:[#allocation10 + $0x198] sm:$0xff] %v1214_v38  ;;  %v1215_v24 = vadd.f32 %v1151_v23, %v955_v39  ;;  %v956_v52 = vadd.f32 %v892_v33, %v696_v40  ;;  %v697_v53 = vadd.f32 %v633_v42, %v437_v37  ;;  %v894_v55 = vmul.f32 %v2679_v54, %v3656_v50  ;;  %v2694_v33 = vld [vmem:[#allocation8 + $0x3d8] sm:$0xff]  ;;  %v2698_v46 = vld [vmem:[#allocation8 + $0x3e0] sm:$0xff] }
  0xec   :  { %v698_v56 = vadd.f32 %v634_v51, %v438_v48  ;;  %v1154_v58 = vmul.f32 %v2680_v57, %v3659_v17  ;;  %v439_v60 = vmul.f32 %v2681_v59, %v3648_v43  ;;  %v635_v62 = vmul.f32 %v2682_v61, %v3651_v44  ;;  %v2695_v38 = vld [vmem:[#allocation8 + $0x5d8] sm:$0xff]  ;;  %v2699_v49 = vld [vmem:[#allocation8 + $0x5e0] sm:$0xff]  ;;  %v2702_v57 = vld [vmem:[#allocation8 + $0x3e8] sm:$0xff] }
  0xed   :  { %1343 = vst [vmem:[#allocation10 + $0x1a0] sm:$0xff] %v1215_v24  ;;  %v1216_v63 = vadd.f32 %v1152_v35, %v956_v52  ;;  %v957_v0 = vadd.f32 %v893_v7, %v697_v53  ;;  %v895_v2 = vmul.f32 %v2683_v1, %v3656_v50  ;;  %v1155_v4 = vmul.f32 %v2684_v3, %v3659_v17  ;;  %v2700_v24 = vld [vmem:[#allocation8 + $0x7e0] sm:$0xff] }
  0xee   :  { %v958_v5 = vadd.f32 %v894_v55, %v698_v56  ;;  %v699_v6 = vadd.f32 %v635_v62, %v439_v60  ;;  %v440_v9 = vmul.f32 %v2685_v8, %v3648_v43  ;;  %v636_v11 = vmul.f32 %v2686_v10, %v3651_v44  ;;  %v2701_v55 = vld [vmem:[#allocation8 + $0x1e8] sm:$0xff]  ;;  %v2707_v8 = vld [vmem:[#allocation8 + $0x5f0] sm:$0xff] }
  0xef   :  { %1344 = vst [vmem:[#allocation10 + $0x1a8] sm:$0xff] %v1216_v63  ;;  %v1217_v13 = vadd.f32 %v1153_v12, %v957_v0  ;;  %v896_v15 = vmul.f32 %v2687_v14, %v3656_v50  ;;  %v1156_v18 = vmul.f32 %v2688_v16, %v3659_v17  ;;  %v441_v20 = vmul.f32 %v2689_v19, %v3648_v43  ;;  %v2703_v60 = vld [vmem:[#allocation8 + $0x5e8] sm:$0xff]  ;;  %v2705_v0 = vld [vmem:[#allocation8 + $0x1f0] sm:$0xff] }
  0xf0   :  { %v1218_v21 = vadd.f32 %v1154_v58, %v958_v5  ;;  %v959_v22 = vadd.f32 %v895_v2, %v699_v6  ;;  %v700_v23 = vadd.f32 %v636_v11, %v440_v9  ;;  %v637_v26 = vmul.f32 %v2690_v25, %v3651_v44  ;;  %v2704_v62 = vld [vmem:[#allocation8 + $0x7e8] sm:$0xff]  ;;  %v2706_v5 = vld [vmem:[#allocation8 + $0x3f0] sm:$0xff]  ;;  %v2712_v25 = vld [vmem:[#allocation8 + $0x7f8] sm:$0xff] }
  0xf1   :  { %1345 = vst [vmem:[#allocation10 + $0x1b0] sm:$0xff] %v1217_v13  ;;  %v897_v28 = vmul.f32 %v2691_v27, %v3656_v50  ;;  %v1157_v30 = vmul.f32 %v2692_v29, %v3659_v17  ;;  %v442_v32 = vmul.f32 %v2693_v31, %v3648_v43  ;;  %v638_v34 = vmul.f32 %v2694_v33, %v3651_v44  ;;  %v2708_v10 = vld [vmem:[#allocation8 + $0x7f0] sm:$0xff]  ;;  %v2709_v13 = vld [vmem:[#allocation8 + $0x1f8] sm:$0xff]  ;;  %v2713_v29 = vld [vmem:[#allocation8] sm:$0xff] }
  0xf2   :  { %1346 = vst [vmem:[#allocation10 + $0x1b8] sm:$0xff] %v1218_v21  ;;  %v1219_v35 = vadd.f32 %v1155_v4, %v959_v22  ;;  %v960_v36 = vadd.f32 %v896_v15, %v700_v23  ;;  %v701_v37 = vadd.f32 %v637_v26, %v441_v20  ;;  %v898_v39 = vmul.f32 %v2695_v38, %v3656_v50  ;;  %v2710_v15 = vld [vmem:[#allocation8 + $0x3f8] sm:$0xff]  ;;  %v2714_v31 = vld [vmem:[#allocation8 + $0x200] sm:$0xff] }
  0xf3   :  { %v702_v40 = vadd.f32 %v638_v34, %v442_v32  ;;  %v1158_v42 = vmul.f32 %v2696_v41, %v3659_v17  ;;  %v443_v7 = vmul.f32 %v2697_v45, %v3648_v43  ;;  %v639_v12 = vmul.f32 %v2698_v46, %v3651_v44  ;;  %v2711_v21 = vld [vmem:[#allocation8 + $0x5f8] sm:$0xff]  ;;  %v2716_v38 = vld [vmem:[#allocation8 + $0x400] sm:$0xff]  ;;  %v2718_v45 = vld [vmem:[#allocation8 + $0x208] sm:$0xff] }
  0xf4   :  { %1347 = vst [vmem:[#allocation10 + $0x1c0] sm:$0xff] %v1219_v35  ;;  %v1220_v47 = vadd.f32 %v1156_v18, %v960_v36  ;;  %v961_v48 = vadd.f32 %v897_v28, %v701_v37  ;;  %v899_v51 = vmul.f32 %v2699_v49, %v3656_v50  ;;  %v1159_v52 = vmul.f32 %v2700_v24, %v3659_v17  ;;  %v2715_v35 = vld [vmem:[#allocation8 + $0x8] sm:$0xff] }
  0xf5   :  { %v962_v53 = vadd.f32 %v898_v39, %v702_v40  ;;  %v703_v54 = vadd.f32 %v639_v12, %v443_v7  ;;  %v444_v56 = vmul.f32 %v2701_v55, %v3648_v43  ;;  %v640_v58 = vmul.f32 %v2702_v57, %v3651_v44  ;;  %v2717_v40 = vld [vmem:[#allocation8 + $0x600] sm:$0xff]  ;;  %v2719_v46 = vld [vmem:[#allocation8 + $0x408] sm:$0xff]  ;;  %v2724_v57 = vld [vmem:[#allocation8 + $0x610] sm:$0xff] }
  0xf6   :  { %1348 = vst [vmem:[#allocation10 + $0x1c8] sm:$0xff] %v1220_v47  ;;  %v1221_v59 = vadd.f32 %v1157_v30, %v961_v48  ;;  %v900_v61 = vmul.f32 %v2703_v60, %v3656_v50  ;;  %v1160_v63 = vmul.f32 %v2704_v62, %v3659_v17  ;;  %v445_v1 = vmul.f32 %v2705_v0, %v3648_v43  ;;  %v2720_v47 = vld [vmem:[#allocation8 + $0x608] sm:$0xff] }
  0xf7   :  { %v1222_v2 = vadd.f32 %v1158_v42, %v962_v53  ;;  %v963_v3 = vadd.f32 %v899_v51, %v703_v54  ;;  %v704_v4 = vadd.f32 %v640_v58, %v444_v56  ;;  %v641_v6 = vmul.f32 %v2706_v5, %v3651_v44  ;;  %v2721_v51 = vld [vmem:[#allocation8 + $0x10] sm:$0xff] }
  0xf8   :  { %1349 = vst [vmem:[#allocation10 + $0x1d0] sm:$0xff] %v1221_v59  ;;  %v901_v9 = vmul.f32 %v2707_v8, %v3656_v50  ;;  %v1161_v11 = vmul.f32 %v2708_v10, %v3659_v17  ;;  %v446_v14 = vmul.f32 %v2709_v13, %v3648_v43  ;;  %v642_v16 = vmul.f32 %v2710_v15, %v3651_v44  ;;  %v2723_v54 = vld [vmem:[#allocation8 + $0x410] sm:$0xff]  ;;  %v2725_v59 = vld [vmem:[#allocation8 + $0x18] sm:$0xff]  ;;  %v2729_v8 = vld [vmem:[#allocation8 + $0x20] sm:$0xff] }
  0xf9   :  { %1350 = vst [vmem:[#allocation10 + $0x1d8] sm:$0xff] %v1222_v2  ;;  %v1223_v18 = vadd.f32 %v1159_v52, %v963_v3  ;;  %v964_v19 = vadd.f32 %v900_v61, %v704_v4  ;;  %v705_v20 = vadd.f32 %v641_v6, %v445_v1  ;;  %v902_v22 = vmul.f32 %v2711_v21, %v3656_v50  ;;  %v2722_v52 = vld [vmem:[#allocation8 + $0x210] sm:$0xff]  ;;  %v2726_v61 = vld [vmem:[#allocation8 + $0x218] sm:$0xff]  ;;  %v2730_v10 = vld [vmem:[#allocation8 + $0x220] sm:$0xff] }
  0xfa   :  { %v706_v23 = vadd.f32 %v642_v16, %v446_v14  ;;  %v1162_v26 = vmul.f32 %v2712_v25, %v3659_v17  ;;  %v3924_v27 = vstv %s3897_s9  ;;  %v3927_v28 = vstv %s3900_s10  ;;  %v2727_v1 = vld [vmem:[#allocation8 + $0x418] sm:$0xff]  ;;  %v2731_v14 = vld [vmem:[#allocation8 + $0x420] sm:$0xff]  ;;  %v2734_v25 = vld [vmem:[#allocation8 + $0x228] sm:$0xff] }
  0xfb   :  { %1351 = vst [vmem:[#allocation10 + $0x1e0] sm:$0xff] %v1223_v18  ;;  %v1224_v43 = vadd.f32 %v1160_v63, %v964_v19  ;;  %v965_v44 = vadd.f32 %v901_v9, %v705_v20  ;;  %v1357_v30 = vmul.f32 %v2713_v29, %v3924_v27  ;;  %v1489_v32 = vmul.f32 %v2714_v31, %v3927_v28  ;;  %v2728_v3 = vld [vmem:[#allocation8 + $0x618] sm:$0xff]  ;;  %v2732_v16 = vld [vmem:[#allocation8 + $0x620] sm:$0xff]  ;;  %v2733_v19 = vld [vmem:[#allocation8 + $0x28] sm:$0xff] }
  0xfc   :  { %v966_v33 = vadd.f32 %v902_v22, %v706_v23  ;;  %v3932_v34 = vstv %s3905_s11  ;;  %v3935_v50 = vstv %s3909_s12  ;;  %v1358_v17 = vmul.f32 %v2715_v35, %v3924_v27 }
  0xfd   :  { %1352 = vst [vmem:[#allocation10 + $0x1e8] sm:$0xff] %v1224_v43  ;;  %v1225_v36 = vadd.f32 %v1161_v11, %v965_v44  ;;  %v1553_v37 = vadd.f32 %v1489_v32, %v1357_v30  ;;  %v1749_v39 = vmul.f32 %v2716_v38, %v3932_v34  ;;  %v2009_v41 = vmul.f32 %v2717_v40, %v3935_v50  ;;  %v2735_v44 = vld [vmem:[#allocation8 + $0x428] sm:$0xff]  ;;  %v2737_v32 = vld [vmem:[#allocation8 + $0x30] sm:$0xff] }
  0xfe   :  { %v1226_v42 = vadd.f32 %v1162_v26, %v966_v33  ;;  %v1490_v7 = vmul.f32 %v2718_v45, %v3927_v28  ;;  %v1750_v12 = vmul.f32 %v2719_v46, %v3932_v34  ;;  %v2010_v48 = vmul.f32 %v2720_v47, %v3935_v50  ;;  %v2736_v30 = vld [vmem:[#allocation8 + $0x628] sm:$0xff]  ;;  %v2741_v45 = vld [vmem:[#allocation8 + $0x38] sm:$0xff] }
  0xff   :  { %1353 = vst [vmem:[#allocation10 + $0x1f0] sm:$0xff] %v1225_v36  ;;  %v1813_v49 = vadd.f32 %v1749_v39, %v1553_v37  ;;  %v1359_v24 = vmul.f32 %v2721_v51, %v3924_v27  ;;  %v1491_v53 = vmul.f32 %v2722_v52, %v3927_v28  ;;  %v1751_v55 = vmul.f32 %v2723_v54, %v3932_v34  ;;  %v2738_v37 = vld [vmem:[#allocation8 + $0x230] sm:$0xff]  ;;  %v2742_v46 = vld [vmem:[#allocation8 + $0x238] sm:$0xff] }
 0x100   :  { %1354 = vst [vmem:[#allocation10 + $0x1f8] sm:$0xff] %v1226_v42  ;;  %v1554_v56 = vadd.f32 %v1490_v7, %v1358_v17  ;;  %v2011_v58 = vmul.f32 %v2724_v57, %v3935_v50  ;;  %v1360_v60 = vmul.f32 %v2725_v59, %v3924_v27  ;;  %v1492_v62 = vmul.f32 %v2726_v61, %v3927_v28  ;;  %v2739_v39 = vld [vmem:[#allocation8 + $0x430] sm:$0xff]  ;;  %v2743_v51 = vld [vmem:[#allocation8 + $0x438] sm:$0xff]  ;;  %v2746_v57 = vld [vmem:[#allocation8 + $0x240] sm:$0xff] }
 0x101   :  { %v2073_v63 = vadd.f32 %v2009_v41, %v1813_v49  ;;  %v1555_v0 = vadd.f32 %v1491_v53, %v1359_v24  ;;  %v1752_v2 = vmul.f32 %v2727_v1, %v3932_v34  ;;  %v2012_v4 = vmul.f32 %v2728_v3, %v3935_v50  ;;  %v2740_v41 = vld [vmem:[#allocation8 + $0x630] sm:$0xff]  ;;  %v2744_v53 = vld [vmem:[#allocation8 + $0x638] sm:$0xff]  ;;  %v2747_v61 = vld [vmem:[#allocation8 + $0x440] sm:$0xff] }
 0x102   :  { %v1814_v5 = vadd.f32 %v1750_v12, %v1554_v56  ;;  %v1556_v6 = vadd.f32 %v1492_v62, %v1360_v60  ;;  %v1361_v9 = vmul.f32 %v2729_v8, %v3924_v27  ;;  %v1493_v11 = vmul.f32 %v2730_v10, %v3927_v28  ;;  %v2749_v3 = vld [vmem:[#allocation8 + $0x48] sm:$0xff] }
 0x103   :  { %2268 = vst [vmem:[#allocation9 + $0x200] sm:$0xff] %v2073_v63  ;;  %v1815_v13 = vadd.f32 %v1751_v55, %v1555_v0  ;;  %v1753_v15 = vmul.f32 %v2731_v14, %v3932_v34  ;;  %v2013_v18 = vmul.f32 %v2732_v16, %v3935_v50  ;;  %v1362_v20 = vmul.f32 %v2733_v19, %v3924_v27  ;;  %v2745_v55 = vld [vmem:[#allocation8 + $0x40] sm:$0xff]  ;;  %v2753_v14 = vld [vmem:[#allocation8 + $0x50] sm:$0xff] }
 0x104   :  { %v2074_v21 = vadd.f32 %v2010_v48, %v1814_v5  ;;  %v1816_v22 = vadd.f32 %v1752_v2, %v1556_v6  ;;  %v1557_v23 = vadd.f32 %v1493_v11, %v1361_v9  ;;  %v1494_v26 = vmul.f32 %v2734_v25, %v3927_v28  ;;  %v2748_v63 = vld [vmem:[#allocation8 + $0x640] sm:$0xff]  ;;  %v2750_v5 = vld [vmem:[#allocation8 + $0x248] sm:$0xff]  ;;  %v2756_v25 = vld [vmem:[#allocation8 + $0x650] sm:$0xff] }
 0x105   :  { %v2075_v43 = vadd.f32 %v2011_v58, %v1815_v13  ;;  %v1754_v29 = vmul.f32 %v2735_v44, %v3932_v34  ;;  %v2014_v31 = vmul.f32 %v2736_v30, %v3935_v50  ;;  %v1363_v33 = vmul.f32 %v2737_v32, %v3924_v27  ;;  %v2751_v9 = vld [vmem:[#allocation8 + $0x448] sm:$0xff] }
 0x106   :  { %2269 = vst [vmem:[#allocation9 + $0x208] sm:$0xff] %v2074_v21  ;;  %v2076_v35 = vadd.f32 %v2012_v4, %v1816_v22  ;;  %v1817_v17 = vadd.f32 %v1753_v15, %v1557_v23  ;;  %v1558_v36 = vadd.f32 %v1494_v26, %v1362_v20  ;;  %v1495_v38 = vmul.f32 %v2738_v37, %v3927_v28  ;;  %v2752_v11 = vld [vmem:[#allocation8 + $0x648] sm:$0xff]  ;;  %v2754_v20 = vld [vmem:[#allocation8 + $0x250] sm:$0xff]  ;;  %v2760_v37 = vld [vmem:[#allocation8 + $0x658] sm:$0xff] }
 0x107   :  { %2270 = vst [vmem:[#allocation9 + $0x210] sm:$0xff] %v2075_v43  ;;  %v1755_v40 = vmul.f32 %v2739_v39, %v3932_v34  ;;  %v2015_v42 = vmul.f32 %v2740_v41, %v3935_v50  ;;  %v1364_v7 = vmul.f32 %v2741_v45, %v3924_v27  ;;  %v1496_v12 = vmul.f32 %v2742_v46, %v3927_v28  ;;  %v2755_v22 = vld [vmem:[#allocation8 + $0x450] sm:$0xff]  ;;  %v2757_v43 = vld [vmem:[#allocation8 + $0x58] sm:$0xff]  ;;  %v2761_v39 = vld [vmem:[#allocation8 + $0x60] sm:$0xff] }
 0x108   :  { %2271 = vst [vmem:[#allocation9 + $0x218] sm:$0xff] %v2076_v35  ;;  %v2077_v47 = vadd.f32 %v2013_v18, %v1817_v17  ;;  %v1818_v48 = vadd.f32 %v1754_v29, %v1558_v36  ;;  %v1559_v49 = vadd.f32 %v1495_v38, %v1363_v33  ;;  %v1756_v24 = vmul.f32 %v2743_v51, %v3932_v34  ;;  %v2758_v29 = vld [vmem:[#allocation8 + $0x258] sm:$0xff]  ;;  %v2762_v41 = vld [vmem:[#allocation8 + $0x260] sm:$0xff] }
 0x109   :  { %v1560_v52 = vadd.f32 %v1496_v12, %v1364_v7  ;;  %v2016_v54 = vmul.f32 %v2744_v53, %v3935_v50  ;;  %v1365_v56 = vmul.f32 %v2745_v55, %v3924_v27  ;;  %v1497_v58 = vmul.f32 %v2746_v57, %v3927_v28  ;;  %v2759_v35 = vld [vmem:[#allocation8 + $0x458] sm:$0xff]  ;;  %v2763_v46 = vld [vmem:[#allocation8 + $0x460] sm:$0xff]  ;;  %v2766_v53 = vld [vmem:[#allocation8 + $0x268] sm:$0xff] }
 0x10a   :  { %2272 = vst [vmem:[#allocation9 + $0x220] sm:$0xff] %v2077_v47  ;;  %v2078_v59 = vadd.f32 %v2014_v31, %v1818_v48  ;;  %v1819_v60 = vadd.f32 %v1755_v40, %v1559_v49  ;;  %v1757_v62 = vmul.f32 %v2747_v61, %v3932_v34  ;;  %v2017_v0 = vmul.f32 %v2748_v63, %v3935_v50  ;;  %v2764_v47 = vld [vmem:[#allocation8 + $0x660] sm:$0xff] }
 0x10b   :  { %v1820_v1 = vadd.f32 %v1756_v24, %v1560_v52  ;;  %v1561_v2 = vadd.f32 %v1497_v58, %v1365_v56  ;;  %v1366_v4 = vmul.f32 %v2749_v3, %v3924_v27  ;;  %v1498_v6 = vmul.f32 %v2750_v5, %v3927_v28  ;;  %v2765_v24 = vld [vmem:[#allocation8 + $0x68] sm:$0xff]  ;;  %v2771_v3 = vld [vmem:[#allocation8 + $0x470] sm:$0xff] }
 0x10c   :  { %2273 = vst [vmem:[#allocation9 + $0x228] sm:$0xff] %v2078_v59  ;;  %v2079_v8 = vadd.f32 %v2015_v42, %v1819_v60  ;;  %v1758_v10 = vmul.f32 %v2751_v9, %v3932_v34  ;;  %v2018_v13 = vmul.f32 %v2752_v11, %v3935_v50  ;;  %v1367_v15 = vmul.f32 %v2753_v14, %v3924_v27  ;;  %v2767_v56 = vld [vmem:[#allocation8 + $0x468] sm:$0xff]  ;;  %v2769_v60 = vld [vmem:[#allocation8 + $0x70] sm:$0xff] }
 0x10d   :  { %v2080_v16 = vadd.f32 %v2016_v54, %v1820_v1  ;;  %v1821_v18 = vadd.f32 %v1757_v62, %v1561_v2  ;;  %v1562_v19 = vadd.f32 %v1498_v6, %v1366_v4  ;;  %v1499_v21 = vmul.f32 %v2754_v20, %v3927_v28  ;;  %v2768_v58 = vld [vmem:[#allocation8 + $0x668] sm:$0xff]  ;;  %v2770_v1 = vld [vmem:[#allocation8 + $0x270] sm:$0xff]  ;;  %v2776_v20 = vld [vmem:[#allocation8 + $0x678] sm:$0xff] }
 0x10e   :  { %2274 = vst [vmem:[#allocation9 + $0x230] sm:$0xff] %v2079_v8  ;;  %v1759_v23 = vmul.f32 %v2755_v22, %v3932_v34  ;;  %v2019_v26 = vmul.f32 %v2756_v25, %v3935_v50  ;;  %v1368_v44 = vmul.f32 %v2757_v43, %v3924_v27  ;;  %v1500_v30 = vmul.f32 %v2758_v29, %v3927_v28  ;;  %v2772_v5 = vld [vmem:[#allocation8 + $0x670] sm:$0xff]  ;;  %v2773_v8 = vld [vmem:[#allocation8 + $0x78] sm:$0xff]  ;;  %v2777_v22 = vld [vmem:[#allocation8 + $0x80] sm:$0xff] }
 0x10f   :  { %2275 = vst [vmem:[#allocation9 + $0x238] sm:$0xff] %v2080_v16  ;;  %v2081_v31 = vadd.f32 %v2017_v0, %v1821_v18  ;;  %v1822_v32 = vadd.f32 %v1758_v10, %v1562_v19  ;;  %v1563_v33 = vadd.f32 %v1499_v21, %v1367_v15  ;;  %v1760_v17 = vmul.f32 %v2759_v35, %v3932_v34  ;;  %v2774_v10 = vld [vmem:[#allocation8 + $0x278] sm:$0xff]  ;;  %v2778_v25 = vld [vmem:[#allocation8 + $0x280] sm:$0xff] }
 0x110   :  { %v1564_v36 = vadd.f32 %v1500_v30, %v1368_v44  ;;  %v2020_v38 = vmul.f32 %v2760_v37, %v3935_v50  ;;  %v1369_v40 = vmul.f32 %v2761_v39, %v3924_v27  ;;  %v1501_v42 = vmul.f32 %v2762_v41, %v3927_v28  ;;  %v2775_v16 = vld [vmem:[#allocation8 + $0x478] sm:$0xff]  ;;  %v2779_v29 = vld [vmem:[#allocation8 + $0x480] sm:$0xff]  ;;  %v2782_v37 = vld [vmem:[#allocation8 + $0x288] sm:$0xff] }
 0x111   :  { %2276 = vst [vmem:[#allocation9 + $0x240] sm:$0xff] %v2081_v31  ;;  %v2082_v45 = vadd.f32 %v2018_v13, %v1822_v32  ;;  %v1823_v7 = vadd.f32 %v1759_v23, %v1563_v33  ;;  %v1761_v12 = vmul.f32 %v2763_v46, %v3932_v34  ;;  %v2021_v48 = vmul.f32 %v2764_v47, %v3935_v50  ;;  %v2780_v31 = vld [vmem:[#allocation8 + $0x680] sm:$0xff] }
 0x112   :  { %v1824_v49 = vadd.f32 %v1760_v17, %v1564_v36  ;;  %v1565_v51 = vadd.f32 %v1501_v42, %v1369_v40  ;;  %v1370_v52 = vmul.f32 %v2765_v24, %v3924_v27  ;;  %v1502_v54 = vmul.f32 %v2766_v53, %v3927_v28  ;;  %v2781_v17 = vld [vmem:[#allocation8 + $0x88] sm:$0xff]  ;;  %v2787_v24 = vld [vmem:[#allocation8 + $0x490] sm:$0xff] }
 0x113   :  { %2277 = vst [vmem:[#allocation9 + $0x248] sm:$0xff] %v2082_v45  ;;  %v2083_v55 = vadd.f32 %v2019_v26, %v1823_v7  ;;  %v1762_v57 = vmul.f32 %v2767_v56, %v3932_v34  ;;  %v2022_v59 = vmul.f32 %v2768_v58, %v3935_v50  ;;  %v1371_v61 = vmul.f32 %v2769_v60, %v3924_v27  ;;  %v2783_v40 = vld [vmem:[#allocation8 + $0x488] sm:$0xff]  ;;  %v2785_v7 = vld [vmem:[#allocation8 + $0x90] sm:$0xff] }
 0x114   :  { %v2084_v62 = vadd.f32 %v2020_v38, %v1824_v49  ;;  %v1825_v63 = vadd.f32 %v1761_v12, %v1565_v51  ;;  %v1566_v0 = vadd.f32 %v1502_v54, %v1370_v52  ;;  %v1503_v2 = vmul.f32 %v2770_v1, %v3927_v28  ;;  %v2784_v42 = vld [vmem:[#allocation8 + $0x688] sm:$0xff]  ;;  %v2786_v49 = vld [vmem:[#allocation8 + $0x290] sm:$0xff]  ;;  %v2792_v1 = vld [vmem:[#allocation8 + $0x698] sm:$0xff] }
 0x115   :  { %2278 = vst [vmem:[#allocation9 + $0x250] sm:$0xff] %v2083_v55  ;;  %v1763_v4 = vmul.f32 %v2771_v3, %v3932_v34  ;;  %v2023_v6 = vmul.f32 %v2772_v5, %v3935_v50  ;;  %v1372_v9 = vmul.f32 %v2773_v8, %v3924_v27  ;;  %v1504_v11 = vmul.f32 %v2774_v10, %v3927_v28  ;;  %v2788_v53 = vld [vmem:[#allocation8 + $0x690] sm:$0xff]  ;;  %v2789_v55 = vld [vmem:[#allocation8 + $0x98] sm:$0xff]  ;;  %v2793_v3 = vld [vmem:[#allocation8 + $0xa0] sm:$0xff] }
 0x116   :  { %2279 = vst [vmem:[#allocation9 + $0x258] sm:$0xff] %v2084_v62  ;;  %v2085_v13 = vadd.f32 %v2021_v48, %v1825_v63  ;;  %v1826_v14 = vadd.f32 %v1762_v57, %v1566_v0  ;;  %v1567_v15 = vadd.f32 %v1503_v2, %v1371_v61  ;;  %v1764_v18 = vmul.f32 %v2775_v16, %v3932_v34  ;;  %v2790_v57 = vld [vmem:[#allocation8 + $0x298] sm:$0xff]  ;;  %v2794_v5 = vld [vmem:[#allocation8 + $0x2a0] sm:$0xff] }
 0x117   :  { %v1568_v19 = vadd.f32 %v1504_v11, %v1372_v9  ;;  %v2024_v21 = vmul.f32 %v2776_v20, %v3935_v50  ;;  %v1373_v23 = vmul.f32 %v2777_v22, %v3924_v27  ;;  %v1505_v26 = vmul.f32 %v2778_v25, %v3927_v28  ;;  %v2791_v62 = vld [vmem:[#allocation8 + $0x498] sm:$0xff]  ;;  %v2795_v10 = vld [vmem:[#allocation8 + $0x4a0] sm:$0xff]  ;;  %v2798_v20 = vld [vmem:[#allocation8 + $0x2a8] sm:$0xff] }
 0x118   :  { %2280 = vst [vmem:[#allocation9 + $0x260] sm:$0xff] %v2085_v13  ;;  %v2086_v43 = vadd.f32 %v2022_v59, %v1826_v14  ;;  %v1827_v44 = vadd.f32 %v1763_v4, %v1567_v15  ;;  %v1765_v30 = vmul.f32 %v2779_v29, %v3932_v34  ;;  %v2025_v32 = vmul.f32 %v2780_v31, %v3935_v50  ;;  %v2796_v13 = vld [vmem:[#allocation8 + $0x6a0] sm:$0xff] }
 0x119   :  { %v1828_v33 = vadd.f32 %v1764_v18, %v1568_v19  ;;  %v1569_v35 = vadd.f32 %v1505_v26, %v1373_v23  ;;  %v1374_v36 = vmul.f32 %v2781_v17, %v3924_v27  ;;  %v1506_v38 = vmul.f32 %v2782_v37, %v3927_v28  ;;  %v2797_v18 = vld [vmem:[#allocation8 + $0xa8] sm:$0xff]  ;;  %v2803_v17 = vld [vmem:[#allocation8 + $0x4b0] sm:$0xff] }
 0x11a   :  { %2281 = vst [vmem:[#allocation9 + $0x268] sm:$0xff] %v2086_v43  ;;  %v2087_v39 = vadd.f32 %v2023_v6, %v1827_v44  ;;  %v1766_v41 = vmul.f32 %v2783_v40, %v3932_v34  ;;  %v2026_v45 = vmul.f32 %v2784_v42, %v3935_v50  ;;  %v1375_v46 = vmul.f32 %v2785_v7, %v3924_v27  ;;  %v2799_v23 = vld [vmem:[#allocation8 + $0x4a8] sm:$0xff]  ;;  %v2801_v44 = vld [vmem:[#allocation8 + $0xb0] sm:$0xff] }
 0x11b   :  { %v2088_v12 = vadd.f32 %v2024_v21, %v1828_v33  ;;  %v1829_v47 = vadd.f32 %v1765_v30, %v1569_v35  ;;  %v1570_v48 = vadd.f32 %v1506_v38, %v1374_v36  ;;  %v1507_v51 = vmul.f32 %v2786_v49, %v3927_v28  ;;  %v2800_v26 = vld [vmem:[#allocation8 + $0x6a8] sm:$0xff]  ;;  %v2802_v33 = vld [vmem:[#allocation8 + $0x2b0] sm:$0xff]  ;;  %v2808_v49 = vld [vmem:[#allocation8 + $0x6b8] sm:$0xff] }
 0x11c   :  { %2282 = vst [vmem:[#allocation9 + $0x270] sm:$0xff] %v2087_v39  ;;  %v1767_v52 = vmul.f32 %v2787_v24, %v3932_v34  ;;  %v2027_v54 = vmul.f32 %v2788_v53, %v3935_v50  ;;  %v1376_v56 = vmul.f32 %v2789_v55, %v3924_v27  ;;  %v1508_v58 = vmul.f32 %v2790_v57, %v3927_v28  ;;  %v2804_v37 = vld [vmem:[#allocation8 + $0x6b0] sm:$0xff]  ;;  %v2805_v39 = vld [vmem:[#allocation8 + $0xb8] sm:$0xff]  ;;  %v2809_v24 = vld [vmem:[#allocation8 + $0xc0] sm:$0xff] }
 0x11d   :  { %2283 = vst [vmem:[#allocation9 + $0x278] sm:$0xff] %v2088_v12  ;;  %v2089_v59 = vadd.f32 %v2025_v32, %v1829_v47  ;;  %v1830_v60 = vadd.f32 %v1766_v41, %v1570_v48  ;;  %v1571_v61 = vadd.f32 %v1507_v51, %v1375_v46  ;;  %v1768_v63 = vmul.f32 %v2791_v62, %v3932_v34  ;;  %v2806_v41 = vld [vmem:[#allocation8 + $0x2b8] sm:$0xff]  ;;  %v2810_v53 = vld [vmem:[#allocation8 + $0x2c0] sm:$0xff] }
 0x11e   :  { %v1572_v0 = vadd.f32 %v1508_v58, %v1376_v56  ;;  %v2028_v2 = vmul.f32 %v2792_v1, %v3935_v50  ;;  %v1377_v4 = vmul.f32 %v2793_v3, %v3924_v27  ;;  %v1509_v6 = vmul.f32 %v2794_v5, %v3927_v28  ;;  %v2807_v12 = vld [vmem:[#allocation8 + $0x4b8] sm:$0xff]  ;;  %v2811_v57 = vld [vmem:[#allocation8 + $0x4c0] sm:$0xff]  ;;  %v2814_v1 = vld [vmem:[#allocation8 + $0x2c8] sm:$0xff] }
 0x11f   :  { %2284 = vst [vmem:[#allocation9 + $0x280] sm:$0xff] %v2089_v59  ;;  %v2090_v8 = vadd.f32 %v2026_v45, %v1830_v60  ;;  %v1831_v9 = vadd.f32 %v1767_v52, %v1571_v61  ;;  %v1769_v11 = vmul.f32 %v2795_v10, %v3932_v34  ;;  %v2029_v14 = vmul.f32 %v2796_v13, %v3935_v50  ;;  %v2812_v59 = vld [vmem:[#allocation8 + $0x6c0] sm:$0xff] }
 0x120   :  { %v1832_v15 = vadd.f32 %v1768_v63, %v1572_v0  ;;  %v1573_v16 = vadd.f32 %v1509_v6, %v1377_v4  ;;  %v1378_v19 = vmul.f32 %v2797_v18, %v3924_v27  ;;  %v1510_v21 = vmul.f32 %v2798_v20, %v3927_v28  ;;  %v2813_v63 = vld [vmem:[#allocation8 + $0xc8] sm:$0xff]  ;;  %v2819_v18 = vld [vmem:[#allocation8 + $0x4d0] sm:$0xff] }
 0x121   :  { %2285 = vst [vmem:[#allocation9 + $0x288] sm:$0xff] %v2090_v8  ;;  %v2091_v22 = vadd.f32 %v2027_v54, %v1831_v9  ;;  %v1770_v25 = vmul.f32 %v2799_v23, %v3932_v34  ;;  %v2030_v43 = vmul.f32 %v2800_v26, %v3935_v50  ;;  %v1379_v29 = vmul.f32 %v2801_v44, %v3924_v27  ;;  %v2815_v4 = vld [vmem:[#allocation8 + $0x4c8] sm:$0xff]  ;;  %v2817_v9 = vld [vmem:[#allocation8 + $0xd0] sm:$0xff] }
 0x122   :  { %v2092_v30 = vadd.f32 %v2028_v2, %v1832_v15  ;;  %v1833_v31 = vadd.f32 %v1769_v11, %v1573_v16  ;;  %v1574_v32 = vadd.f32 %v1510_v21, %v1378_v19  ;;  %v1511_v35 = vmul.f32 %v2802_v33, %v3927_v28  ;;  %v2816_v6 = vld [vmem:[#allocation8 + $0x6c8] sm:$0xff]  ;;  %v2818_v15 = vld [vmem:[#allocation8 + $0x2d0] sm:$0xff]  ;;  %v2824_v33 = vld [vmem:[#allocation8 + $0x6d8] sm:$0xff] }
 0x123   :  { %2286 = vst [vmem:[#allocation9 + $0x290] sm:$0xff] %v2091_v22  ;;  %v1771_v36 = vmul.f32 %v2803_v17, %v3932_v34  ;;  %v2031_v38 = vmul.f32 %v2804_v37, %v3935_v50  ;;  %v1380_v40 = vmul.f32 %v2805_v39, %v3924_v27  ;;  %v1512_v42 = vmul.f32 %v2806_v41, %v3927_v28  ;;  %v2820_v20 = vld [vmem:[#allocation8 + $0x6d0] sm:$0xff]  ;;  %v2821_v22 = vld [vmem:[#allocation8 + $0xd8] sm:$0xff]  ;;  %v2825_v17 = vld [vmem:[#allocation8 + $0xe0] sm:$0xff] }
 0x124   :  { %2287 = vst [vmem:[#allocation9 + $0x298] sm:$0xff] %v2092_v30  ;;  %v2093_v45 = vadd.f32 %v2029_v14, %v1833_v31  ;;  %v1834_v7 = vadd.f32 %v1770_v25, %v1574_v32  ;;  %v1575_v46 = vadd.f32 %v1511_v35, %v1379_v29  ;;  %v1772_v47 = vmul.f32 %v2807_v12, %v3932_v34  ;;  %v2822_v25 = vld [vmem:[#allocation8 + $0x2d8] sm:$0xff]  ;;  %v2826_v37 = vld [vmem:[#allocation8 + $0x2e0] sm:$0xff] }
 0x125   :  { %v1576_v48 = vadd.f32 %v1512_v42, %v1380_v40  ;;  %v2032_v51 = vmul.f32 %v2808_v49, %v3935_v50  ;;  %v1381_v52 = vmul.f32 %v2809_v24, %v3924_v27  ;;  %v1513_v54 = vmul.f32 %v2810_v53, %v3927_v28  ;;  %v2823_v30 = vld [vmem:[#allocation8 + $0x4d8] sm:$0xff]  ;;  %v2827_v41 = vld [vmem:[#allocation8 + $0x4e0] sm:$0xff]  ;;  %v2830_v49 = vld [vmem:[#allocation8 + $0x2e8] sm:$0xff] }
 0x126   :  { %2288 = vst [vmem:[#allocation9 + $0x2a0] sm:$0xff] %v2093_v45  ;;  %v2094_v55 = vadd.f32 %v2030_v43, %v1834_v7  ;;  %v1835_v56 = vadd.f32 %v1771_v36, %v1575_v46  ;;  %v1773_v58 = vmul.f32 %v2811_v57, %v3932_v34  ;;  %v2033_v60 = vmul.f32 %v2812_v59, %v3935_v50  ;;  %v2828_v45 = vld [vmem:[#allocation8 + $0x6e0] sm:$0xff] }
 0x127   :  { %v1836_v61 = vadd.f32 %v1772_v47, %v1576_v48  ;;  %v1577_v62 = vadd.f32 %v1513_v54, %v1381_v52  ;;  %v1382_v0 = vmul.f32 %v2813_v63, %v3924_v27  ;;  %v1514_v2 = vmul.f32 %v2814_v1, %v3927_v28  ;;  %v2829_v47 = vld [vmem:[#allocation8 + $0xe8] sm:$0xff]  ;;  %v2835_v63 = vld [vmem:[#allocation8 + $0x4f0] sm:$0xff] }
 0x128   :  { %2289 = vst [vmem:[#allocation9 + $0x2a8] sm:$0xff] %v2094_v55  ;;  %v2095_v3 = vadd.f32 %v2031_v38, %v1835_v56  ;;  %v1774_v5 = vmul.f32 %v2815_v4, %v3932_v34  ;;  %v2034_v8 = vmul.f32 %v2816_v6, %v3935_v50  ;;  %v1383_v10 = vmul.f32 %v2817_v9, %v3924_v27  ;;  %v2831_v52 = vld [vmem:[#allocation8 + $0x4e8] sm:$0xff]  ;;  %v2833_v56 = vld [vmem:[#allocation8 + $0xf0] sm:$0xff] }
 0x129   :  { %v2096_v11 = vadd.f32 %v2032_v51, %v1836_v61  ;;  %v1837_v13 = vadd.f32 %v1773_v58, %v1577_v62  ;;  %v1578_v14 = vadd.f32 %v1514_v2, %v1382_v0  ;;  %v1515_v16 = vmul.f32 %v2818_v15, %v3927_v28  ;;  %v2832_v54 = vld [vmem:[#allocation8 + $0x6e8] sm:$0xff]  ;;  %v2834_v61 = vld [vmem:[#allocation8 + $0x2f0] sm:$0xff]  ;;  %v2840_v15 = vld [vmem:[#allocation8 + $0x6f8] sm:$0xff] }
 0x12a   :  { %2290 = vst [vmem:[#allocation9 + $0x2b0] sm:$0xff] %v2095_v3  ;;  %v1775_v19 = vmul.f32 %v2819_v18, %v3932_v34  ;;  %v2035_v21 = vmul.f32 %v2820_v20, %v3935_v50  ;;  %v1384_v23 = vmul.f32 %v2821_v22, %v3924_v27  ;;  %v1516_v26 = vmul.f32 %v2822_v25, %v3927_v28  ;;  %v2836_v1 = vld [vmem:[#allocation8 + $0x6f0] sm:$0xff]  ;;  %v2837_v3 = vld [vmem:[#allocation8 + $0xf8] sm:$0xff]  ;;  %v2841_v18 = vld [vmem:[#allocation8 + $0x100] sm:$0xff] }
 0x12b   :  { %2291 = vst [vmem:[#allocation9 + $0x2b8] sm:$0xff] %v2096_v11  ;;  %v2097_v43 = vadd.f32 %v2033_v60, %v1837_v13  ;;  %v1838_v44 = vadd.f32 %v1774_v5, %v1578_v14  ;;  %v1579_v29 = vadd.f32 %v1515_v16, %v1383_v10  ;;  %v1776_v31 = vmul.f32 %v2823_v30, %v3932_v34  ;;  %v2838_v5 = vld [vmem:[#allocation8 + $0x2f8] sm:$0xff]  ;;  %v2842_v20 = vld [vmem:[#allocation8 + $0x300] sm:$0xff] }
 0x12c   :  { %v1580_v32 = vadd.f32 %v1516_v26, %v1384_v23  ;;  %v2036_v35 = vmul.f32 %v2824_v33, %v3935_v50  ;;  %v1385_v36 = vmul.f32 %v2825_v17, %v3924_v27  ;;  %v1517_v38 = vmul.f32 %v2826_v37, %v3927_v28  ;;  %v2839_v11 = vld [vmem:[#allocation8 + $0x4f8] sm:$0xff]  ;;  %v2843_v25 = vld [vmem:[#allocation8 + $0x500] sm:$0xff]  ;;  %v2846_v33 = vld [vmem:[#allocation8 + $0x308] sm:$0xff] }
 0x12d   :  { %2292 = vst [vmem:[#allocation9 + $0x2c0] sm:$0xff] %v2097_v43  ;;  %v2098_v39 = vadd.f32 %v2034_v8, %v1838_v44  ;;  %v1839_v40 = vadd.f32 %v1775_v19, %v1579_v29  ;;  %v1777_v42 = vmul.f32 %v2827_v41, %v3932_v34  ;;  %v2037_v7 = vmul.f32 %v2828_v45, %v3935_v50  ;;  %v2844_v43 = vld [vmem:[#allocation8 + $0x700] sm:$0xff] }
 0x12e   :  { %v1840_v46 = vadd.f32 %v1776_v31, %v1580_v32  ;;  %v1581_v12 = vadd.f32 %v1517_v38, %v1385_v36  ;;  %v1386_v48 = vmul.f32 %v2829_v47, %v3924_v27  ;;  %v1518_v51 = vmul.f32 %v2830_v49, %v3927_v28  ;;  %v2845_v31 = vld [vmem:[#allocation8 + $0x108] sm:$0xff]  ;;  %v2851_v47 = vld [vmem:[#allocation8 + $0x510] sm:$0xff] }
 0x12f   :  { %2293 = vst [vmem:[#allocation9 + $0x2c8] sm:$0xff] %v2098_v39  ;;  %v2099_v24 = vadd.f32 %v2035_v21, %v1839_v40  ;;  %v1778_v53 = vmul.f32 %v2831_v52, %v3932_v34  ;;  %v2038_v55 = vmul.f32 %v2832_v54, %v3935_v50  ;;  %v1387_v57 = vmul.f32 %v2833_v56, %v3924_v27  ;;  %v2847_v36 = vld [vmem:[#allocation8 + $0x508] sm:$0xff]  ;;  %v2849_v40 = vld [vmem:[#allocation8 + $0x110] sm:$0xff] }
 0x130   :  { %v2100_v58 = vadd.f32 %v2036_v35, %v1840_v46  ;;  %v1841_v59 = vadd.f32 %v1777_v42, %v1581_v12  ;;  %v1582_v60 = vadd.f32 %v1518_v51, %v1386_v48  ;;  %v1519_v62 = vmul.f32 %v2834_v61, %v3927_v28  ;;  %v2848_v38 = vld [vmem:[#allocation8 + $0x708] sm:$0xff]  ;;  %v2850_v46 = vld [vmem:[#allocation8 + $0x310] sm:$0xff]  ;;  %v2856_v61 = vld [vmem:[#allocation8 + $0x718] sm:$0xff] }
 0x131   :  { %2294 = vst [vmem:[#allocation9 + $0x2d0] sm:$0xff] %v2099_v24  ;;  %v1779_v0 = vmul.f32 %v2835_v63, %v3932_v34  ;;  %v2039_v2 = vmul.f32 %v2836_v1, %v3935_v50  ;;  %v1388_v4 = vmul.f32 %v2837_v3, %v3924_v27  ;;  %v1520_v6 = vmul.f32 %v2838_v5, %v3927_v28  ;;  %v2852_v49 = vld [vmem:[#allocation8 + $0x710] sm:$0xff]  ;;  %v2853_v24 = vld [vmem:[#allocation8 + $0x118] sm:$0xff]  ;;  %v2857_v63 = vld [vmem:[#allocation8 + $0x120] sm:$0xff] }
 0x132   :  { %2295 = vst [vmem:[#allocation9 + $0x2d8] sm:$0xff] %v2100_v58  ;;  %v2101_v8 = vadd.f32 %v2037_v7, %v1841_v59  ;;  %v1842_v9 = vadd.f32 %v1778_v53, %v1582_v60  ;;  %v1583_v10 = vadd.f32 %v1519_v62, %v1387_v57  ;;  %v1780_v13 = vmul.f32 %v2839_v11, %v3932_v34  ;;  %v2854_v53 = vld [vmem:[#allocation8 + $0x318] sm:$0xff]  ;;  %v2858_v1 = vld [vmem:[#allocation8 + $0x320] sm:$0xff] }
 0x133   :  { %v1584_v14 = vadd.f32 %v1520_v6, %v1388_v4  ;;  %v2040_v16 = vmul.f32 %v2840_v15, %v3935_v50  ;;  %v1389_v19 = vmul.f32 %v2841_v18, %v3924_v27  ;;  %v1521_v21 = vmul.f32 %v2842_v20, %v3927_v28  ;;  %v2855_v58 = vld [vmem:[#allocation8 + $0x518] sm:$0xff]  ;;  %v2859_v5 = vld [vmem:[#allocation8 + $0x520] sm:$0xff]  ;;  %v2862_v15 = vld [vmem:[#allocation8 + $0x328] sm:$0xff] }
 0x134   :  { %2296 = vst [vmem:[#allocation9 + $0x2e0] sm:$0xff] %v2101_v8  ;;  %v2102_v22 = vadd.f32 %v2038_v55, %v1842_v9  ;;  %v1843_v23 = vadd.f32 %v1779_v0, %v1583_v10  ;;  %v1781_v26 = vmul.f32 %v2843_v25, %v3932_v34  ;;  %v2041_v44 = vmul.f32 %v2844_v43, %v3935_v50  ;;  %v2860_v8 = vld [vmem:[#allocation8 + $0x720] sm:$0xff] }
 0x135   :  { %v1844_v29 = vadd.f32 %v1780_v13, %v1584_v14  ;;  %v1585_v30 = vadd.f32 %v1521_v21, %v1389_v19  ;;  %v1390_v32 = vmul.f32 %v2845_v31, %v3924_v27  ;;  %v1522_v35 = vmul.f32 %v2846_v33, %v3927_v28  ;;  %v2861_v13 = vld [vmem:[#allocation8 + $0x128] sm:$0xff]  ;;  %v2867_v31 = vld [vmem:[#allocation8 + $0x530] sm:$0xff] }
 0x136   :  { %2297 = vst [vmem:[#allocation9 + $0x2e8] sm:$0xff] %v2102_v22  ;;  %v2103_v17 = vadd.f32 %v2039_v2, %v1843_v23  ;;  %v1782_v37 = vmul.f32 %v2847_v36, %v3932_v34  ;;  %v2042_v39 = vmul.f32 %v2848_v38, %v3935_v50  ;;  %v1391_v41 = vmul.f32 %v2849_v40, %v3924_v27  ;;  %v2863_v19 = vld [vmem:[#allocation8 + $0x528] sm:$0xff]  ;;  %v2865_v23 = vld [vmem:[#allocation8 + $0x130] sm:$0xff] }
 0x137   :  { %v2104_v42 = vadd.f32 %v2040_v16, %v1844_v29  ;;  %v1845_v45 = vadd.f32 %v1781_v26, %v1585_v30  ;;  %v1586_v7 = vadd.f32 %v1522_v35, %v1390_v32  ;;  %v1523_v12 = vmul.f32 %v2850_v46, %v3927_v28  ;;  %v2864_v21 = vld [vmem:[#allocation8 + $0x728] sm:$0xff]  ;;  %v2866_v29 = vld [vmem:[#allocation8 + $0x330] sm:$0xff]  ;;  %v2872_v46 = vld [vmem:[#allocation8 + $0x738] sm:$0xff] }
 0x138   :  { %2298 = vst [vmem:[#allocation9 + $0x2f0] sm:$0xff] %v2103_v17  ;;  %v1783_v48 = vmul.f32 %v2851_v47, %v3932_v34  ;;  %v2043_v51 = vmul.f32 %v2852_v49, %v3935_v50  ;;  %v1392_v52 = vmul.f32 %v2853_v24, %v3924_v27  ;;  %v1524_v54 = vmul.f32 %v2854_v53, %v3927_v28  ;;  %v2868_v33 = vld [vmem:[#allocation8 + $0x730] sm:$0xff]  ;;  %v2869_v17 = vld [vmem:[#allocation8 + $0x138] sm:$0xff]  ;;  %v2873_v47 = vld [vmem:[#allocation8 + $0x140] sm:$0xff] }
 0x139   :  { %2299 = vst [vmem:[#allocation9 + $0x2f8] sm:$0xff] %v2104_v42  ;;  %v2105_v55 = vadd.f32 %v2041_v44, %v1845_v45  ;;  %v1846_v56 = vadd.f32 %v1782_v37, %v1586_v7  ;;  %v1587_v57 = vadd.f32 %v1523_v12, %v1391_v41  ;;  %v1784_v59 = vmul.f32 %v2855_v58, %v3932_v34  ;;  %v2870_v37 = vld [vmem:[#allocation8 + $0x338] sm:$0xff]  ;;  %v2874_v49 = vld [vmem:[#allocation8 + $0x340] sm:$0xff] }
 0x13a   :  { %v1588_v60 = vadd.f32 %v1524_v54, %v1392_v52  ;;  %v2044_v62 = vmul.f32 %v2856_v61, %v3935_v50  ;;  %v1393_v0 = vmul.f32 %v2857_v63, %v3924_v27  ;;  %v1525_v2 = vmul.f32 %v2858_v1, %v3927_v28  ;;  %v2871_v42 = vld [vmem:[#allocation8 + $0x538] sm:$0xff]  ;;  %v2875_v53 = vld [vmem:[#allocation8 + $0x540] sm:$0xff]  ;;  %v2878_v61 = vld [vmem:[#allocation8 + $0x348] sm:$0xff] }
 0x13b   :  { %2300 = vst [vmem:[#allocation9 + $0x300] sm:$0xff] %v2105_v55  ;;  %v2106_v3 = vadd.f32 %v2042_v39, %v1846_v56  ;;  %v1847_v4 = vadd.f32 %v1783_v48, %v1587_v57  ;;  %v1785_v6 = vmul.f32 %v2859_v5, %v3932_v34  ;;  %v2045_v9 = vmul.f32 %v2860_v8, %v3935_v50  ;;  %v2876_v55 = vld [vmem:[#allocation8 + $0x740] sm:$0xff] }
 0x13c   :  { %v1848_v10 = vadd.f32 %v1784_v59, %v1588_v60  ;;  %v1589_v11 = vadd.f32 %v1525_v2, %v1393_v0  ;;  %v1394_v14 = vmul.f32 %v2861_v13, %v3924_v27  ;;  %v1526_v16 = vmul.f32 %v2862_v15, %v3927_v28  ;;  %v2877_v59 = vld [vmem:[#allocation8 + $0x148] sm:$0xff]  ;;  %v2883_v13 = vld [vmem:[#allocation8 + $0x550] sm:$0xff] }
 0x13d   :  { %2301 = vst [vmem:[#allocation9 + $0x308] sm:$0xff] %v2106_v3  ;;  %v2107_v18 = vadd.f32 %v2043_v51, %v1847_v4  ;;  %v1786_v20 = vmul.f32 %v2863_v19, %v3932_v34  ;;  %v2046_v22 = vmul.f32 %v2864_v21, %v3935_v50  ;;  %v1395_v25 = vmul.f32 %v2865_v23, %v3924_v27  ;;  %v2879_v0 = vld [vmem:[#allocation8 + $0x548] sm:$0xff]  ;;  %v2881_v4 = vld [vmem:[#allocation8 + $0x150] sm:$0xff] }
 0x13e   :  { %v2108_v26 = vadd.f32 %v2044_v62, %v1848_v10  ;;  %v1849_v43 = vadd.f32 %v1785_v6, %v1589_v11  ;;  %v1590_v44 = vadd.f32 %v1526_v16, %v1394_v14  ;;  %v1527_v30 = vmul.f32 %v2866_v29, %v3927_v28  ;;  %v2880_v2 = vld [vmem:[#allocation8 + $0x748] sm:$0xff]  ;;  %v2882_v10 = vld [vmem:[#allocation8 + $0x350] sm:$0xff]  ;;  %v2888_v29 = vld [vmem:[#allocation8 + $0x758] sm:$0xff] }
 0x13f   :  { %2302 = vst [vmem:[#allocation9 + $0x310] sm:$0xff] %v2107_v18  ;;  %v1787_v32 = vmul.f32 %v2867_v31, %v3932_v34  ;;  %v2047_v35 = vmul.f32 %v2868_v33, %v3935_v50  ;;  %v1396_v36 = vmul.f32 %v2869_v17, %v3924_v27  ;;  %v1528_v38 = vmul.f32 %v2870_v37, %v3927_v28  ;;  %v2884_v15 = vld [vmem:[#allocation8 + $0x750] sm:$0xff]  ;;  %v2885_v18 = vld [vmem:[#allocation8 + $0x158] sm:$0xff]  ;;  %v2889_v31 = vld [vmem:[#allocation8 + $0x160] sm:$0xff] }
 0x140   :  { %2303 = vst [vmem:[#allocation9 + $0x318] sm:$0xff] %v2108_v26  ;;  %v2109_v39 = vadd.f32 %v2045_v9, %v1849_v43  ;;  %v1850_v40 = vadd.f32 %v1786_v20, %v1590_v44  ;;  %v1591_v41 = vadd.f32 %v1527_v30, %v1395_v25  ;;  %v1788_v45 = vmul.f32 %v2871_v42, %v3932_v34  ;;  %v2886_v20 = vld [vmem:[#allocation8 + $0x358] sm:$0xff]  ;;  %v2890_v33 = vld [vmem:[#allocation8 + $0x360] sm:$0xff] }
 0x141   :  { %v1592_v7 = vadd.f32 %v1528_v38, %v1396_v36  ;;  %v2048_v12 = vmul.f32 %v2872_v46, %v3935_v50  ;;  %v1397_v48 = vmul.f32 %v2873_v47, %v3924_v27  ;;  %v1529_v51 = vmul.f32 %v2874_v49, %v3927_v28  ;;  %v2887_v26 = vld [vmem:[#allocation8 + $0x558] sm:$0xff]  ;;  %v2891_v37 = vld [vmem:[#allocation8 + $0x560] sm:$0xff]  ;;  %v2894_v46 = vld [vmem:[#allocation8 + $0x368] sm:$0xff] }
 0x142   :  { %2304 = vst [vmem:[#allocation9 + $0x320] sm:$0xff] %v2109_v39  ;;  %v2110_v24 = vadd.f32 %v2046_v22, %v1850_v40  ;;  %v1851_v52 = vadd.f32 %v1787_v32, %v1591_v41  ;;  %v1789_v54 = vmul.f32 %v2875_v53, %v3932_v34  ;;  %v2049_v56 = vmul.f32 %v2876_v55, %v3935_v50  ;;  %v2892_v39 = vld [vmem:[#allocation8 + $0x760] sm:$0xff] }
 0x143   :  { %v1852_v57 = vadd.f32 %v1788_v45, %v1592_v7  ;;  %v1593_v58 = vadd.f32 %v1529_v51, %v1397_v48  ;;  %v1398_v60 = vmul.f32 %v2877_v59, %v3924_v27  ;;  %v1530_v62 = vmul.f32 %v2878_v61, %v3927_v28  ;;  %v2893_v45 = vld [vmem:[#allocation8 + $0x168] sm:$0xff]  ;;  %v2899_v59 = vld [vmem:[#allocation8 + $0x570] sm:$0xff] }
 0x144   :  { %2305 = vst [vmem:[#allocation9 + $0x328] sm:$0xff] %v2110_v24  ;;  %v2111_v63 = vadd.f32 %v2047_v35, %v1851_v52  ;;  %v1790_v1 = vmul.f32 %v2879_v0, %v3932_v34  ;;  %v2050_v3 = vmul.f32 %v2880_v2, %v3935_v50  ;;  %v1399_v5 = vmul.f32 %v2881_v4, %v3924_v27  ;;  %v2895_v48 = vld [vmem:[#allocation8 + $0x568] sm:$0xff]  ;;  %v2897_v52 = vld [vmem:[#allocation8 + $0x170] sm:$0xff] }
 0x145   :  { %v2112_v6 = vadd.f32 %v2048_v12, %v1852_v57  ;;  %v1853_v8 = vadd.f32 %v1789_v54, %v1593_v58  ;;  %v1594_v9 = vadd.f32 %v1530_v62, %v1398_v60  ;;  %v1531_v11 = vmul.f32 %v2882_v10, %v3927_v28  ;;  %v2896_v51 = vld [vmem:[#allocation8 + $0x768] sm:$0xff]  ;;  %v2898_v57 = vld [vmem:[#allocation8 + $0x370] sm:$0xff]  ;;  %v2904_v10 = vld [vmem:[#allocation8 + $0x778] sm:$0xff] }
 0x146   :  { %2306 = vst [vmem:[#allocation9 + $0x330] sm:$0xff] %v2111_v63  ;;  %v1791_v14 = vmul.f32 %v2883_v13, %v3932_v34  ;;  %v2051_v16 = vmul.f32 %v2884_v15, %v3935_v50  ;;  %v1400_v19 = vmul.f32 %v2885_v18, %v3924_v27  ;;  %v1532_v21 = vmul.f32 %v2886_v20, %v3927_v28  ;;  %v2900_v61 = vld [vmem:[#allocation8 + $0x770] sm:$0xff]  ;;  %v2901_v63 = vld [vmem:[#allocation8 + $0x178] sm:$0xff]  ;;  %v2905_v13 = vld [vmem:[#allocation8 + $0x180] sm:$0xff] }
 0x147   :  { %2307 = vst [vmem:[#allocation9 + $0x338] sm:$0xff] %v2112_v6  ;;  %v2113_v22 = vadd.f32 %v2049_v56, %v1853_v8  ;;  %v1854_v23 = vadd.f32 %v1790_v1, %v1594_v9  ;;  %v1595_v25 = vadd.f32 %v1531_v11, %v1399_v5  ;;  %v1792_v43 = vmul.f32 %v2887_v26, %v3932_v34  ;;  %v2902_v1 = vld [vmem:[#allocation8 + $0x378] sm:$0xff]  ;;  %v2906_v15 = vld [vmem:[#allocation8 + $0x380] sm:$0xff] }
 0x148   :  { %v1596_v44 = vadd.f32 %v1532_v21, %v1400_v19  ;;  %v2052_v30 = vmul.f32 %v2888_v29, %v3935_v50  ;;  %v1401_v32 = vmul.f32 %v2889_v31, %v3924_v27  ;;  %v1533_v35 = vmul.f32 %v2890_v33, %v3927_v28  ;;  %v2903_v6 = vld [vmem:[#allocation8 + $0x578] sm:$0xff]  ;;  %v2907_v20 = vld [vmem:[#allocation8 + $0x580] sm:$0xff]  ;;  %v2910_v29 = vld [vmem:[#allocation8 + $0x388] sm:$0xff] }
 0x149   :  { %2308 = vst [vmem:[#allocation9 + $0x340] sm:$0xff] %v2113_v22  ;;  %v2114_v17 = vadd.f32 %v2050_v3, %v1854_v23  ;;  %v1855_v36 = vadd.f32 %v1791_v14, %v1595_v25  ;;  %v1793_v38 = vmul.f32 %v2891_v37, %v3932_v34  ;;  %v2053_v40 = vmul.f32 %v2892_v39, %v3935_v50  ;;  %v2908_v22 = vld [vmem:[#allocation8 + $0x780] sm:$0xff] }
 0x14a   :  { %v1856_v41 = vadd.f32 %v1792_v43, %v1596_v44  ;;  %v1597_v42 = vadd.f32 %v1533_v35, %v1401_v32  ;;  %v1402_v7 = vmul.f32 %v2893_v45, %v3924_v27  ;;  %v1534_v12 = vmul.f32 %v2894_v46, %v3927_v28  ;;  %v2909_v43 = vld [vmem:[#allocation8 + $0x188] sm:$0xff]  ;;  %v2915_v45 = vld [vmem:[#allocation8 + $0x590] sm:$0xff] }
 0x14b   :  { %2309 = vst [vmem:[#allocation9 + $0x348] sm:$0xff] %v2114_v17  ;;  %v2115_v47 = vadd.f32 %v2051_v16, %v1855_v36  ;;  %v1794_v49 = vmul.f32 %v2895_v48, %v3932_v34  ;;  %v2054_v24 = vmul.f32 %v2896_v51, %v3935_v50  ;;  %v1403_v53 = vmul.f32 %v2897_v52, %v3924_v27  ;;  %v2911_v32 = vld [vmem:[#allocation8 + $0x588] sm:$0xff]  ;;  %v2913_v36 = vld [vmem:[#allocation8 + $0x190] sm:$0xff] }
 0x14c   :  { %v2116_v54 = vadd.f32 %v2052_v30, %v1856_v41  ;;  %v1857_v55 = vadd.f32 %v1793_v38, %v1597_v42  ;;  %v1598_v56 = vadd.f32 %v1534_v12, %v1402_v7  ;;  %v1535_v58 = vmul.f32 %v2898_v57, %v3927_v28  ;;  %v2912_v35 = vld [vmem:[#allocation8 + $0x788] sm:$0xff]  ;;  %v2914_v41 = vld [vmem:[#allocation8 + $0x390] sm:$0xff]  ;;  %v2920_v57 = vld [vmem:[#allocation8 + $0x798] sm:$0xff] }
 0x14d   :  { %2310 = vst [vmem:[#allocation9 + $0x350] sm:$0xff] %v2115_v47  ;;  %v1795_v60 = vmul.f32 %v2899_v59, %v3932_v34  ;;  %v2055_v62 = vmul.f32 %v2900_v61, %v3935_v50  ;;  %v1404_v0 = vmul.f32 %v2901_v63, %v3924_v27  ;;  %v1536_v2 = vmul.f32 %v2902_v1, %v3927_v28  ;;  %v2916_v46 = vld [vmem:[#allocation8 + $0x790] sm:$0xff]  ;;  %v2917_v47 = vld [vmem:[#allocation8 + $0x198] sm:$0xff]  ;;  %v2921_v59 = vld [vmem:[#allocation8 + $0x1a0] sm:$0xff] }
 0x14e   :  { %2311 = vst [vmem:[#allocation9 + $0x358] sm:$0xff] %v2116_v54  ;;  %v2117_v3 = vadd.f32 %v2053_v40, %v1857_v55  ;;  %v1858_v4 = vadd.f32 %v1794_v49, %v1598_v56  ;;  %v1599_v5 = vadd.f32 %v1535_v58, %v1403_v53  ;;  %v1796_v8 = vmul.f32 %v2903_v6, %v3932_v34  ;;  %v2918_v49 = vld [vmem:[#allocation8 + $0x398] sm:$0xff]  ;;  %v2922_v61 = vld [vmem:[#allocation8 + $0x3a0] sm:$0xff] }
 0x14f   :  { %v1600_v9 = vadd.f32 %v1536_v2, %v1404_v0  ;;  %v2056_v11 = vmul.f32 %v2904_v10, %v3935_v50  ;;  %v1405_v14 = vmul.f32 %v2905_v13, %v3924_v27  ;;  %v1537_v16 = vmul.f32 %v2906_v15, %v3927_v28  ;;  %v2919_v54 = vld [vmem:[#allocation8 + $0x598] sm:$0xff]  ;;  %v2923_v1 = vld [vmem:[#allocation8 + $0x5a0] sm:$0xff]  ;;  %v2926_v10 = vld [vmem:[#allocation8 + $0x3a8] sm:$0xff] }
 0x150   :  { %2312 = vst [vmem:[#allocation9 + $0x360] sm:$0xff] %v2117_v3  ;;  %v2118_v18 = vadd.f32 %v2054_v24, %v1858_v4  ;;  %v1859_v19 = vadd.f32 %v1795_v60, %v1599_v5  ;;  %v1797_v21 = vmul.f32 %v2907_v20, %v3932_v34  ;;  %v2057_v23 = vmul.f32 %v2908_v22, %v3935_v50  ;;  %v2924_v3 = vld [vmem:[#allocation8 + $0x7a0] sm:$0xff] }
 0x151   :  { %v1860_v25 = vadd.f32 %v1796_v8, %v1600_v9  ;;  %v1601_v26 = vadd.f32 %v1537_v16, %v1405_v14  ;;  %v1406_v44 = vmul.f32 %v2909_v43, %v3924_v27  ;;  %v1538_v30 = vmul.f32 %v2910_v29, %v3927_v28  ;;  %v2925_v8 = vld [vmem:[#allocation8 + $0x1a8] sm:$0xff]  ;;  %v2931_v43 = vld [vmem:[#allocation8 + $0x5b0] sm:$0xff] }
 0x152   :  { %2313 = vst [vmem:[#allocation9 + $0x368] sm:$0xff] %v2118_v18  ;;  %v2119_v31 = vadd.f32 %v2055_v62, %v1859_v19  ;;  %v1798_v33 = vmul.f32 %v2911_v32, %v3932_v34  ;;  %v2058_v17 = vmul.f32 %v2912_v35, %v3935_v50  ;;  %v1407_v37 = vmul.f32 %v2913_v36, %v3924_v27  ;;  %v2927_v14 = vld [vmem:[#allocation8 + $0x5a8] sm:$0xff]  ;;  %v2929_v19 = vld [vmem:[#allocation8 + $0x1b0] sm:$0xff] }
 0x153   :  { %v2120_v38 = vadd.f32 %v2056_v11, %v1860_v25  ;;  %v1861_v39 = vadd.f32 %v1797_v21, %v1601_v26  ;;  %v1602_v40 = vadd.f32 %v1538_v30, %v1406_v44  ;;  %v1539_v42 = vmul.f32 %v2914_v41, %v3927_v28  ;;  %v2928_v16 = vld [vmem:[#allocation8 + $0x7a8] sm:$0xff]  ;;  %v2930_v25 = vld [vmem:[#allocation8 + $0x3b0] sm:$0xff]  ;;  %v2936_v41 = vld [vmem:[#allocation8 + $0x7b8] sm:$0xff] }
 0x154   :  { %2314 = vst [vmem:[#allocation9 + $0x370] sm:$0xff] %v2119_v31  ;;  %v1799_v7 = vmul.f32 %v2915_v45, %v3932_v34  ;;  %v2059_v12 = vmul.f32 %v2916_v46, %v3935_v50  ;;  %v1408_v48 = vmul.f32 %v2917_v47, %v3924_v27  ;;  %v1540_v51 = vmul.f32 %v2918_v49, %v3927_v28  ;;  %v2932_v29 = vld [vmem:[#allocation8 + $0x7b0] sm:$0xff]  ;;  %v2933_v31 = vld [vmem:[#allocation8 + $0x1b8] sm:$0xff]  ;;  %v2937_v45 = vld [vmem:[#allocation8 + $0x1c0] sm:$0xff] }
 0x155   :  { %2315 = vst [vmem:[#allocation9 + $0x378] sm:$0xff] %v2120_v38  ;;  %v2121_v24 = vadd.f32 %v2057_v23, %v1861_v39  ;;  %v1862_v52 = vadd.f32 %v1798_v33, %v1602_v40  ;;  %v1603_v53 = vadd.f32 %v1539_v42, %v1407_v37  ;;  %v1800_v55 = vmul.f32 %v2919_v54, %v3932_v34  ;;  %v2934_v33 = vld [vmem:[#allocation8 + $0x3b8] sm:$0xff]  ;;  %v2938_v46 = vld [vmem:[#allocation8 + $0x3c0] sm:$0xff] }
 0x156   :  { %v1604_v56 = vadd.f32 %v1540_v51, %v1408_v48  ;;  %v2060_v58 = vmul.f32 %v2920_v57, %v3935_v50  ;;  %v1409_v60 = vmul.f32 %v2921_v59, %v3924_v27  ;;  %v1541_v62 = vmul.f32 %v2922_v61, %v3927_v28  ;;  %v2935_v38 = vld [vmem:[#allocation8 + $0x5b8] sm:$0xff]  ;;  %v2939_v49 = vld [vmem:[#allocation8 + $0x5c0] sm:$0xff]  ;;  %v2942_v57 = vld [vmem:[#allocation8 + $0x3c8] sm:$0xff] }
 0x157   :  { %2316 = vst [vmem:[#allocation9 + $0x380] sm:$0xff] %v2121_v24  ;;  %v2122_v63 = vadd.f32 %v2058_v17, %v1862_v52  ;;  %v1863_v0 = vadd.f32 %v1799_v7, %v1603_v53  ;;  %v1801_v2 = vmul.f32 %v2923_v1, %v3932_v34  ;;  %v2061_v4 = vmul.f32 %v2924_v3, %v3935_v50  ;;  %v2940_v24 = vld [vmem:[#allocation8 + $0x7c0] sm:$0xff] }
 0x158   :  { %v1864_v5 = vadd.f32 %v1800_v55, %v1604_v56  ;;  %v1605_v6 = vadd.f32 %v1541_v62, %v1409_v60  ;;  %v1410_v9 = vmul.f32 %v2925_v8, %v3924_v27  ;;  %v1542_v11 = vmul.f32 %v2926_v10, %v3927_v28  ;;  %v2941_v55 = vld [vmem:[#allocation8 + $0x1c8] sm:$0xff]  ;;  %v2947_v8 = vld [vmem:[#allocation8 + $0x5d0] sm:$0xff] }
 0x159   :  { %2317 = vst [vmem:[#allocation9 + $0x388] sm:$0xff] %v2122_v63  ;;  %v2123_v13 = vadd.f32 %v2059_v12, %v1863_v0  ;;  %v1802_v15 = vmul.f32 %v2927_v14, %v3932_v34  ;;  %v2062_v18 = vmul.f32 %v2928_v16, %v3935_v50  ;;  %v1411_v20 = vmul.f32 %v2929_v19, %v3924_v27  ;;  %v2943_v60 = vld [vmem:[#allocation8 + $0x5c8] sm:$0xff]  ;;  %v2945_v0 = vld [vmem:[#allocation8 + $0x1d0] sm:$0xff] }
 0x15a   :  { %v2124_v21 = vadd.f32 %v2060_v58, %v1864_v5  ;;  %v1865_v22 = vadd.f32 %v1801_v2, %v1605_v6  ;;  %v1606_v23 = vadd.f32 %v1542_v11, %v1410_v9  ;;  %v1543_v26 = vmul.f32 %v2930_v25, %v3927_v28  ;;  %v2944_v62 = vld [vmem:[#allocation8 + $0x7c8] sm:$0xff]  ;;  %v2946_v5 = vld [vmem:[#allocation8 + $0x3d0] sm:$0xff]  ;;  %v2952_v25 = vld [vmem:[#allocation8 + $0x7d8] sm:$0xff] }
 0x15b   :  { %2318 = vst [vmem:[#allocation9 + $0x390] sm:$0xff] %v2123_v13  ;;  %v1803_v44 = vmul.f32 %v2931_v43, %v3932_v34  ;;  %v2063_v30 = vmul.f32 %v2932_v29, %v3935_v50  ;;  %v1412_v32 = vmul.f32 %v2933_v31, %v3924_v27  ;;  %v1544_v35 = vmul.f32 %v2934_v33, %v3927_v28  ;;  %v2948_v10 = vld [vmem:[#allocation8 + $0x7d0] sm:$0xff]  ;;  %v2949_v13 = vld [vmem:[#allocation8 + $0x1d8] sm:$0xff]  ;;  %v2953_v43 = vld [vmem:[#allocation8 + $0x1e0] sm:$0xff] }
 0x15c   :  { %2319 = vst [vmem:[#allocation9 + $0x398] sm:$0xff] %v2124_v21  ;;  %v2125_v17 = vadd.f32 %v2061_v4, %v1865_v22  ;;  %v1866_v36 = vadd.f32 %v1802_v15, %v1606_v23  ;;  %v1607_v37 = vadd.f32 %v1543_v26, %v1411_v20  ;;  %v1804_v39 = vmul.f32 %v2935_v38, %v3932_v34  ;;  %v2950_v15 = vld [vmem:[#allocation8 + $0x3d8] sm:$0xff]  ;;  %v2954_v29 = vld [vmem:[#allocation8 + $0x3e0] sm:$0xff] }
 0x15d   :  { %v1608_v40 = vadd.f32 %v1544_v35, %v1412_v32  ;;  %v2064_v42 = vmul.f32 %v2936_v41, %v3935_v50  ;;  %v1413_v7 = vmul.f32 %v2937_v45, %v3924_v27  ;;  %v1545_v12 = vmul.f32 %v2938_v46, %v3927_v28  ;;  %v2951_v21 = vld [vmem:[#allocation8 + $0x5d8] sm:$0xff]  ;;  %v2955_v33 = vld [vmem:[#allocation8 + $0x5e0] sm:$0xff]  ;;  %v2958_v41 = vld [vmem:[#allocation8 + $0x3e8] sm:$0xff] }
 0x15e   :  { %2320 = vst [vmem:[#allocation9 + $0x3a0] sm:$0xff] %v2125_v17  ;;  %v2126_v47 = vadd.f32 %v2062_v18, %v1866_v36  ;;  %v1867_v48 = vadd.f32 %v1803_v44, %v1607_v37  ;;  %v1805_v51 = vmul.f32 %v2939_v49, %v3932_v34  ;;  %v2065_v52 = vmul.f32 %v2940_v24, %v3935_v50  ;;  %v2956_v17 = vld [vmem:[#allocation8 + $0x7e0] sm:$0xff] }
 0x15f   :  { %v1868_v53 = vadd.f32 %v1804_v39, %v1608_v40  ;;  %v1609_v54 = vadd.f32 %v1545_v12, %v1413_v7  ;;  %v1414_v56 = vmul.f32 %v2941_v55, %v3924_v27  ;;  %v1546_v58 = vmul.f32 %v2942_v57, %v3927_v28  ;;  %v2957_v39 = vld [vmem:[#allocation8 + $0x1e8] sm:$0xff]  ;;  %v2963_v55 = vld [vmem:[#allocation8 + $0x5f0] sm:$0xff] }
 0x160   :  { %2321 = vst [vmem:[#allocation9 + $0x3a8] sm:$0xff] %v2126_v47  ;;  %v2127_v59 = vadd.f32 %v2063_v30, %v1867_v48  ;;  %v1806_v61 = vmul.f32 %v2943_v60, %v3932_v34  ;;  %v2066_v63 = vmul.f32 %v2944_v62, %v3935_v50  ;;  %v1415_v1 = vmul.f32 %v2945_v0, %v3924_v27  ;;  %v2959_v7 = vld [vmem:[#allocation8 + $0x5e8] sm:$0xff]  ;;  %v2961_v48 = vld [vmem:[#allocation8 + $0x1f0] sm:$0xff] }
 0x161   :  { %v2128_v2 = vadd.f32 %v2064_v42, %v1868_v53  ;;  %v1869_v3 = vadd.f32 %v1805_v51, %v1609_v54  ;;  %v1610_v4 = vadd.f32 %v1546_v58, %v1414_v56  ;;  %v1547_v6 = vmul.f32 %v2946_v5, %v3927_v28  ;;  %v2960_v12 = vld [vmem:[#allocation8 + $0x7e8] sm:$0xff]  ;;  %v2962_v53 = vld [vmem:[#allocation8 + $0x3f0] sm:$0xff]  ;;  %v2968_v5 = vld [vmem:[#allocation8 + $0x7f8] sm:$0xff] }
 0x162   :  { %2322 = vst [vmem:[#allocation9 + $0x3b0] sm:$0xff] %v2127_v59  ;;  %v1807_v9 = vmul.f32 %v2947_v8, %v3932_v34  ;;  %v2067_v11 = vmul.f32 %v2948_v10, %v3935_v50  ;;  %v1416_v14 = vmul.f32 %v2949_v13, %v3924_v27  ;;  %v1548_v16 = vmul.f32 %v2950_v15, %v3927_v28  ;;  %v2964_v57 = vld [vmem:[#allocation8 + $0x7f0] sm:$0xff]  ;;  %v2965_v59 = vld [vmem:[#allocation8 + $0x1f8] sm:$0xff]  ;;  %v2969_v10 = vld [vmem:[#allocation8] sm:$0xff] }
 0x163   :  { %2323 = vst [vmem:[#allocation9 + $0x3b8] sm:$0xff] %v2128_v2  ;;  %v2129_v18 = vadd.f32 %v2065_v52, %v1869_v3  ;;  %v1870_v19 = vadd.f32 %v1806_v61, %v1610_v4  ;;  %v1611_v20 = vadd.f32 %v1547_v6, %v1415_v1  ;;  %v1808_v22 = vmul.f32 %v2951_v21, %v3932_v34  ;;  %v2966_v61 = vld [vmem:[#allocation8 + $0x3f8] sm:$0xff]  ;;  %v2970_v13 = vld [vmem:[#allocation8 + $0x200] sm:$0xff] }
 0x164   :  { %v1612_v23 = vadd.f32 %v1548_v16, %v1416_v14  ;;  %v2068_v26 = vmul.f32 %v2952_v25, %v3935_v50  ;;  %v1417_v44 = vmul.f32 %v2953_v43, %v3924_v27  ;;  %v1549_v30 = vmul.f32 %v2954_v29, %v3927_v28  ;;  %v2967_v2 = vld [vmem:[#allocation8 + $0x5f8] sm:$0xff]  ;;  %v2971_v16 = vld [vmem:[#allocation8 + $0x8] sm:$0xff]  ;;  %v2972_v21 = vld [vmem:[#allocation8 + $0x400] sm:$0xff] }
 0x165   :  { %2324 = vst [vmem:[#allocation9 + $0x3c0] sm:$0xff] %v2129_v18  ;;  %v2130_v31 = vadd.f32 %v2066_v63, %v1870_v19  ;;  %v1871_v32 = vadd.f32 %v1807_v9, %v1611_v20  ;;  %v1809_v35 = vmul.f32 %v2955_v33, %v3932_v34  ;;  %v2069_v36 = vmul.f32 %v2956_v17, %v3935_v50  ;;  %v2974_v43 = vld [vmem:[#allocation8 + $0x208] sm:$0xff] }
 0x166   :  { %v1872_v37 = vadd.f32 %v1808_v22, %v1612_v23  ;;  %v1613_v38 = vadd.f32 %v1549_v30, %v1417_v44  ;;  %v1418_v40 = vmul.f32 %v2957_v39, %v3924_v27  ;;  %v1550_v42 = vmul.f32 %v2958_v41, %v3927_v28  ;;  %v2973_v23 = vld [vmem:[#allocation8 + $0x600] sm:$0xff]  ;;  %v2975_v29 = vld [vmem:[#allocation8 + $0x408] sm:$0xff]  ;;  %v2980_v41 = vld [vmem:[#allocation8 + $0x610] sm:$0xff] }
 0x167   :  { %2325 = vst [vmem:[#allocation9 + $0x3c8] sm:$0xff] %v2130_v31  ;;  %v2131_v45 = vadd.f32 %v2067_v11, %v1871_v32  ;;  %v1810_v46 = vmul.f32 %v2959_v7, %v3932_v34  ;;  %v2070_v47 = vmul.f32 %v2960_v12, %v3935_v50  ;;  %v1419_v49 = vmul.f32 %v2961_v48, %v3924_v27  ;;  %v2976_v31 = vld [vmem:[#allocation8 + $0x608] sm:$0xff] }
 0x168   :  { %v2132_v51 = vadd.f32 %v2068_v26, %v1872_v37  ;;  %v1873_v24 = vadd.f32 %v1809_v35, %v1613_v38  ;;  %v1614_v52 = vadd.f32 %v1550_v42, %v1418_v40  ;;  %v1551_v54 = vmul.f32 %v2962_v53, %v3927_v28  ;;  %v2977_v35 = vld [vmem:[#allocation8 + $0x10] sm:$0xff] }
 0x169   :  { %2326 = vst [vmem:[#allocation9 + $0x3d0] sm:$0xff] %v2131_v45  ;;  %v1811_v56 = vmul.f32 %v2963_v55, %v3932_v34  ;;  %v2071_v58 = vmul.f32 %v2964_v57, %v3935_v50  ;;  %v1420_v60 = vmul.f32 %v2965_v59, %v3924_v27  ;;  %v1552_v62 = vmul.f32 %v2966_v61, %v3927_v28  ;;  %v2979_v38 = vld [vmem:[#allocation8 + $0x410] sm:$0xff]  ;;  %v2981_v45 = vld [vmem:[#allocation8 + $0x18] sm:$0xff]  ;;  %v2985_v55 = vld [vmem:[#allocation8 + $0x20] sm:$0xff] }
 0x16a   :  { %2327 = vst [vmem:[#allocation9 + $0x3d8] sm:$0xff] %v2132_v51  ;;  %v2133_v63 = vadd.f32 %v2069_v36, %v1873_v24  ;;  %v1874_v0 = vadd.f32 %v1810_v46, %v1614_v52  ;;  %v1615_v1 = vadd.f32 %v1551_v54, %v1419_v49  ;;  %v1812_v3 = vmul.f32 %v2967_v2, %v3932_v34  ;;  %v2978_v36 = vld [vmem:[#allocation8 + $0x210] sm:$0xff]  ;;  %v2982_v46 = vld [vmem:[#allocation8 + $0x218] sm:$0xff]  ;;  %v2986_v57 = vld [vmem:[#allocation8 + $0x220] sm:$0xff] }
 0x16b   :  { %v1616_v4 = vadd.f32 %v1552_v62, %v1420_v60  ;;  %v2072_v6 = vmul.f32 %v2968_v5, %v3935_v50  ;;  %v4200_v8 = vstv %s4173_s13  ;;  %v4203_v9 = vstv %s4176_s14  ;;  %v2983_v49 = vld [vmem:[#allocation8 + $0x418] sm:$0xff]  ;;  %v2987_v60 = vld [vmem:[#allocation8 + $0x420] sm:$0xff]  ;;  %v2990_v5 = vld [vmem:[#allocation8 + $0x228] sm:$0xff] }
 0x16c   :  { %2328 = vst [vmem:[#allocation9 + $0x3e0] sm:$0xff] %v2133_v63  ;;  %v2134_v27 = vadd.f32 %v2070_v47, %v1874_v0  ;;  %v1875_v28 = vadd.f32 %v1811_v56, %v1615_v1  ;;  %v1423_v11 = vmul.f32 %v2969_v10, %v4200_v8  ;;  %v1619_v14 = vmul.f32 %v2970_v13, %v4203_v9  ;;  %v2984_v24 = vld [vmem:[#allocation8 + $0x618] sm:$0xff]  ;;  %v2988_v62 = vld [vmem:[#allocation8 + $0x620] sm:$0xff]  ;;  %v2989_v0 = vld [vmem:[#allocation8 + $0x28] sm:$0xff] }
 0x16d   :  { %v1876_v34 = vadd.f32 %v1812_v3, %v1616_v4  ;;  %v4213_v50 = vstv %s4181_s15  ;;  %v4216_v15 = vstv %s4185_s16  ;;  %v1424_v18 = vmul.f32 %v2971_v16, %v4200_v8 }
 0x16e   :  { %2329 = vst [vmem:[#allocation9 + $0x3e8] sm:$0xff] %v2134_v27  ;;  %v2135_v19 = vadd.f32 %v2071_v58, %v1875_v28  ;;  %v1683_v20 = vadd.f32 %v1619_v14, %v1423_v11  ;;  %v1879_v22 = vmul.f32 %v2972_v21, %v4213_v50  ;;  %v2139_v25 = vmul.f32 %v2973_v23, %v4216_v15  ;;  %v2991_v28 = vld [vmem:[#allocation8 + $0x428] sm:$0xff]  ;;  %v2993_v14 = vld [vmem:[#allocation8 + $0x30] sm:$0xff] }
 0x16f   :  { %v2136_v26 = vadd.f32 %v2072_v6, %v1876_v34  ;;  %v1620_v44 = vmul.f32 %v2974_v43, %v4203_v9  ;;  %v1880_v30 = vmul.f32 %v2975_v29, %v4213_v50  ;;  %v2140_v32 = vmul.f32 %v2976_v31, %v4216_v15  ;;  %v2992_v11 = vld [vmem:[#allocation8 + $0x628] sm:$0xff]  ;;  %v2997_v43 = vld [vmem:[#allocation8 + $0x38] sm:$0xff] }
 0x170   :  { %2330 = vst [vmem:[#allocation9 + $0x3f0] sm:$0xff] %v2135_v19  ;;  %v1943_v33 = vadd.f32 %v1879_v22, %v1683_v20  ;;  %v1425_v17 = vmul.f32 %v2977_v35, %v4200_v8  ;;  %v1621_v37 = vmul.f32 %v2978_v36, %v4203_v9  ;;  %v1881_v39 = vmul.f32 %v2979_v38, %v4213_v50  ;;  %v2994_v20 = vld [vmem:[#allocation8 + $0x230] sm:$0xff]  ;;  %v2998_v29 = vld [vmem:[#allocation8 + $0x238] sm:$0xff] }
 0x171   :  { %2331 = vst [vmem:[#allocation9 + $0x3f8] sm:$0xff] %v2136_v26  ;;  %v1684_v40 = vadd.f32 %v1620_v44, %v1424_v18  ;;  %v2141_v42 = vmul.f32 %v2980_v41, %v4216_v15  ;;  %v1426_v7 = vmul.f32 %v2981_v45, %v4200_v8  ;;  %v1622_v12 = vmul.f32 %v2982_v46, %v4203_v9  ;;  %v2995_v22 = vld [vmem:[#allocation8 + $0x430] sm:$0xff]  ;;  %v2999_v35 = vld [vmem:[#allocation8 + $0x438] sm:$0xff]  ;;  %v3002_v41 = vld [vmem:[#allocation8 + $0x240] sm:$0xff] }
 0x172   :  { %v2203_v47 = vadd.f32 %v2139_v25, %v1943_v33  ;;  %v1685_v48 = vadd.f32 %v1621_v37, %v1425_v17  ;;  %v1882_v51 = vmul.f32 %v2983_v49, %v4213_v50  ;;  %v2142_v52 = vmul.f32 %v2984_v24, %v4216_v15  ;;  %2409 = dma.vmem_to_hbm [thread:$0]  %s2402_s18, 16384, %s2404_s21, [#allocation4], %s3334_s28, %s3334_s28, %s3335_s0   ;;  %v2996_v25 = vld [vmem:[#allocation8 + $0x630] sm:$0xff]  ;;  %v3000_v37 = vld [vmem:[#allocation8 + $0x638] sm:$0xff]  ;;  %v3003_v46 = vld [vmem:[#allocation8 + $0x440] sm:$0xff] }
 0x173   :  { %v1944_v53 = vadd.f32 %v1880_v30, %v1684_v40  ;;  %v1686_v54 = vadd.f32 %v1622_v12, %v1426_v7  ;;  %v1427_v56 = vmul.f32 %v2985_v55, %v4200_v8  ;;  %v1623_v58 = vmul.f32 %v2986_v57, %v4203_v9  ;;  %v3005_v24 = vld [vmem:[#allocation8 + $0x48] sm:$0xff] }
 0x174   :  { %2333 = vst [vmem:[#allocation10 + $0x200] sm:$0xff] %v2203_v47  ;;  %v1945_v59 = vadd.f32 %v1881_v39, %v1685_v48  ;;  %v1883_v61 = vmul.f32 %v2987_v60, %v4213_v50  ;;  %v2143_v63 = vmul.f32 %v2988_v62, %v4216_v15  ;;  %v1428_v1 = vmul.f32 %v2989_v0, %v4200_v8  ;;  %v3001_v39 = vld [vmem:[#allocation8 + $0x40] sm:$0xff]  ;;  %v3009_v60 = vld [vmem:[#allocation8 + $0x50] sm:$0xff] }
 0x175   :  { %v2204_v2 = vadd.f32 %v2140_v32, %v1944_v53  ;;  %v1946_v3 = vadd.f32 %v1882_v51, %v1686_v54  ;;  %v1687_v4 = vadd.f32 %v1623_v58, %v1427_v56  ;;  %v1624_v6 = vmul.f32 %v2990_v5, %v4203_v9  ;;  %v3004_v47 = vld [vmem:[#allocation8 + $0x640] sm:$0xff]  ;;  %v3006_v53 = vld [vmem:[#allocation8 + $0x248] sm:$0xff]  ;;  %v3012_v5 = vld [vmem:[#allocation8 + $0x650] sm:$0xff] }
 0x176   :  { %v2205_v27 = vadd.f32 %v2141_v42, %v1945_v59  ;;  %v1884_v10 = vmul.f32 %v2991_v28, %v4213_v50  ;;  %v2144_v13 = vmul.f32 %v2992_v11, %v4216_v15  ;;  %v1429_v34 = vmul.f32 %v2993_v14, %v4200_v8  ;;  %v3007_v56 = vld [vmem:[#allocation8 + $0x448] sm:$0xff] }
 0x177   :  { %2334 = vst [vmem:[#allocation10 + $0x208] sm:$0xff] %v2204_v2  ;;  %v2206_v16 = vadd.f32 %v2142_v52, %v1946_v3  ;;  %v1947_v18 = vadd.f32 %v1883_v61, %v1687_v4  ;;  %v1688_v19 = vadd.f32 %v1624_v6, %v1428_v1  ;;  %v1625_v21 = vmul.f32 %v2994_v20, %v4203_v9  ;;  %v3008_v58 = vld [vmem:[#allocation8 + $0x648] sm:$0xff]  ;;  %v3010_v1 = vld [vmem:[#allocation8 + $0x250] sm:$0xff]  ;;  %v3016_v20 = vld [vmem:[#allocation8 + $0x658] sm:$0xff] }
 0x178   :  { %2335 = vst [vmem:[#allocation10 + $0x210] sm:$0xff] %v2205_v27  ;;  %v1885_v23 = vmul.f32 %v2995_v22, %v4213_v50  ;;  %v2145_v26 = vmul.f32 %v2996_v25, %v4216_v15  ;;  %v1430_v44 = vmul.f32 %v2997_v43, %v4200_v8  ;;  %v1626_v30 = vmul.f32 %v2998_v29, %v4203_v9  ;;  %v3011_v3 = vld [vmem:[#allocation8 + $0x450] sm:$0xff]  ;;  %v3013_v27 = vld [vmem:[#allocation8 + $0x58] sm:$0xff]  ;;  %v3017_v22 = vld [vmem:[#allocation8 + $0x60] sm:$0xff] }
 0x179   :  { %2336 = vst [vmem:[#allocation10 + $0x218] sm:$0xff] %v2206_v16  ;;  %v2207_v31 = vadd.f32 %v2143_v63, %v1947_v18  ;;  %v1948_v32 = vadd.f32 %v1884_v10, %v1688_v19  ;;  %v1689_v33 = vadd.f32 %v1625_v21, %v1429_v34  ;;  %v1886_v17 = vmul.f32 %v2999_v35, %v4213_v50  ;;  %v3014_v10 = vld [vmem:[#allocation8 + $0x258] sm:$0xff]  ;;  %v3018_v25 = vld [vmem:[#allocation8 + $0x260] sm:$0xff] }
 0x17a   :  { %v1690_v36 = vadd.f32 %v1626_v30, %v1430_v44  ;;  %v2146_v38 = vmul.f32 %v3000_v37, %v4216_v15  ;;  %v1431_v40 = vmul.f32 %v3001_v39, %v4200_v8  ;;  %v1627_v42 = vmul.f32 %v3002_v41, %v4203_v9  ;;  %v3015_v16 = vld [vmem:[#allocation8 + $0x458] sm:$0xff]  ;;  %v3019_v29 = vld [vmem:[#allocation8 + $0x460] sm:$0xff]  ;;  %v3022_v37 = vld [vmem:[#allocation8 + $0x268] sm:$0xff] }
 0x17b   :  { %2337 = vst [vmem:[#allocation10 + $0x220] sm:$0xff] %v2207_v31  ;;  %v2208_v45 = vadd.f32 %v2144_v13, %v1948_v32  ;;  %v1949_v7 = vadd.f32 %v1885_v23, %v1689_v33  ;;  %v1887_v12 = vmul.f32 %v3003_v46, %v4213_v50  ;;  %v2147_v48 = vmul.f32 %v3004_v47, %v4216_v15  ;;  %v3020_v31 = vld [vmem:[#allocation8 + $0x660] sm:$0xff] }
 0x17c   :  { %v1950_v49 = vadd.f32 %v1886_v17, %v1690_v36  ;;  %v1691_v51 = vadd.f32 %v1627_v42, %v1431_v40  ;;  %v1432_v52 = vmul.f32 %v3005_v24, %v4200_v8  ;;  %v1628_v54 = vmul.f32 %v3006_v53, %v4203_v9  ;;  %v3021_v17 = vld [vmem:[#allocation8 + $0x68] sm:$0xff]  ;;  %v3027_v24 = vld [vmem:[#allocation8 + $0x470] sm:$0xff] }
 0x17d   :  { %2338 = vst [vmem:[#allocation10 + $0x228] sm:$0xff] %v2208_v45  ;;  %v2209_v55 = vadd.f32 %v2145_v26, %v1949_v7  ;;  %v1888_v57 = vmul.f32 %v3007_v56, %v4213_v50  ;;  %v2148_v59 = vmul.f32 %v3008_v58, %v4216_v15  ;;  %v1433_v61 = vmul.f32 %v3009_v60, %v4200_v8  ;;  %v3023_v40 = vld [vmem:[#allocation8 + $0x468] sm:$0xff]  ;;  %v3025_v7 = vld [vmem:[#allocation8 + $0x70] sm:$0xff] }
 0x17e   :  { %v2210_v62 = vadd.f32 %v2146_v38, %v1950_v49  ;;  %v1951_v63 = vadd.f32 %v1887_v12, %v1691_v51  ;;  %v1692_v0 = vadd.f32 %v1628_v54, %v1432_v52  ;;  %v1629_v2 = vmul.f32 %v3010_v1, %v4203_v9  ;;  %v3024_v42 = vld [vmem:[#allocation8 + $0x668] sm:$0xff]  ;;  %v3026_v49 = vld [vmem:[#allocation8 + $0x270] sm:$0xff]  ;;  %v3032_v1 = vld [vmem:[#allocation8 + $0x678] sm:$0xff] }
 0x17f   :  { %2339 = vst [vmem:[#allocation10 + $0x230] sm:$0xff] %v2209_v55  ;;  %v1889_v4 = vmul.f32 %v3011_v3, %v4213_v50  ;;  %v2149_v6 = vmul.f32 %v3012_v5, %v4216_v15  ;;  %v1434_v28 = vmul.f32 %v3013_v27, %v4200_v8  ;;  %v1630_v11 = vmul.f32 %v3014_v10, %v4203_v9  ;;  %v3028_v53 = vld [vmem:[#allocation8 + $0x670] sm:$0xff]  ;;  %v3029_v55 = vld [vmem:[#allocation8 + $0x78] sm:$0xff]  ;;  %v3033_v3 = vld [vmem:[#allocation8 + $0x80] sm:$0xff] }
 0x180   :  { %2340 = vst [vmem:[#allocation10 + $0x238] sm:$0xff] %v2210_v62  ;;  %v2211_v13 = vadd.f32 %v2147_v48, %v1951_v63  ;;  %v1952_v14 = vadd.f32 %v1888_v57, %v1692_v0  ;;  %v1693_v34 = vadd.f32 %v1629_v2, %v1433_v61  ;;  %v1890_v18 = vmul.f32 %v3015_v16, %v4213_v50  ;;  %v3030_v57 = vld [vmem:[#allocation8 + $0x278] sm:$0xff]  ;;  %v3034_v5 = vld [vmem:[#allocation8 + $0x280] sm:$0xff] }
 0x181   :  { %v1694_v19 = vadd.f32 %v1630_v11, %v1434_v28  ;;  %v2150_v21 = vmul.f32 %v3016_v20, %v4216_v15  ;;  %v1435_v23 = vmul.f32 %v3017_v22, %v4200_v8  ;;  %v1631_v26 = vmul.f32 %v3018_v25, %v4203_v9  ;;  %v3031_v62 = vld [vmem:[#allocation8 + $0x478] sm:$0xff]  ;;  %v3035_v10 = vld [vmem:[#allocation8 + $0x480] sm:$0xff]  ;;  %v3038_v20 = vld [vmem:[#allocation8 + $0x288] sm:$0xff] }
 0x182   :  { %2341 = vst [vmem:[#allocation10 + $0x240] sm:$0xff] %v2211_v13  ;;  %v2212_v43 = vadd.f32 %v2148_v59, %v1952_v14  ;;  %v1953_v44 = vadd.f32 %v1889_v4, %v1693_v34  ;;  %v1891_v30 = vmul.f32 %v3019_v29, %v4213_v50  ;;  %v2151_v32 = vmul.f32 %v3020_v31, %v4216_v15  ;;  %v3036_v13 = vld [vmem:[#allocation8 + $0x680] sm:$0xff] }
 0x183   :  { %v1954_v33 = vadd.f32 %v1890_v18, %v1694_v19  ;;  %v1695_v35 = vadd.f32 %v1631_v26, %v1435_v23  ;;  %v1436_v36 = vmul.f32 %v3021_v17, %v4200_v8  ;;  %v1632_v38 = vmul.f32 %v3022_v37, %v4203_v9  ;;  %v3037_v18 = vld [vmem:[#allocation8 + $0x88] sm:$0xff]  ;;  %v3043_v17 = vld [vmem:[#allocation8 + $0x490] sm:$0xff] }
 0x184   :  { %2342 = vst [vmem:[#allocation10 + $0x248] sm:$0xff] %v2212_v43  ;;  %v2213_v39 = vadd.f32 %v2149_v6, %v1953_v44  ;;  %v1892_v41 = vmul.f32 %v3023_v40, %v4213_v50  ;;  %v2152_v45 = vmul.f32 %v3024_v42, %v4216_v15  ;;  %v1437_v46 = vmul.f32 %v3025_v7, %v4200_v8  ;;  %v3039_v23 = vld [vmem:[#allocation8 + $0x488] sm:$0xff]  ;;  %v3041_v44 = vld [vmem:[#allocation8 + $0x90] sm:$0xff] }
 0x185   :  { %v2214_v12 = vadd.f32 %v2150_v21, %v1954_v33  ;;  %v1955_v47 = vadd.f32 %v1891_v30, %v1695_v35  ;;  %v1696_v48 = vadd.f32 %v1632_v38, %v1436_v36  ;;  %v1633_v51 = vmul.f32 %v3026_v49, %v4203_v9  ;;  %v3040_v26 = vld [vmem:[#allocation8 + $0x688] sm:$0xff]  ;;  %v3042_v33 = vld [vmem:[#allocation8 + $0x290] sm:$0xff]  ;;  %v3048_v49 = vld [vmem:[#allocation8 + $0x698] sm:$0xff] }
 0x186   :  { %2343 = vst [vmem:[#allocation10 + $0x250] sm:$0xff] %v2213_v39  ;;  %v1893_v52 = vmul.f32 %v3027_v24, %v4213_v50  ;;  %v2153_v54 = vmul.f32 %v3028_v53, %v4216_v15  ;;  %v1438_v56 = vmul.f32 %v3029_v55, %v4200_v8  ;;  %v1634_v58 = vmul.f32 %v3030_v57, %v4203_v9  ;;  %v3044_v37 = vld [vmem:[#allocation8 + $0x690] sm:$0xff]  ;;  %v3045_v39 = vld [vmem:[#allocation8 + $0x98] sm:$0xff]  ;;  %v3049_v24 = vld [vmem:[#allocation8 + $0xa0] sm:$0xff] }
 0x187   :  { %2344 = vst [vmem:[#allocation10 + $0x258] sm:$0xff] %v2214_v12  ;;  %v2215_v59 = vadd.f32 %v2151_v32, %v1955_v47  ;;  %v1956_v60 = vadd.f32 %v1892_v41, %v1696_v48  ;;  %v1697_v61 = vadd.f32 %v1633_v51, %v1437_v46  ;;  %v1894_v63 = vmul.f32 %v3031_v62, %v4213_v50  ;;  %v3046_v41 = vld [vmem:[#allocation8 + $0x298] sm:$0xff]  ;;  %v3050_v53 = vld [vmem:[#allocation8 + $0x2a0] sm:$0xff] }
 0x188   :  { %v1698_v0 = vadd.f32 %v1634_v58, %v1438_v56  ;;  %v2154_v2 = vmul.f32 %v3032_v1, %v4216_v15  ;;  %v1439_v4 = vmul.f32 %v3033_v3, %v4200_v8  ;;  %v1635_v6 = vmul.f32 %v3034_v5, %v4203_v9  ;;  %v3047_v12 = vld [vmem:[#allocation8 + $0x498] sm:$0xff]  ;;  %v3051_v57 = vld [vmem:[#allocation8 + $0x4a0] sm:$0xff]  ;;  %v3054_v1 = vld [vmem:[#allocation8 + $0x2a8] sm:$0xff] }
 0x189   :  { %2345 = vst [vmem:[#allocation10 + $0x260] sm:$0xff] %v2215_v59  ;;  %v2216_v27 = vadd.f32 %v2152_v45, %v1956_v60  ;;  %v1957_v28 = vadd.f32 %v1893_v52, %v1697_v61  ;;  %v1895_v11 = vmul.f32 %v3035_v10, %v4213_v50  ;;  %v2155_v14 = vmul.f32 %v3036_v13, %v4216_v15  ;;  %v3052_v59 = vld [vmem:[#allocation8 + $0x6a0] sm:$0xff] }
 0x18a   :  { %v1958_v34 = vadd.f32 %v1894_v63, %v1698_v0  ;;  %v1699_v16 = vadd.f32 %v1635_v6, %v1439_v4  ;;  %v1440_v19 = vmul.f32 %v3037_v18, %v4200_v8  ;;  %v1636_v21 = vmul.f32 %v3038_v20, %v4203_v9  ;;  %v3053_v63 = vld [vmem:[#allocation8 + $0xa8] sm:$0xff]  ;;  %v3059_v18 = vld [vmem:[#allocation8 + $0x4b0] sm:$0xff] }
 0x18b   :  { %2346 = vst [vmem:[#allocation10 + $0x268] sm:$0xff] %v2216_v27  ;;  %v2217_v22 = vadd.f32 %v2153_v54, %v1957_v28  ;;  %v1896_v25 = vmul.f32 %v3039_v23, %v4213_v50  ;;  %v2156_v43 = vmul.f32 %v3040_v26, %v4216_v15  ;;  %v1441_v29 = vmul.f32 %v3041_v44, %v4200_v8  ;;  %v3055_v4 = vld [vmem:[#allocation8 + $0x4a8] sm:$0xff]  ;;  %v3057_v28 = vld [vmem:[#allocation8 + $0xb0] sm:$0xff] }
 0x18c   :  { %v2218_v30 = vadd.f32 %v2154_v2, %v1958_v34  ;;  %v1959_v31 = vadd.f32 %v1895_v11, %v1699_v16  ;;  %v1700_v32 = vadd.f32 %v1636_v21, %v1440_v19  ;;  %v1637_v35 = vmul.f32 %v3042_v33, %v4203_v9  ;;  %v3056_v6 = vld [vmem:[#allocation8 + $0x6a8] sm:$0xff]  ;;  %v3058_v34 = vld [vmem:[#allocation8 + $0x2b0] sm:$0xff]  ;;  %v3064_v33 = vld [vmem:[#allocation8 + $0x6b8] sm:$0xff] }
 0x18d   :  { %2347 = vst [vmem:[#allocation10 + $0x270] sm:$0xff] %v2217_v22  ;;  %v1897_v36 = vmul.f32 %v3043_v17, %v4213_v50  ;;  %v2157_v38 = vmul.f32 %v3044_v37, %v4216_v15  ;;  %v1442_v40 = vmul.f32 %v3045_v39, %v4200_v8  ;;  %v1638_v42 = vmul.f32 %v3046_v41, %v4203_v9  ;;  %v3060_v20 = vld [vmem:[#allocation8 + $0x6b0] sm:$0xff]  ;;  %v3061_v22 = vld [vmem:[#allocation8 + $0xb8] sm:$0xff]  ;;  %v3065_v17 = vld [vmem:[#allocation8 + $0xc0] sm:$0xff] }
 0x18e   :  { %2348 = vst [vmem:[#allocation10 + $0x278] sm:$0xff] %v2218_v30  ;;  %v2219_v45 = vadd.f32 %v2155_v14, %v1959_v31  ;;  %v1960_v7 = vadd.f32 %v1896_v25, %v1700_v32  ;;  %v1701_v46 = vadd.f32 %v1637_v35, %v1441_v29  ;;  %v1898_v47 = vmul.f32 %v3047_v12, %v4213_v50  ;;  %v3062_v25 = vld [vmem:[#allocation8 + $0x2b8] sm:$0xff]  ;;  %v3066_v37 = vld [vmem:[#allocation8 + $0x2c0] sm:$0xff] }
 0x18f   :  { %v1702_v48 = vadd.f32 %v1638_v42, %v1442_v40  ;;  %v2158_v51 = vmul.f32 %v3048_v49, %v4216_v15  ;;  %v1443_v52 = vmul.f32 %v3049_v24, %v4200_v8  ;;  %v1639_v54 = vmul.f32 %v3050_v53, %v4203_v9  ;;  %v3063_v30 = vld [vmem:[#allocation8 + $0x4b8] sm:$0xff]  ;;  %v3067_v41 = vld [vmem:[#allocation8 + $0x4c0] sm:$0xff]  ;;  %v3070_v49 = vld [vmem:[#allocation8 + $0x2c8] sm:$0xff] }
 0x190   :  { %2349 = vst [vmem:[#allocation10 + $0x280] sm:$0xff] %v2219_v45  ;;  %v2220_v55 = vadd.f32 %v2156_v43, %v1960_v7  ;;  %v1961_v56 = vadd.f32 %v1897_v36, %v1701_v46  ;;  %v1899_v58 = vmul.f32 %v3051_v57, %v4213_v50  ;;  %v2159_v60 = vmul.f32 %v3052_v59, %v4216_v15  ;;  %v3068_v45 = vld [vmem:[#allocation8 + $0x6c0] sm:$0xff] }
 0x191   :  { %v1962_v61 = vadd.f32 %v1898_v47, %v1702_v48  ;;  %v1703_v62 = vadd.f32 %v1639_v54, %v1443_v52  ;;  %v1444_v0 = vmul.f32 %v3053_v63, %v4200_v8  ;;  %v1640_v2 = vmul.f32 %v3054_v1, %v4203_v9  ;;  %v3069_v47 = vld [vmem:[#allocation8 + $0xc8] sm:$0xff]  ;;  %v3075_v63 = vld [vmem:[#allocation8 + $0x4d0] sm:$0xff] }
 0x192   :  { %2350 = vst [vmem:[#allocation10 + $0x288] sm:$0xff] %v2220_v55  ;;  %v2221_v3 = vadd.f32 %v2157_v38, %v1961_v56  ;;  %v1900_v5 = vmul.f32 %v3055_v4, %v4213_v50  ;;  %v2160_v27 = vmul.f32 %v3056_v6, %v4216_v15  ;;  %v1445_v10 = vmul.f32 %v3057_v28, %v4200_v8  ;;  %v3071_v52 = vld [vmem:[#allocation8 + $0x4c8] sm:$0xff]  ;;  %v3073_v56 = vld [vmem:[#allocation8 + $0xd0] sm:$0xff] }
 0x193   :  { %v2222_v11 = vadd.f32 %v2158_v51, %v1962_v61  ;;  %v1963_v13 = vadd.f32 %v1899_v58, %v1703_v62  ;;  %v1704_v14 = vadd.f32 %v1640_v2, %v1444_v0  ;;  %v1641_v16 = vmul.f32 %v3058_v34, %v4203_v9  ;;  %v3072_v54 = vld [vmem:[#allocation8 + $0x6c8] sm:$0xff]  ;;  %v3074_v61 = vld [vmem:[#allocation8 + $0x2d0] sm:$0xff]  ;;  %v3080_v34 = vld [vmem:[#allocation8 + $0x6d8] sm:$0xff] }
 0x194   :  { %2351 = vst [vmem:[#allocation10 + $0x290] sm:$0xff] %v2221_v3  ;;  %v1901_v19 = vmul.f32 %v3059_v18, %v4213_v50  ;;  %v2161_v21 = vmul.f32 %v3060_v20, %v4216_v15  ;;  %v1446_v23 = vmul.f32 %v3061_v22, %v4200_v8  ;;  %v1642_v26 = vmul.f32 %v3062_v25, %v4203_v9  ;;  %v3076_v1 = vld [vmem:[#allocation8 + $0x6d0] sm:$0xff]  ;;  %v3077_v3 = vld [vmem:[#allocation8 + $0xd8] sm:$0xff]  ;;  %v3081_v18 = vld [vmem:[#allocation8 + $0xe0] sm:$0xff] }
 0x195   :  { %2352 = vst [vmem:[#allocation10 + $0x298] sm:$0xff] %v2222_v11  ;;  %v2223_v43 = vadd.f32 %v2159_v60, %v1963_v13  ;;  %v1964_v44 = vadd.f32 %v1900_v5, %v1704_v14  ;;  %v1705_v29 = vadd.f32 %v1641_v16, %v1445_v10  ;;  %v1902_v31 = vmul.f32 %v3063_v30, %v4213_v50  ;;  %v3078_v5 = vld [vmem:[#allocation8 + $0x2d8] sm:$0xff]  ;;  %v3082_v20 = vld [vmem:[#allocation8 + $0x2e0] sm:$0xff] }
 0x196   :  { %v1706_v32 = vadd.f32 %v1642_v26, %v1446_v23  ;;  %v2162_v35 = vmul.f32 %v3064_v33, %v4216_v15  ;;  %v1447_v36 = vmul.f32 %v3065_v17, %v4200_v8  ;;  %v1643_v38 = vmul.f32 %v3066_v37, %v4203_v9  ;;  %v3079_v11 = vld [vmem:[#allocation8 + $0x4d8] sm:$0xff]  ;;  %v3083_v25 = vld [vmem:[#allocation8 + $0x4e0] sm:$0xff]  ;;  %v3086_v33 = vld [vmem:[#allocation8 + $0x2e8] sm:$0xff] }
 0x197   :  { %2353 = vst [vmem:[#allocation10 + $0x2a0] sm:$0xff] %v2223_v43  ;;  %v2224_v39 = vadd.f32 %v2160_v27, %v1964_v44  ;;  %v1965_v40 = vadd.f32 %v1901_v19, %v1705_v29  ;;  %v1903_v42 = vmul.f32 %v3067_v41, %v4213_v50  ;;  %v2163_v7 = vmul.f32 %v3068_v45, %v4216_v15  ;;  %v3084_v43 = vld [vmem:[#allocation8 + $0x6e0] sm:$0xff] }
 0x198   :  { %v1966_v46 = vadd.f32 %v1902_v31, %v1706_v32  ;;  %v1707_v12 = vadd.f32 %v1643_v38, %v1447_v36  ;;  %v1448_v48 = vmul.f32 %v3069_v47, %v4200_v8  ;;  %v1644_v51 = vmul.f32 %v3070_v49, %v4203_v9  ;;  %v3085_v31 = vld [vmem:[#allocation8 + $0xe8] sm:$0xff]  ;;  %v3091_v47 = vld [vmem:[#allocation8 + $0x4f0] sm:$0xff] }
 0x199   :  { %2354 = vst [vmem:[#allocation10 + $0x2a8] sm:$0xff] %v2224_v39  ;;  %v2225_v24 = vadd.f32 %v2161_v21, %v1965_v40  ;;  %v1904_v53 = vmul.f32 %v3071_v52, %v4213_v50  ;;  %v2164_v55 = vmul.f32 %v3072_v54, %v4216_v15  ;;  %v1449_v57 = vmul.f32 %v3073_v56, %v4200_v8  ;;  %v3087_v36 = vld [vmem:[#allocation8 + $0x4e8] sm:$0xff]  ;;  %v3089_v40 = vld [vmem:[#allocation8 + $0xf0] sm:$0xff] }
 0x19a   :  { %v2226_v58 = vadd.f32 %v2162_v35, %v1966_v46  ;;  %v1967_v59 = vadd.f32 %v1903_v42, %v1707_v12  ;;  %v1708_v60 = vadd.f32 %v1644_v51, %v1448_v48  ;;  %v1645_v62 = vmul.f32 %v3074_v61, %v4203_v9  ;;  %v3088_v38 = vld [vmem:[#allocation8 + $0x6e8] sm:$0xff]  ;;  %v3090_v46 = vld [vmem:[#allocation8 + $0x2f0] sm:$0xff]  ;;  %v3096_v61 = vld [vmem:[#allocation8 + $0x6f8] sm:$0xff] }
 0x19b   :  { %2355 = vst [vmem:[#allocation10 + $0x2b0] sm:$0xff] %v2225_v24  ;;  %v1905_v0 = vmul.f32 %v3075_v63, %v4213_v50  ;;  %v2165_v2 = vmul.f32 %v3076_v1, %v4216_v15  ;;  %v1450_v4 = vmul.f32 %v3077_v3, %v4200_v8  ;;  %v1646_v6 = vmul.f32 %v3078_v5, %v4203_v9  ;;  %v3092_v49 = vld [vmem:[#allocation8 + $0x6f0] sm:$0xff]  ;;  %v3093_v24 = vld [vmem:[#allocation8 + $0xf8] sm:$0xff]  ;;  %v3097_v63 = vld [vmem:[#allocation8 + $0x100] sm:$0xff] }
 0x19c   :  { %2356 = vst [vmem:[#allocation10 + $0x2b8] sm:$0xff] %v2226_v58  ;;  %v2227_v27 = vadd.f32 %v2163_v7, %v1967_v59  ;;  %v1968_v28 = vadd.f32 %v1904_v53, %v1708_v60  ;;  %v1709_v10 = vadd.f32 %v1645_v62, %v1449_v57  ;;  %v1906_v13 = vmul.f32 %v3079_v11, %v4213_v50  ;;  %v3094_v53 = vld [vmem:[#allocation8 + $0x2f8] sm:$0xff]  ;;  %v3098_v1 = vld [vmem:[#allocation8 + $0x300] sm:$0xff] }
 0x19d   :  { %v1710_v14 = vadd.f32 %v1646_v6, %v1450_v4  ;;  %v2166_v16 = vmul.f32 %v3080_v34, %v4216_v15  ;;  %v1451_v19 = vmul.f32 %v3081_v18, %v4200_v8  ;;  %v1647_v21 = vmul.f32 %v3082_v20, %v4203_v9  ;;  %v3095_v58 = vld [vmem:[#allocation8 + $0x4f8] sm:$0xff]  ;;  %v3099_v5 = vld [vmem:[#allocation8 + $0x500] sm:$0xff]  ;;  %v3102_v34 = vld [vmem:[#allocation8 + $0x308] sm:$0xff] }
 0x19e   :  { %2357 = vst [vmem:[#allocation10 + $0x2c0] sm:$0xff] %v2227_v27  ;;  %v2228_v22 = vadd.f32 %v2164_v55, %v1968_v28  ;;  %v1969_v23 = vadd.f32 %v1905_v0, %v1709_v10  ;;  %v1907_v26 = vmul.f32 %v3083_v25, %v4213_v50  ;;  %v2167_v44 = vmul.f32 %v3084_v43, %v4216_v15  ;;  %v3100_v27 = vld [vmem:[#allocation8 + $0x700] sm:$0xff] }
 0x19f   :  { %v1970_v29 = vadd.f32 %v1906_v13, %v1710_v14  ;;  %v1711_v30 = vadd.f32 %v1647_v21, %v1451_v19  ;;  %v1452_v32 = vmul.f32 %v3085_v31, %v4200_v8  ;;  %v1648_v35 = vmul.f32 %v3086_v33, %v4203_v9  ;;  %v3101_v13 = vld [vmem:[#allocation8 + $0x108] sm:$0xff]  ;;  %v3107_v31 = vld [vmem:[#allocation8 + $0x510] sm:$0xff] }
 0x1a0   :  { %2358 = vst [vmem:[#allocation10 + $0x2c8] sm:$0xff] %v2228_v22  ;;  %v2229_v17 = vadd.f32 %v2165_v2, %v1969_v23  ;;  %v1908_v37 = vmul.f32 %v3087_v36, %v4213_v50  ;;  %v2168_v39 = vmul.f32 %v3088_v38, %v4216_v15  ;;  %v1453_v41 = vmul.f32 %v3089_v40, %v4200_v8  ;;  %v3103_v19 = vld [vmem:[#allocation8 + $0x508] sm:$0xff]  ;;  %v3105_v23 = vld [vmem:[#allocation8 + $0x110] sm:$0xff] }
 0x1a1   :  { %v2230_v42 = vadd.f32 %v2166_v16, %v1970_v29  ;;  %v1971_v45 = vadd.f32 %v1907_v26, %v1711_v30  ;;  %v1712_v7 = vadd.f32 %v1648_v35, %v1452_v32  ;;  %v1649_v12 = vmul.f32 %v3090_v46, %v4203_v9  ;;  %v3104_v21 = vld [vmem:[#allocation8 + $0x708] sm:$0xff]  ;;  %v3106_v29 = vld [vmem:[#allocation8 + $0x310] sm:$0xff]  ;;  %v3112_v46 = vld [vmem:[#allocation8 + $0x718] sm:$0xff] }
 0x1a2   :  { %2359 = vst [vmem:[#allocation10 + $0x2d0] sm:$0xff] %v2229_v17  ;;  %v1909_v48 = vmul.f32 %v3091_v47, %v4213_v50  ;;  %v2169_v51 = vmul.f32 %v3092_v49, %v4216_v15  ;;  %v1454_v52 = vmul.f32 %v3093_v24, %v4200_v8  ;;  %v1650_v54 = vmul.f32 %v3094_v53, %v4203_v9  ;;  %v3108_v33 = vld [vmem:[#allocation8 + $0x710] sm:$0xff]  ;;  %v3109_v17 = vld [vmem:[#allocation8 + $0x118] sm:$0xff]  ;;  %v3113_v47 = vld [vmem:[#allocation8 + $0x120] sm:$0xff] }
 0x1a3   :  { %2360 = vst [vmem:[#allocation10 + $0x2d8] sm:$0xff] %v2230_v42  ;;  %v2231_v55 = vadd.f32 %v2167_v44, %v1971_v45  ;;  %v1972_v56 = vadd.f32 %v1908_v37, %v1712_v7  ;;  %v1713_v57 = vadd.f32 %v1649_v12, %v1453_v41  ;;  %v1910_v59 = vmul.f32 %v3095_v58, %v4213_v50  ;;  %v3110_v37 = vld [vmem:[#allocation8 + $0x318] sm:$0xff]  ;;  %v3114_v49 = vld [vmem:[#allocation8 + $0x320] sm:$0xff] }
 0x1a4   :  { %v1714_v60 = vadd.f32 %v1650_v54, %v1454_v52  ;;  %v2170_v62 = vmul.f32 %v3096_v61, %v4216_v15  ;;  %v1455_v0 = vmul.f32 %v3097_v63, %v4200_v8  ;;  %v1651_v2 = vmul.f32 %v3098_v1, %v4203_v9  ;;  %v3111_v42 = vld [vmem:[#allocation8 + $0x518] sm:$0xff]  ;;  %v3115_v53 = vld [vmem:[#allocation8 + $0x520] sm:$0xff]  ;;  %v3118_v61 = vld [vmem:[#allocation8 + $0x328] sm:$0xff] }
 0x1a5   :  { %2361 = vst [vmem:[#allocation10 + $0x2e0] sm:$0xff] %v2231_v55  ;;  %v2232_v3 = vadd.f32 %v2168_v39, %v1972_v56  ;;  %v1973_v4 = vadd.f32 %v1909_v48, %v1713_v57  ;;  %v1911_v6 = vmul.f32 %v3099_v5, %v4213_v50  ;;  %v2171_v28 = vmul.f32 %v3100_v27, %v4216_v15  ;;  %v3116_v55 = vld [vmem:[#allocation8 + $0x720] sm:$0xff] }
 0x1a6   :  { %v1974_v10 = vadd.f32 %v1910_v59, %v1714_v60  ;;  %v1715_v11 = vadd.f32 %v1651_v2, %v1455_v0  ;;  %v1456_v14 = vmul.f32 %v3101_v13, %v4200_v8  ;;  %v1652_v16 = vmul.f32 %v3102_v34, %v4203_v9  ;;  %v3117_v59 = vld [vmem:[#allocation8 + $0x128] sm:$0xff]  ;;  %v3123_v13 = vld [vmem:[#allocation8 + $0x530] sm:$0xff] }
 0x1a7   :  { %2362 = vst [vmem:[#allocation10 + $0x2e8] sm:$0xff] %v2232_v3  ;;  %v2233_v18 = vadd.f32 %v2169_v51, %v1973_v4  ;;  %v1912_v20 = vmul.f32 %v3103_v19, %v4213_v50  ;;  %v2172_v22 = vmul.f32 %v3104_v21, %v4216_v15  ;;  %v1457_v25 = vmul.f32 %v3105_v23, %v4200_v8  ;;  %v3119_v0 = vld [vmem:[#allocation8 + $0x528] sm:$0xff]  ;;  %v3121_v4 = vld [vmem:[#allocation8 + $0x130] sm:$0xff] }
 0x1a8   :  { %v2234_v26 = vadd.f32 %v2170_v62, %v1974_v10  ;;  %v1975_v43 = vadd.f32 %v1911_v6, %v1715_v11  ;;  %v1716_v44 = vadd.f32 %v1652_v16, %v1456_v14  ;;  %v1653_v30 = vmul.f32 %v3106_v29, %v4203_v9  ;;  %v3120_v2 = vld [vmem:[#allocation8 + $0x728] sm:$0xff]  ;;  %v3122_v10 = vld [vmem:[#allocation8 + $0x330] sm:$0xff]  ;;  %v3128_v29 = vld [vmem:[#allocation8 + $0x738] sm:$0xff] }
 0x1a9   :  { %2363 = vst [vmem:[#allocation10 + $0x2f0] sm:$0xff] %v2233_v18  ;;  %v1913_v32 = vmul.f32 %v3107_v31, %v4213_v50  ;;  %v2173_v35 = vmul.f32 %v3108_v33, %v4216_v15  ;;  %v1458_v36 = vmul.f32 %v3109_v17, %v4200_v8  ;;  %v1654_v38 = vmul.f32 %v3110_v37, %v4203_v9  ;;  %v3124_v34 = vld [vmem:[#allocation8 + $0x730] sm:$0xff]  ;;  %v3125_v18 = vld [vmem:[#allocation8 + $0x138] sm:$0xff]  ;;  %v3129_v31 = vld [vmem:[#allocation8 + $0x140] sm:$0xff] }
 0x1aa   :  { %2364 = vst [vmem:[#allocation10 + $0x2f8] sm:$0xff] %v2234_v26  ;;  %v2235_v39 = vadd.f32 %v2171_v28, %v1975_v43  ;;  %v1976_v40 = vadd.f32 %v1912_v20, %v1716_v44  ;;  %v1717_v41 = vadd.f32 %v1653_v30, %v1457_v25  ;;  %v1914_v45 = vmul.f32 %v3111_v42, %v4213_v50  ;;  %v3126_v20 = vld [vmem:[#allocation8 + $0x338] sm:$0xff]  ;;  %v3130_v33 = vld [vmem:[#allocation8 + $0x340] sm:$0xff] }
 0x1ab   :  { %v1718_v7 = vadd.f32 %v1654_v38, %v1458_v36  ;;  %v2174_v12 = vmul.f32 %v3112_v46, %v4216_v15  ;;  %v1459_v48 = vmul.f32 %v3113_v47, %v4200_v8  ;;  %v1655_v51 = vmul.f32 %v3114_v49, %v4203_v9  ;;  %v3127_v26 = vld [vmem:[#allocation8 + $0x538] sm:$0xff]  ;;  %v3131_v37 = vld [vmem:[#allocation8 + $0x540] sm:$0xff]  ;;  %v3134_v46 = vld [vmem:[#allocation8 + $0x348] sm:$0xff] }
 0x1ac   :  { %2365 = vst [vmem:[#allocation10 + $0x300] sm:$0xff] %v2235_v39  ;;  %v2236_v24 = vadd.f32 %v2172_v22, %v1976_v40  ;;  %v1977_v52 = vadd.f32 %v1913_v32, %v1717_v41  ;;  %v1915_v54 = vmul.f32 %v3115_v53, %v4213_v50  ;;  %v2175_v56 = vmul.f32 %v3116_v55, %v4216_v15  ;;  %v3132_v39 = vld [vmem:[#allocation8 + $0x740] sm:$0xff] }
 0x1ad   :  { %v1978_v57 = vadd.f32 %v1914_v45, %v1718_v7  ;;  %v1719_v58 = vadd.f32 %v1655_v51, %v1459_v48  ;;  %v1460_v60 = vmul.f32 %v3117_v59, %v4200_v8  ;;  %v1656_v62 = vmul.f32 %v3118_v61, %v4203_v9  ;;  %v3133_v45 = vld [vmem:[#allocation8 + $0x148] sm:$0xff]  ;;  %v3139_v59 = vld [vmem:[#allocation8 + $0x550] sm:$0xff] }
 0x1ae   :  { %2366 = vst [vmem:[#allocation10 + $0x308] sm:$0xff] %v2236_v24  ;;  %v2237_v63 = vadd.f32 %v2173_v35, %v1977_v52  ;;  %v1916_v1 = vmul.f32 %v3119_v0, %v4213_v50  ;;  %v2176_v3 = vmul.f32 %v3120_v2, %v4216_v15  ;;  %v1461_v5 = vmul.f32 %v3121_v4, %v4200_v8  ;;  %v3135_v48 = vld [vmem:[#allocation8 + $0x548] sm:$0xff]  ;;  %v3137_v52 = vld [vmem:[#allocation8 + $0x150] sm:$0xff] }
 0x1af   :  { %v2238_v6 = vadd.f32 %v2174_v12, %v1978_v57  ;;  %v1979_v27 = vadd.f32 %v1915_v54, %v1719_v58  ;;  %v1720_v28 = vadd.f32 %v1656_v62, %v1460_v60  ;;  %v1657_v11 = vmul.f32 %v3122_v10, %v4203_v9  ;;  %v3136_v51 = vld [vmem:[#allocation8 + $0x748] sm:$0xff]  ;;  %v3138_v57 = vld [vmem:[#allocation8 + $0x350] sm:$0xff]  ;;  %v3144_v10 = vld [vmem:[#allocation8 + $0x758] sm:$0xff] }
 0x1b0   :  { %2367 = vst [vmem:[#allocation10 + $0x310] sm:$0xff] %v2237_v63  ;;  %v1917_v14 = vmul.f32 %v3123_v13, %v4213_v50  ;;  %v2177_v16 = vmul.f32 %v3124_v34, %v4216_v15  ;;  %v1462_v19 = vmul.f32 %v3125_v18, %v4200_v8  ;;  %v1658_v21 = vmul.f32 %v3126_v20, %v4203_v9  ;;  %v3140_v61 = vld [vmem:[#allocation8 + $0x750] sm:$0xff]  ;;  %v3141_v63 = vld [vmem:[#allocation8 + $0x158] sm:$0xff]  ;;  %v3145_v13 = vld [vmem:[#allocation8 + $0x160] sm:$0xff] }
 0x1b1   :  { %2368 = vst [vmem:[#allocation10 + $0x318] sm:$0xff] %v2238_v6  ;;  %v2239_v22 = vadd.f32 %v2175_v56, %v1979_v27  ;;  %v1980_v23 = vadd.f32 %v1916_v1, %v1720_v28  ;;  %v1721_v25 = vadd.f32 %v1657_v11, %v1461_v5  ;;  %v1918_v43 = vmul.f32 %v3127_v26, %v4213_v50  ;;  %v3142_v1 = vld [vmem:[#allocation8 + $0x358] sm:$0xff]  ;;  %v3146_v34 = vld [vmem:[#allocation8 + $0x360] sm:$0xff] }
 0x1b2   :  { %v1722_v44 = vadd.f32 %v1658_v21, %v1462_v19  ;;  %v2178_v30 = vmul.f32 %v3128_v29, %v4216_v15  ;;  %v1463_v32 = vmul.f32 %v3129_v31, %v4200_v8  ;;  %v1659_v35 = vmul.f32 %v3130_v33, %v4203_v9  ;;  %v3143_v6 = vld [vmem:[#allocation8 + $0x558] sm:$0xff]  ;;  %v3147_v20 = vld [vmem:[#allocation8 + $0x560] sm:$0xff]  ;;  %v3150_v29 = vld [vmem:[#allocation8 + $0x368] sm:$0xff] }
 0x1b3   :  { %2369 = vst [vmem:[#allocation10 + $0x320] sm:$0xff] %v2239_v22  ;;  %v2240_v17 = vadd.f32 %v2176_v3, %v1980_v23  ;;  %v1981_v36 = vadd.f32 %v1917_v14, %v1721_v25  ;;  %v1919_v38 = vmul.f32 %v3131_v37, %v4213_v50  ;;  %v2179_v40 = vmul.f32 %v3132_v39, %v4216_v15  ;;  %v3148_v22 = vld [vmem:[#allocation8 + $0x760] sm:$0xff] }
 0x1b4   :  { %v1982_v41 = vadd.f32 %v1918_v43, %v1722_v44  ;;  %v1723_v42 = vadd.f32 %v1659_v35, %v1463_v32  ;;  %v1464_v7 = vmul.f32 %v3133_v45, %v4200_v8  ;;  %v1660_v12 = vmul.f32 %v3134_v46, %v4203_v9  ;;  %v3149_v43 = vld [vmem:[#allocation8 + $0x168] sm:$0xff]  ;;  %v3155_v45 = vld [vmem:[#allocation8 + $0x570] sm:$0xff] }
 0x1b5   :  { %2370 = vst [vmem:[#allocation10 + $0x328] sm:$0xff] %v2240_v17  ;;  %v2241_v47 = vadd.f32 %v2177_v16, %v1981_v36  ;;  %v1920_v49 = vmul.f32 %v3135_v48, %v4213_v50  ;;  %v2180_v24 = vmul.f32 %v3136_v51, %v4216_v15  ;;  %v1465_v53 = vmul.f32 %v3137_v52, %v4200_v8  ;;  %v3151_v32 = vld [vmem:[#allocation8 + $0x568] sm:$0xff]  ;;  %v3153_v36 = vld [vmem:[#allocation8 + $0x170] sm:$0xff] }
 0x1b6   :  { %v2242_v54 = vadd.f32 %v2178_v30, %v1982_v41  ;;  %v1983_v55 = vadd.f32 %v1919_v38, %v1723_v42  ;;  %v1724_v56 = vadd.f32 %v1660_v12, %v1464_v7  ;;  %v1661_v58 = vmul.f32 %v3138_v57, %v4203_v9  ;;  %v3152_v35 = vld [vmem:[#allocation8 + $0x768] sm:$0xff]  ;;  %v3154_v41 = vld [vmem:[#allocation8 + $0x370] sm:$0xff]  ;;  %v3160_v57 = vld [vmem:[#allocation8 + $0x778] sm:$0xff] }
 0x1b7   :  { %2371 = vst [vmem:[#allocation10 + $0x330] sm:$0xff] %v2241_v47  ;;  %v1921_v60 = vmul.f32 %v3139_v59, %v4213_v50  ;;  %v2181_v62 = vmul.f32 %v3140_v61, %v4216_v15  ;;  %v1466_v0 = vmul.f32 %v3141_v63, %v4200_v8  ;;  %v1662_v2 = vmul.f32 %v3142_v1, %v4203_v9  ;;  %v3156_v46 = vld [vmem:[#allocation8 + $0x770] sm:$0xff]  ;;  %v3157_v47 = vld [vmem:[#allocation8 + $0x178] sm:$0xff]  ;;  %v3161_v59 = vld [vmem:[#allocation8 + $0x180] sm:$0xff] }
 0x1b8   :  { %2372 = vst [vmem:[#allocation10 + $0x338] sm:$0xff] %v2242_v54  ;;  %v2243_v3 = vadd.f32 %v2179_v40, %v1983_v55  ;;  %v1984_v4 = vadd.f32 %v1920_v49, %v1724_v56  ;;  %v1725_v5 = vadd.f32 %v1661_v58, %v1465_v53  ;;  %v1922_v27 = vmul.f32 %v3143_v6, %v4213_v50  ;;  %v3158_v49 = vld [vmem:[#allocation8 + $0x378] sm:$0xff]  ;;  %v3162_v61 = vld [vmem:[#allocation8 + $0x380] sm:$0xff] }
 0x1b9   :  { %v1726_v28 = vadd.f32 %v1662_v2, %v1466_v0  ;;  %v2182_v11 = vmul.f32 %v3144_v10, %v4216_v15  ;;  %v1467_v14 = vmul.f32 %v3145_v13, %v4200_v8  ;;  %v1663_v16 = vmul.f32 %v3146_v34, %v4203_v9  ;;  %v3159_v54 = vld [vmem:[#allocation8 + $0x578] sm:$0xff]  ;;  %v3163_v1 = vld [vmem:[#allocation8 + $0x580] sm:$0xff]  ;;  %v3166_v10 = vld [vmem:[#allocation8 + $0x388] sm:$0xff] }
 0x1ba   :  { %2373 = vst [vmem:[#allocation10 + $0x340] sm:$0xff] %v2243_v3  ;;  %v2244_v18 = vadd.f32 %v2180_v24, %v1984_v4  ;;  %v1985_v19 = vadd.f32 %v1921_v60, %v1725_v5  ;;  %v1923_v21 = vmul.f32 %v3147_v20, %v4213_v50  ;;  %v2183_v23 = vmul.f32 %v3148_v22, %v4216_v15  ;;  %v3164_v3 = vld [vmem:[#allocation8 + $0x780] sm:$0xff] }
 0x1bb   :  { %v1986_v25 = vadd.f32 %v1922_v27, %v1726_v28  ;;  %v1727_v26 = vadd.f32 %v1663_v16, %v1467_v14  ;;  %v1468_v44 = vmul.f32 %v3149_v43, %v4200_v8  ;;  %v1664_v30 = vmul.f32 %v3150_v29, %v4203_v9  ;;  %v3165_v27 = vld [vmem:[#allocation8 + $0x188] sm:$0xff]  ;;  %v3171_v43 = vld [vmem:[#allocation8 + $0x590] sm:$0xff] }
 0x1bc   :  { %2374 = vst [vmem:[#allocation10 + $0x348] sm:$0xff] %v2244_v18  ;;  %v2245_v31 = vadd.f32 %v2181_v62, %v1985_v19  ;;  %v1924_v33 = vmul.f32 %v3151_v32, %v4213_v50  ;;  %v2184_v17 = vmul.f32 %v3152_v35, %v4216_v15  ;;  %v1469_v37 = vmul.f32 %v3153_v36, %v4200_v8  ;;  %v3167_v14 = vld [vmem:[#allocation8 + $0x588] sm:$0xff]  ;;  %v3169_v19 = vld [vmem:[#allocation8 + $0x190] sm:$0xff] }
 0x1bd   :  { %v2246_v38 = vadd.f32 %v2182_v11, %v1986_v25  ;;  %v1987_v39 = vadd.f32 %v1923_v21, %v1727_v26  ;;  %v1728_v40 = vadd.f32 %v1664_v30, %v1468_v44  ;;  %v1665_v42 = vmul.f32 %v3154_v41, %v4203_v9  ;;  %v3168_v16 = vld [vmem:[#allocation8 + $0x788] sm:$0xff]  ;;  %v3170_v25 = vld [vmem:[#allocation8 + $0x390] sm:$0xff]  ;;  %v3176_v41 = vld [vmem:[#allocation8 + $0x798] sm:$0xff] }
 0x1be   :  { %2375 = vst [vmem:[#allocation10 + $0x350] sm:$0xff] %v2245_v31  ;;  %v1925_v7 = vmul.f32 %v3155_v45, %v4213_v50  ;;  %v2185_v12 = vmul.f32 %v3156_v46, %v4216_v15  ;;  %v1470_v48 = vmul.f32 %v3157_v47, %v4200_v8  ;;  %v1666_v51 = vmul.f32 %v3158_v49, %v4203_v9  ;;  %v3172_v29 = vld [vmem:[#allocation8 + $0x790] sm:$0xff]  ;;  %v3173_v31 = vld [vmem:[#allocation8 + $0x198] sm:$0xff]  ;;  %v3177_v45 = vld [vmem:[#allocation8 + $0x1a0] sm:$0xff] }
 0x1bf   :  { %2376 = vst [vmem:[#allocation10 + $0x358] sm:$0xff] %v2246_v38  ;;  %v2247_v24 = vadd.f32 %v2183_v23, %v1987_v39  ;;  %v1988_v52 = vadd.f32 %v1924_v33, %v1728_v40  ;;  %v1729_v53 = vadd.f32 %v1665_v42, %v1469_v37  ;;  %v1926_v55 = vmul.f32 %v3159_v54, %v4213_v50  ;;  %v3174_v33 = vld [vmem:[#allocation8 + $0x398] sm:$0xff]  ;;  %v3178_v46 = vld [vmem:[#allocation8 + $0x3a0] sm:$0xff] }
 0x1c0   :  { %v1730_v56 = vadd.f32 %v1666_v51, %v1470_v48  ;;  %v2186_v58 = vmul.f32 %v3160_v57, %v4216_v15  ;;  %v1471_v60 = vmul.f32 %v3161_v59, %v4200_v8  ;;  %v1667_v62 = vmul.f32 %v3162_v61, %v4203_v9  ;;  %v3175_v38 = vld [vmem:[#allocation8 + $0x598] sm:$0xff]  ;;  %v3179_v49 = vld [vmem:[#allocation8 + $0x5a0] sm:$0xff]  ;;  %v3182_v57 = vld [vmem:[#allocation8 + $0x3a8] sm:$0xff] }
 0x1c1   :  { %2377 = vst [vmem:[#allocation10 + $0x360] sm:$0xff] %v2247_v24  ;;  %v2248_v63 = vadd.f32 %v2184_v17, %v1988_v52  ;;  %v1989_v0 = vadd.f32 %v1925_v7, %v1729_v53  ;;  %v1927_v2 = vmul.f32 %v3163_v1, %v4213_v50  ;;  %v2187_v4 = vmul.f32 %v3164_v3, %v4216_v15  ;;  %v3180_v24 = vld [vmem:[#allocation8 + $0x7a0] sm:$0xff] }
 0x1c2   :  { %v1990_v5 = vadd.f32 %v1926_v55, %v1730_v56  ;;  %v1731_v6 = vadd.f32 %v1667_v62, %v1471_v60  ;;  %v1472_v28 = vmul.f32 %v3165_v27, %v4200_v8  ;;  %v1668_v11 = vmul.f32 %v3166_v10, %v4203_v9  ;;  %v3181_v55 = vld [vmem:[#allocation8 + $0x1a8] sm:$0xff]  ;;  %v3187_v27 = vld [vmem:[#allocation8 + $0x5b0] sm:$0xff] }
 0x1c3   :  { %2378 = vst [vmem:[#allocation10 + $0x368] sm:$0xff] %v2248_v63  ;;  %v2249_v13 = vadd.f32 %v2185_v12, %v1989_v0  ;;  %v1928_v34 = vmul.f32 %v3167_v14, %v4213_v50  ;;  %v2188_v18 = vmul.f32 %v3168_v16, %v4216_v15  ;;  %v1473_v20 = vmul.f32 %v3169_v19, %v4200_v8  ;;  %v3183_v60 = vld [vmem:[#allocation8 + $0x5a8] sm:$0xff]  ;;  %v3185_v0 = vld [vmem:[#allocation8 + $0x1b0] sm:$0xff] }
 0x1c4   :  { %v2250_v21 = vadd.f32 %v2186_v58, %v1990_v5  ;;  %v1991_v22 = vadd.f32 %v1927_v2, %v1731_v6  ;;  %v1732_v23 = vadd.f32 %v1668_v11, %v1472_v28  ;;  %v1669_v26 = vmul.f32 %v3170_v25, %v4203_v9  ;;  %v3184_v62 = vld [vmem:[#allocation8 + $0x7a8] sm:$0xff]  ;;  %v3186_v5 = vld [vmem:[#allocation8 + $0x3b0] sm:$0xff]  ;;  %v3192_v25 = vld [vmem:[#allocation8 + $0x7b8] sm:$0xff] }
 0x1c5   :  { %2379 = vst [vmem:[#allocation10 + $0x370] sm:$0xff] %v2249_v13  ;;  %v1929_v44 = vmul.f32 %v3171_v43, %v4213_v50  ;;  %v2189_v30 = vmul.f32 %v3172_v29, %v4216_v15  ;;  %v1474_v32 = vmul.f32 %v3173_v31, %v4200_v8  ;;  %v1670_v35 = vmul.f32 %v3174_v33, %v4203_v9  ;;  %v3188_v10 = vld [vmem:[#allocation8 + $0x7b0] sm:$0xff]  ;;  %v3189_v13 = vld [vmem:[#allocation8 + $0x1b8] sm:$0xff]  ;;  %v3193_v43 = vld [vmem:[#allocation8 + $0x1c0] sm:$0xff] }
 0x1c6   :  { %2380 = vst [vmem:[#allocation10 + $0x378] sm:$0xff] %v2250_v21  ;;  %v2251_v17 = vadd.f32 %v2187_v4, %v1991_v22  ;;  %v1992_v36 = vadd.f32 %v1928_v34, %v1732_v23  ;;  %v1733_v37 = vadd.f32 %v1669_v26, %v1473_v20  ;;  %v1930_v39 = vmul.f32 %v3175_v38, %v4213_v50  ;;  %v3190_v34 = vld [vmem:[#allocation8 + $0x3b8] sm:$0xff]  ;;  %v3194_v29 = vld [vmem:[#allocation8 + $0x3c0] sm:$0xff] }
 0x1c7   :  { %v1734_v40 = vadd.f32 %v1670_v35, %v1474_v32  ;;  %v2190_v42 = vmul.f32 %v3176_v41, %v4216_v15  ;;  %v1475_v7 = vmul.f32 %v3177_v45, %v4200_v8  ;;  %v1671_v12 = vmul.f32 %v3178_v46, %v4203_v9  ;;  %v3191_v21 = vld [vmem:[#allocation8 + $0x5b8] sm:$0xff]  ;;  %v3195_v33 = vld [vmem:[#allocation8 + $0x5c0] sm:$0xff]  ;;  %v3198_v41 = vld [vmem:[#allocation8 + $0x3c8] sm:$0xff] }
 0x1c8   :  { %2381 = vst [vmem:[#allocation10 + $0x380] sm:$0xff] %v2251_v17  ;;  %v2252_v47 = vadd.f32 %v2188_v18, %v1992_v36  ;;  %v1993_v48 = vadd.f32 %v1929_v44, %v1733_v37  ;;  %v1931_v51 = vmul.f32 %v3179_v49, %v4213_v50  ;;  %v2191_v52 = vmul.f32 %v3180_v24, %v4216_v15  ;;  %v3196_v17 = vld [vmem:[#allocation8 + $0x7c0] sm:$0xff] }
 0x1c9   :  { %v1994_v53 = vadd.f32 %v1930_v39, %v1734_v40  ;;  %v1735_v54 = vadd.f32 %v1671_v12, %v1475_v7  ;;  %v1476_v56 = vmul.f32 %v3181_v55, %v4200_v8  ;;  %v1672_v58 = vmul.f32 %v3182_v57, %v4203_v9  ;;  %v3197_v39 = vld [vmem:[#allocation8 + $0x1c8] sm:$0xff]  ;;  %v3203_v55 = vld [vmem:[#allocation8 + $0x5d0] sm:$0xff] }
 0x1ca   :  { %2382 = vst [vmem:[#allocation10 + $0x388] sm:$0xff] %v2252_v47  ;;  %v2253_v59 = vadd.f32 %v2189_v30, %v1993_v48  ;;  %v1932_v61 = vmul.f32 %v3183_v60, %v4213_v50  ;;  %v2192_v63 = vmul.f32 %v3184_v62, %v4216_v15  ;;  %v1477_v1 = vmul.f32 %v3185_v0, %v4200_v8  ;;  %v3199_v7 = vld [vmem:[#allocation8 + $0x5c8] sm:$0xff]  ;;  %v3201_v48 = vld [vmem:[#allocation8 + $0x1d0] sm:$0xff] }
 0x1cb   :  { %v2254_v2 = vadd.f32 %v2190_v42, %v1994_v53  ;;  %v1995_v3 = vadd.f32 %v1931_v51, %v1735_v54  ;;  %v1736_v4 = vadd.f32 %v1672_v58, %v1476_v56  ;;  %v1673_v6 = vmul.f32 %v3186_v5, %v4203_v9  ;;  %v3200_v12 = vld [vmem:[#allocation8 + $0x7c8] sm:$0xff]  ;;  %v3202_v53 = vld [vmem:[#allocation8 + $0x3d0] sm:$0xff]  ;;  %v3208_v5 = vld [vmem:[#allocation8 + $0x7d8] sm:$0xff] }
 0x1cc   :  { %2383 = vst [vmem:[#allocation10 + $0x390] sm:$0xff] %v2253_v59  ;;  %v1933_v28 = vmul.f32 %v3187_v27, %v4213_v50  ;;  %v2193_v11 = vmul.f32 %v3188_v10, %v4216_v15  ;;  %v1478_v14 = vmul.f32 %v3189_v13, %v4200_v8  ;;  %v1674_v16 = vmul.f32 %v3190_v34, %v4203_v9  ;;  %v3204_v57 = vld [vmem:[#allocation8 + $0x7d0] sm:$0xff]  ;;  %v3205_v59 = vld [vmem:[#allocation8 + $0x1d8] sm:$0xff]  ;;  %v3209_v27 = vld [vmem:[#allocation8 + $0x1e0] sm:$0xff] }
 0x1cd   :  { %2384 = vst [vmem:[#allocation10 + $0x398] sm:$0xff] %v2254_v2  ;;  %v2255_v18 = vadd.f32 %v2191_v52, %v1995_v3  ;;  %v1996_v19 = vadd.f32 %v1932_v61, %v1736_v4  ;;  %v1737_v20 = vadd.f32 %v1673_v6, %v1477_v1  ;;  %v1934_v22 = vmul.f32 %v3191_v21, %v4213_v50  ;;  %v3206_v61 = vld [vmem:[#allocation8 + $0x3d8] sm:$0xff]  ;;  %v3210_v10 = vld [vmem:[#allocation8 + $0x3e0] sm:$0xff] }
 0x1ce   :  { %v1738_v23 = vadd.f32 %v1674_v16, %v1478_v14  ;;  %v2194_v26 = vmul.f32 %v3192_v25, %v4216_v15  ;;  %v1479_v44 = vmul.f32 %v3193_v43, %v4200_v8  ;;  %v1675_v30 = vmul.f32 %v3194_v29, %v4203_v9  ;;  %v3207_v2 = vld [vmem:[#allocation8 + $0x5d8] sm:$0xff]  ;;  %v3211_v34 = vld [vmem:[#allocation8 + $0x5e0] sm:$0xff]  ;;  %v3214_v25 = vld [vmem:[#allocation8 + $0x3e8] sm:$0xff] }
 0x1cf   :  { %2385 = vst [vmem:[#allocation10 + $0x3a0] sm:$0xff] %v2255_v18  ;;  %v2256_v31 = vadd.f32 %v2192_v63, %v1996_v19  ;;  %v1997_v32 = vadd.f32 %v1933_v28, %v1737_v20  ;;  %v1935_v35 = vmul.f32 %v3195_v33, %v4213_v50  ;;  %v2195_v36 = vmul.f32 %v3196_v17, %v4216_v15  ;;  %v3212_v18 = vld [vmem:[#allocation8 + $0x7e0] sm:$0xff] }
 0x1d0   :  { %v1998_v37 = vadd.f32 %v1934_v22, %v1738_v23  ;;  %v1739_v38 = vadd.f32 %v1675_v30, %v1479_v44  ;;  %v1480_v40 = vmul.f32 %v3197_v39, %v4200_v8  ;;  %v1676_v42 = vmul.f32 %v3198_v41, %v4203_v9  ;;  %v3213_v22 = vld [vmem:[#allocation8 + $0x1e8] sm:$0xff]  ;;  %v3219_v39 = vld [vmem:[#allocation8 + $0x5f0] sm:$0xff] }
 0x1d1   :  { %2386 = vst [vmem:[#allocation10 + $0x3a8] sm:$0xff] %v2256_v31  ;;  %v2257_v45 = vadd.f32 %v2193_v11, %v1997_v32  ;;  %v1936_v46 = vmul.f32 %v3199_v7, %v4213_v50  ;;  %v2196_v47 = vmul.f32 %v3200_v12, %v4216_v15  ;;  %v1481_v49 = vmul.f32 %v3201_v48, %v4200_v8  ;;  %v3215_v44 = vld [vmem:[#allocation8 + $0x5e8] sm:$0xff]  ;;  %v3217_v32 = vld [vmem:[#allocation8 + $0x1f0] sm:$0xff] }
 0x1d2   :  { %v2258_v51 = vadd.f32 %v2194_v26, %v1998_v37  ;;  %v1999_v24 = vadd.f32 %v1935_v35, %v1739_v38  ;;  %v1740_v52 = vadd.f32 %v1676_v42, %v1480_v40  ;;  %v1677_v54 = vmul.f32 %v3202_v53, %v4203_v9  ;;  %v3216_v30 = vld [vmem:[#allocation8 + $0x7e8] sm:$0xff]  ;;  %v3218_v37 = vld [vmem:[#allocation8 + $0x3f0] sm:$0xff]  ;;  %v3224_v53 = vld [vmem:[#allocation8 + $0x7f8] sm:$0xff] }
 0x1d3   :  { %2387 = vst [vmem:[#allocation10 + $0x3b0] sm:$0xff] %v2257_v45  ;;  %v1937_v56 = vmul.f32 %v3203_v55, %v4213_v50  ;;  %v2197_v58 = vmul.f32 %v3204_v57, %v4216_v15  ;;  %v1482_v60 = vmul.f32 %v3205_v59, %v4200_v8  ;;  %v1678_v62 = vmul.f32 %v3206_v61, %v4203_v9  ;;  %v3220_v41 = vld [vmem:[#allocation8 + $0x7f0] sm:$0xff]  ;;  %v3221_v45 = vld [vmem:[#allocation8 + $0x1f8] sm:$0xff] }
 0x1d4   :  { %2388 = vst [vmem:[#allocation10 + $0x3b8] sm:$0xff] %v2258_v51  ;;  %v2259_v63 = vadd.f32 %v2195_v36, %v1999_v24  ;;  %v2000_v0 = vadd.f32 %v1936_v46, %v1740_v52  ;;  %v1741_v1 = vadd.f32 %v1677_v54, %v1481_v49  ;;  %v1938_v3 = vmul.f32 %v3207_v2, %v4213_v50  ;;  %v3222_v46 = vld [vmem:[#allocation8 + $0x3f8] sm:$0xff] }
 0x1d5   :  { %v1742_v4 = vadd.f32 %v1678_v62, %v1482_v60  ;;  %v2198_v6 = vmul.f32 %v3208_v5, %v4216_v15  ;;  %v1483_v28 = vmul.f32 %v3209_v27, %v4200_v8  ;;  %v1679_v11 = vmul.f32 %v3210_v10, %v4203_v9  ;;  %v3223_v51 = vld [vmem:[#allocation8 + $0x5f8] sm:$0xff] }
 0x1d6   :  { %2389 = vst [vmem:[#allocation10 + $0x3c0] sm:$0xff] %v2259_v63  ;;  %v2260_v13 = vadd.f32 %v2196_v47, %v2000_v0  ;;  %v2001_v14 = vadd.f32 %v1937_v56, %v1741_v1  ;;  %v1939_v16 = vmul.f32 %v3211_v34, %v4213_v50  ;;  %v2199_v19 = vmul.f32 %v3212_v18, %v4216_v15 }
 0x1d7   :  { %v2002_v20 = vadd.f32 %v1938_v3, %v1742_v4  ;;  %v1743_v21 = vadd.f32 %v1679_v11, %v1483_v28  ;;  %v1484_v23 = vmul.f32 %v3213_v22, %v4200_v8  ;;  %v1680_v26 = vmul.f32 %v3214_v25, %v4203_v9 }
 0x1d8   :  { %2390 = vst [vmem:[#allocation10 + $0x3c8] sm:$0xff] %v2260_v13  ;;  %v2261_v43 = vadd.f32 %v2197_v58, %v2001_v14  ;;  %v1940_v29 = vmul.f32 %v3215_v44, %v4213_v50  ;;  %v2200_v31 = vmul.f32 %v3216_v30, %v4216_v15  ;;  %v1485_v33 = vmul.f32 %v3217_v32, %v4200_v8 }
 0x1d9   :  { %v2262_v35 = vadd.f32 %v2198_v6, %v2002_v20  ;;  %v2003_v17 = vadd.f32 %v1939_v16, %v1743_v21  ;;  %v1744_v36 = vadd.f32 %v1680_v26, %v1484_v23  ;;  %v1681_v38 = vmul.f32 %v3218_v37, %v4203_v9 }
 0x1da   :  { %2391 = vst [vmem:[#allocation10 + $0x3d0] sm:$0xff] %v2261_v43  ;;  %v1941_v40 = vmul.f32 %v3219_v39, %v4213_v50  ;;  %v2201_v42 = vmul.f32 %v3220_v41, %v4216_v15  ;;  %v1486_v7 = vmul.f32 %v3221_v45, %v4200_v8  ;;  %v1682_v12 = vmul.f32 %v3222_v46, %v4203_v9 }
 0x1db   :  { %2392 = vst [vmem:[#allocation10 + $0x3d8] sm:$0xff] %v2262_v35  ;;  %v2263_v47 = vadd.f32 %v2199_v19, %v2003_v17  ;;  %v2004_v48 = vadd.f32 %v1940_v29, %v1744_v36  ;;  %v1745_v49 = vadd.f32 %v1681_v38, %v1485_v33  ;;  %v1942_v24 = vmul.f32 %v3223_v51, %v4213_v50 }
 0x1dc   :  { %v1746_v52 = vadd.f32 %v1682_v12, %v1486_v7  ;;  %v2202_v54 = vmul.f32 %v3224_v53, %v4216_v15 }
 0x1dd   :  { %2393 = vst [vmem:[#allocation10 + $0x3e0] sm:$0xff] %v2263_v47  ;;  %v2264_v55 = vadd.f32 %v2200_v31, %v2004_v48  ;;  %v2005_v56 = vadd.f32 %v1941_v40, %v1745_v49 }
 0x1de   :  { %v2006_v8 = vadd.f32 %v1942_v24, %v1746_v52 }
 0x1df   :  { %2394 = vst [vmem:[#allocation10 + $0x3e8] sm:$0xff] %v2264_v55  ;;  %v2265_v9 = vadd.f32 %v2201_v42, %v2005_v56 }
 0x1e0   :  { %v2266_v57 = vadd.f32 %v2202_v54, %v2006_v8 }
 0x1e1   :  { %2395 = vst [vmem:[#allocation10 + $0x3f0] sm:$0xff] %v2265_v9 }
 0x1e2   :  { %2396 = vst [vmem:[#allocation10 + $0x3f8] sm:$0xff] %v2266_v57 }
 0x1e3   :  { %2422 = dma.vmem_to_hbm [thread:$0]  %s2415_s22, 16384, %s2417_s25, [#allocation11], %s3334_s28, %s3334_s28, %s3335_s0  }
 0x1e4   :  { %3327 = dma.done.wait [#allocation4], 16384  }
 0x1e5   :  { %3328 = vsyncadd [#allocation4], 4294950912 }
 0x1e6   :  { %3329 = dma.done.wait [#allocation11], 16384  }
 0x1e7   :  { %3330 = vsyncadd [#allocation11], 4294950912 }
 0x1e8   :  { %2431 = vsyncpa [#allocation3], 1 }
 0x1e9   :  { %2432 = vsyncpa [#allocation4], 1 }
 0x1ea   :  { %2433 = vsyncpa [#allocation11], 1 }
 0x1eb   :  { %2434 = vsyncpa [#allocation5], 1 }
 0x1ec   :  { %2435 = vsyncpa [#allocation7], 1 }

</bundles_post_ra>
